<compile_context>
chip_gen: v6e
topology: v6e:2x2x1
jax: 0.10.0
libtpu: 0.0.40
codegen_flags: <defaults>
</compile_context>

<pallas_src>
import jax
import jax.numpy as jnp
import numpy as np
from jax.experimental import pallas as pl
from jax.experimental.pallas import tpu as pltpu


# ------------------------------ fused kernel ---------------------------------

def _conv_block_kernel(x_ref, w1_ref, b1_ref, w2_ref, b2_ref, o_ref,
                       y1_ref, y2_ref, hrow_ref):
    """One batch-slice of: conv3x3+ReLU -> conv3x3+ReLU -> maxpool2x2 (all VMEM)."""

    def conv3x3_relu(src_ref, w9_ref, b_ref, dst_ref):
        nb, hi, wi, ci = src_ref.shape
        co = w9_ref.shape[-1]
        ho, wo = hi - 2, wi - 2
        bsz = nb * ho                                    # batch of row-matmuls
        acc = jnp.zeros((bsz, wo, co), jnp.float32)
        for k in range(9):                               # 9 taps, accumulated on MXU
            dy, dx = divmod(k, 3)
            a = src_ref[:, dy:dy + ho, dx:dx + wo, :]    # (nb, ho, wo, ci) VMEM load
            a = a.reshape(bsz, wo, ci)                   # leading-dim merge (free)
            wk = jnp.broadcast_to(w9_ref[k], (bsz, ci, co))
            acc = acc + jnp.einsum("bwc,bco->bwo", a, wk,
                                   preferred_element_type=jnp.float32)
        y = jnp.maximum(acc + b_ref[...], 0.0)           # bias + ReLU (f32 on VPU)
        dst_ref[...] = y.reshape(nb, ho, wo, co)         # leading-dim split (free)

    # conv1 + ReLU  (x -> y1),  conv2 + ReLU  (y1 -> y2); both stay in VMEM scratch.
    conv3x3_relu(x_ref, w1_ref, b1_ref, y1_ref)
    conv3x3_relu(y1_ref, w2_ref, b2_ref, y2_ref)

    # MaxPool2d(2, 2): pairwise max along H, then along W, all static slices.
    h2, w2 = y2_ref.shape[1], y2_ref.shape[2]
    ph, pw = h2 // 2, w2 // 2
    for i in range(ph):
        hrow_ref[:, i:i + 1, :, :] = jnp.maximum(
            y2_ref[:, 2 * i:2 * i + 1, :, :],
            y2_ref[:, 2 * i + 1:2 * i + 2, :, :])
    for j in range(pw):
        o_ref[:, :, j:j + 1, :] = jnp.maximum(
            hrow_ref[:, :, 2 * j:2 * j + 1, :],
            hrow_ref[:, :, 2 * j + 1:2 * j + 2, :])


# ------------------------------ wrapper ---------------------------------------

def conv_block_forward(x_nhwc, params):
    """TinyVGG_ConvBlock forward. x: (N, H, W, Cin) NHWC, float32."""
    (w1, b1), (w2, b2) = params                          # w: (3,3,Cin,Cout) HWIO
    N, H, W, Cin = x_nhwc.shape
    Ch = w1.shape[-1]
    assert H >= 5 and W >= 5 and (H - 4) % 2 == 0 and (W - 4) % 2 == 0, \
        "need H,W >= 5 and even spatial size after the two valid 3x3 convs"
    H1, W1 = H - 2, W - 2
    H2, W2 = H1 - 2, W1 - 2
    Hp, Wp = H2 // 2, W2 // 2

    # Metadata-only reshapes (contiguous), folded by XLA: k = dy*3 + dx ordering.
    w1_9 = w1.reshape(9, Cin, Ch)
    w2_9 = w2.reshape(9, Ch, Ch)
    b1_2 = b1.reshape(1, Ch)
    b2_2 = b2.reshape(1, Ch)

    return pl.pallas_call(
        _conv_block_kernel,
        out_shape=jax.ShapeDtypeStruct((N, Hp, Wp, Ch), jnp.float32),
        grid=(N,),
        in_specs=[
            pl.BlockSpec((1, H, W, Cin), lambda n: (n, 0, 0, 0)),
            pl.BlockSpec((9, Cin, Ch), lambda n: (0, 0, 0)),
            pl.BlockSpec((1, Ch), lambda n: (0, 0)),
            pl.BlockSpec((9, Ch, Ch), lambda n: (0, 0, 0)),
            pl.BlockSpec((1, Ch), lambda n: (0, 0)),
        ],
        out_specs=pl.BlockSpec((1, Hp, Wp, Ch), lambda n: (n, 0, 0, 0)),
        scratch_shapes=[
            pltpu.VMEM((1, H1, W1, Ch), jnp.float32),   # conv1+ReLU output
            pltpu.VMEM((1, H2, W2, Ch), jnp.float32),   # conv2+ReLU output
            pltpu.VMEM((1, Hp, W2, Ch), jnp.float32),   # H-pooled rows
        ],
        compiler_params=pltpu.CompilerParams(
            dimension_semantics=("parallel",),          # v7x: split batch over 2 TCs
        ),
    )(x_nhwc, w1_9, b1_2, w2_9, b2_2)


# ------------------------------ params & reference ----------------------------

def init_params(key, in_ch, out_ch):
    """PyTorch-style Conv2d init, weights kept in HWIO."""
    k1, k2 = jax.random.split(key)

    def conv_p(k, cin, cout):
        kw, kb = jax.random.split(k)
        bound = 1.0 / np.sqrt(cin * 9)
        w = jax.random.uniform(kw, (3, 3, cin, cout), jnp.float32, -bound, bound)
        b = jax.random.uniform(kb, (cout,), jnp.float32, -bound, bound)
        return w, b

    return conv_p(k1, in_ch, out_ch), conv_p(k2, out_ch, out_ch)


def _ref_forward(x_nhwc, params):
    """Pure-JAX reference (same math) for correctness checking."""
    (w1, b1), (w2, b2) = params

    def conv(x, w, b):
        y = jax.lax.conv_general_dilated(
            x, w, window_strides=(1, 1), padding="VALID",
            dimension_numbers=("NHWC", "HWIO", "NHWC"))
        return jax.nn.relu(y + b)

    x = conv(conv(x_nhwc, w1, b1), w2, b2)
    return jax.lax.reduce_window(x, -jnp.inf, jax.lax.max,
                                 (1, 2, 2, 1), (1, 2, 2, 1), "VALID")


# ------------------------------ main -------------------------------------------

if __name__ == "__main__":
    key = jax.random.PRNGKey(0)
    kx, kp = jax.random.split(key)

    # TinyVGG_ConvBlock(in_channels=3, out_channels=16), x: (N, C, H, W) = (2, 3, 16, 16)
    N, CIN, H, W = 2, 3, 16, 16
    COUT = 16

    x_nchw = jax.random.normal(kx, (N, CIN, H, W), dtype=jnp.float32)
    x_nhwc = jnp.transpose(x_nchw, (0, 2, 3, 1))   # one-time layout change (data side)

    params = init_params(kp, CIN, COUT)

    fwd = jax.jit(conv_block_forward)
    out = jax.block_until_ready(fwd(x_nhwc, params))

    ref = _ref_forward(x_nhwc, params)
    assert out.shape == ((N, (H - 4) // 2, (W - 4) // 2, COUT)), out.shape
    np.testing.assert_allclose(np.asarray(out), np.asarray(ref), rtol=1e-4, atol=1e-4)

    print("KERNEL_OK")
</pallas_src>

<mosaic_0001>
module attributes {stable_mosaic.version = 11 : i64} {
  func.func @_conv_block_kernel(%arg0: i32, %arg1: memref<1x16x16x3xf32, #tpu.memory_space<vmem>>, %arg2: memref<9x3x16xf32, #tpu.memory_space<vmem>>, %arg3: memref<1x16xf32, #tpu.memory_space<vmem>>, %arg4: memref<9x16x16xf32, #tpu.memory_space<vmem>>, %arg5: memref<1x16xf32, #tpu.memory_space<vmem>>, %arg6: memref<1x6x6x16xf32, #tpu.memory_space<vmem>>, %arg7: memref<1x14x14x16xf32, #tpu.memory_space<vmem>>, %arg8: memref<1x12x12x16xf32, #tpu.memory_space<vmem>>, %arg9: memref<1x6x12x16xf32, #tpu.memory_space<vmem>>) attributes {dimension_semantics = [#tpu.dimension_semantics<parallel>], iteration_bounds = array<i64: 2>, scalar_prefetch = 0 : i64, scratch_operands = 3 : i64, tpu.core_type = #tpu.core_type<tc>, window_params = [{transform_indices = @transform_0, window_bounds = array<i64: 1, 16, 16, 3>}, {pipeline_mode = #tpu.pipeline_mode<synchronous>, transform_indices = @transform_1, window_bounds = array<i64: 9, 3, 16>}, {pipeline_mode = #tpu.pipeline_mode<synchronous>, transform_indices = @transform_2, window_bounds = array<i64: 1, 16>}, {pipeline_mode = #tpu.pipeline_mode<synchronous>, transform_indices = @transform_3, window_bounds = array<i64: 9, 16, 16>}, {pipeline_mode = #tpu.pipeline_mode<synchronous>, transform_indices = @transform_4, window_bounds = array<i64: 1, 16>}, {transform_indices = @transform_5, window_bounds = array<i64: 1, 6, 6, 16>}]} {
    %cst = arith.constant 0.000000e+00 : f32
    %0 = vector.broadcast %cst : f32 to vector<14x14x16xf32>
    %c0 = arith.constant 0 : index
    %c0_0 = arith.constant 0 : index
    %c0_1 = arith.constant 0 : index
    %c0_2 = arith.constant 0 : index
    %1 = vector.load %arg1[%c0, %c0_0, %c0_1, %c0_2] : memref<1x16x16x3xf32, #tpu.memory_space<vmem>>, vector<1x14x14x3xf32>
    %2 = vector.shape_cast %1 : vector<1x14x14x3xf32> to vector<14x14x3xf32>
    %c0_3 = arith.constant 0 : index
    %c0_4 = arith.constant 0 : index
    %c0_5 = arith.constant 0 : index
    %3 = vector.load %arg2[%c0_3, %c0_4, %c0_5] : memref<9x3x16xf32, #tpu.memory_space<vmem>>, vector<1x3x16xf32>
    %4 = vector.shape_cast %3 : vector<1x3x16xf32> to vector<3x16xf32>
    %5 = vector.shape_cast %4 : vector<3x16xf32> to vector<1x3x16xf32>
    %6 = vector.broadcast %5 : vector<1x3x16xf32> to vector<14x3x16xf32>
    "tpu.trace_start"() <{level = 10 : i32, message = "bwc,bco->bwo"}> : () -> ()
    %cst_6 = arith.constant dense<0.000000e+00> : vector<14x14x16xf32>
    %7 = tpu.matmul %2, %6, %cst_6 {dimension_numbers = #tpu.dot_dimension_numbers<[2], [1], [1], [2], [0, 0, 0, 1, 1, 2], [0], [0]>} : vector<14x14x3xf32>, vector<14x3x16xf32>, vector<14x14x16xf32> -> vector<14x14x16xf32>
    "tpu.trace_stop"() : () -> ()
    %8 = arith.addf %0, %7 : vector<14x14x16xf32>
    %c0_7 = arith.constant 0 : index
    %c0_8 = arith.constant 0 : index
    %c1 = arith.constant 1 : index
    %c0_9 = arith.constant 0 : index
    %9 = vector.load %arg1[%c0_7, %c0_8, %c1, %c0_9] : memref<1x16x16x3xf32, #tpu.memory_space<vmem>>, vector<1x14x14x3xf32>
    %10 = vector.shape_cast %9 : vector<1x14x14x3xf32> to vector<14x14x3xf32>
    %c1_10 = arith.constant 1 : index
    %c0_11 = arith.constant 0 : index
    %c0_12 = arith.constant 0 : index
    %11 = vector.load %arg2[%c1_10, %c0_11, %c0_12] : memref<9x3x16xf32, #tpu.memory_space<vmem>>, vector<1x3x16xf32>
    %12 = vector.shape_cast %11 : vector<1x3x16xf32> to vector<3x16xf32>
    %13 = vector.shape_cast %12 : vector<3x16xf32> to vector<1x3x16xf32>
    %14 = vector.broadcast %13 : vector<1x3x16xf32> to vector<14x3x16xf32>
    "tpu.trace_start"() <{level = 10 : i32, message = "bwc,bco->bwo"}> : () -> ()
    %cst_13 = arith.constant dense<0.000000e+00> : vector<14x14x16xf32>
    %15 = tpu.matmul %10, %14, %cst_13 {dimension_numbers = #tpu.dot_dimension_numbers<[2], [1], [1], [2], [0, 0, 0, 1, 1, 2], [0], [0]>} : vector<14x14x3xf32>, vector<14x3x16xf32>, vector<14x14x16xf32> -> vector<14x14x16xf32>
    "tpu.trace_stop"() : () -> ()
    %16 = arith.addf %8, %15 : vector<14x14x16xf32>
    %c0_14 = arith.constant 0 : index
    %c0_15 = arith.constant 0 : index
    %c2 = arith.constant 2 : index
    %c0_16 = arith.constant 0 : index
    %17 = vector.load %arg1[%c0_14, %c0_15, %c2, %c0_16] : memref<1x16x16x3xf32, #tpu.memory_space<vmem>>, vector<1x14x14x3xf32>
    %18 = vector.shape_cast %17 : vector<1x14x14x3xf32> to vector<14x14x3xf32>
    %c2_17 = arith.constant 2 : index
    %c0_18 = arith.constant 0 : index
    %c0_19 = arith.constant 0 : index
    %19 = vector.load %arg2[%c2_17, %c0_18, %c0_19] : memref<9x3x16xf32, #tpu.memory_space<vmem>>, vector<1x3x16xf32>
    %20 = vector.shape_cast %19 : vector<1x3x16xf32> to vector<3x16xf32>
    %21 = vector.shape_cast %20 : vector<3x16xf32> to vector<1x3x16xf32>
    %22 = vector.broadcast %21 : vector<1x3x16xf32> to vector<14x3x16xf32>
    "tpu.trace_start"() <{level = 10 : i32, message = "bwc,bco->bwo"}> : () -> ()
    %cst_20 = arith.constant dense<0.000000e+00> : vector<14x14x16xf32>
    %23 = tpu.matmul %18, %22, %cst_20 {dimension_numbers = #tpu.dot_dimension_numbers<[2], [1], [1], [2], [0, 0, 0, 1, 1, 2], [0], [0]>} : vector<14x14x3xf32>, vector<14x3x16xf32>, vector<14x14x16xf32> -> vector<14x14x16xf32>
    "tpu.trace_stop"() : () -> ()
    %24 = arith.addf %16, %23 : vector<14x14x16xf32>
    %c0_21 = arith.constant 0 : index
    %c1_22 = arith.constant 1 : index
    %c0_23 = arith.constant 0 : index
    %c0_24 = arith.constant 0 : index
    %25 = vector.load %arg1[%c0_21, %c1_22, %c0_23, %c0_24] : memref<1x16x16x3xf32, #tpu.memory_space<vmem>>, vector<1x14x14x3xf32>
    %26 = vector.shape_cast %25 : vector<1x14x14x3xf32> to vector<14x14x3xf32>
    %c3 = arith.constant 3 : index
    %c0_25 = arith.constant 0 : index
    %c0_26 = arith.constant 0 : index
    %27 = vector.load %arg2[%c3, %c0_25, %c0_26] : memref<9x3x16xf32, #tpu.memory_space<vmem>>, vector<1x3x16xf32>
    %28 = vector.shape_cast %27 : vector<1x3x16xf32> to vector<3x16xf32>
    %29 = vector.shape_cast %28 : vector<3x16xf32> to vector<1x3x16xf32>
    %30 = vector.broadcast %29 : vector<1x3x16xf32> to vector<14x3x16xf32>
    "tpu.trace_start"() <{level = 10 : i32, message = "bwc,bco->bwo"}> : () -> ()
    %cst_27 = arith.constant dense<0.000000e+00> : vector<14x14x16xf32>
    %31 = tpu.matmul %26, %30, %cst_27 {dimension_numbers = #tpu.dot_dimension_numbers<[2], [1], [1], [2], [0, 0, 0, 1, 1, 2], [0], [0]>} : vector<14x14x3xf32>, vector<14x3x16xf32>, vector<14x14x16xf32> -> vector<14x14x16xf32>
    "tpu.trace_stop"() : () -> ()
    %32 = arith.addf %24, %31 : vector<14x14x16xf32>
    %c0_28 = arith.constant 0 : index
    %c1_29 = arith.constant 1 : index
    %c1_30 = arith.constant 1 : index
    %c0_31 = arith.constant 0 : index
    %33 = vector.load %arg1[%c0_28, %c1_29, %c1_30, %c0_31] : memref<1x16x16x3xf32, #tpu.memory_space<vmem>>, vector<1x14x14x3xf32>
    %34 = vector.shape_cast %33 : vector<1x14x14x3xf32> to vector<14x14x3xf32>
    %c4 = arith.constant 4 : index
    %c0_32 = arith.constant 0 : index
    %c0_33 = arith.constant 0 : index
    %35 = vector.load %arg2[%c4, %c0_32, %c0_33] : memref<9x3x16xf32, #tpu.memory_space<vmem>>, vector<1x3x16xf32>
    %36 = vector.shape_cast %35 : vector<1x3x16xf32> to vector<3x16xf32>
    %37 = vector.shape_cast %36 : vector<3x16xf32> to vector<1x3x16xf32>
    %38 = vector.broadcast %37 : vector<1x3x16xf32> to vector<14x3x16xf32>
    "tpu.trace_start"() <{level = 10 : i32, message = "bwc,bco->bwo"}> : () -> ()
    %cst_34 = arith.constant dense<0.000000e+00> : vector<14x14x16xf32>
    %39 = tpu.matmul %34, %38, %cst_34 {dimension_numbers = #tpu.dot_dimension_numbers<[2], [1], [1], [2], [0, 0, 0, 1, 1, 2], [0], [0]>} : vector<14x14x3xf32>, vector<14x3x16xf32>, vector<14x14x16xf32> -> vector<14x14x16xf32>
    "tpu.trace_stop"() : () -> ()
    %40 = arith.addf %32, %39 : vector<14x14x16xf32>
    %c0_35 = arith.constant 0 : index
    %c1_36 = arith.constant 1 : index
    %c2_37 = arith.constant 2 : index
    %c0_38 = arith.constant 0 : index
    %41 = vector.load %arg1[%c0_35, %c1_36, %c2_37, %c0_38] : memref<1x16x16x3xf32, #tpu.memory_space<vmem>>, vector<1x14x14x3xf32>
    %42 = vector.shape_cast %41 : vector<1x14x14x3xf32> to vector<14x14x3xf32>
    %c5 = arith.constant 5 : index
    %c0_39 = arith.constant 0 : index
    %c0_40 = arith.constant 0 : index
    %43 = vector.load %arg2[%c5, %c0_39, %c0_40] : memref<9x3x16xf32, #tpu.memory_space<vmem>>, vector<1x3x16xf32>
    %44 = vector.shape_cast %43 : vector<1x3x16xf32> to vector<3x16xf32>
    %45 = vector.shape_cast %44 : vector<3x16xf32> to vector<1x3x16xf32>
    %46 = vector.broadcast %45 : vector<1x3x16xf32> to vector<14x3x16xf32>
    "tpu.trace_start"() <{level = 10 : i32, message = "bwc,bco->bwo"}> : () -> ()
    %cst_41 = arith.constant dense<0.000000e+00> : vector<14x14x16xf32>
    %47 = tpu.matmul %42, %46, %cst_41 {dimension_numbers = #tpu.dot_dimension_numbers<[2], [1], [1], [2], [0, 0, 0, 1, 1, 2], [0], [0]>} : vector<14x14x3xf32>, vector<14x3x16xf32>, vector<14x14x16xf32> -> vector<14x14x16xf32>
    "tpu.trace_stop"() : () -> ()
    %48 = arith.addf %40, %47 : vector<14x14x16xf32>
    %c0_42 = arith.constant 0 : index
    %c2_43 = arith.constant 2 : index
    %c0_44 = arith.constant 0 : index
    %c0_45 = arith.constant 0 : index
    %49 = vector.load %arg1[%c0_42, %c2_43, %c0_44, %c0_45] : memref<1x16x16x3xf32, #tpu.memory_space<vmem>>, vector<1x14x14x3xf32>
    %50 = vector.shape_cast %49 : vector<1x14x14x3xf32> to vector<14x14x3xf32>
    %c6 = arith.constant 6 : index
    %c0_46 = arith.constant 0 : index
    %c0_47 = arith.constant 0 : index
    %51 = vector.load %arg2[%c6, %c0_46, %c0_47] : memref<9x3x16xf32, #tpu.memory_space<vmem>>, vector<1x3x16xf32>
    %52 = vector.shape_cast %51 : vector<1x3x16xf32> to vector<3x16xf32>
    %53 = vector.shape_cast %52 : vector<3x16xf32> to vector<1x3x16xf32>
    %54 = vector.broadcast %53 : vector<1x3x16xf32> to vector<14x3x16xf32>
    "tpu.trace_start"() <{level = 10 : i32, message = "bwc,bco->bwo"}> : () -> ()
    %cst_48 = arith.constant dense<0.000000e+00> : vector<14x14x16xf32>
    %55 = tpu.matmul %50, %54, %cst_48 {dimension_numbers = #tpu.dot_dimension_numbers<[2], [1], [1], [2], [0, 0, 0, 1, 1, 2], [0], [0]>} : vector<14x14x3xf32>, vector<14x3x16xf32>, vector<14x14x16xf32> -> vector<14x14x16xf32>
    "tpu.trace_stop"() : () -> ()
    %56 = arith.addf %48, %55 : vector<14x14x16xf32>
    %c0_49 = arith.constant 0 : index
    %c2_50 = arith.constant 2 : index
    %c1_51 = arith.constant 1 : index
    %c0_52 = arith.constant 0 : index
    %57 = vector.load %arg1[%c0_49, %c2_50, %c1_51, %c0_52] : memref<1x16x16x3xf32, #tpu.memory_space<vmem>>, vector<1x14x14x3xf32>
    %58 = vector.shape_cast %57 : vector<1x14x14x3xf32> to vector<14x14x3xf32>
    %c7 = arith.constant 7 : index
    %c0_53 = arith.constant 0 : index
    %c0_54 = arith.constant 0 : index
    %59 = vector.load %arg2[%c7, %c0_53, %c0_54] : memref<9x3x16xf32, #tpu.memory_space<vmem>>, vector<1x3x16xf32>
    %60 = vector.shape_cast %59 : vector<1x3x16xf32> to vector<3x16xf32>
    %61 = vector.shape_cast %60 : vector<3x16xf32> to vector<1x3x16xf32>
    %62 = vector.broadcast %61 : vector<1x3x16xf32> to vector<14x3x16xf32>
    "tpu.trace_start"() <{level = 10 : i32, message = "bwc,bco->bwo"}> : () -> ()
    %cst_55 = arith.constant dense<0.000000e+00> : vector<14x14x16xf32>
    %63 = tpu.matmul %58, %62, %cst_55 {dimension_numbers = #tpu.dot_dimension_numbers<[2], [1], [1], [2], [0, 0, 0, 1, 1, 2], [0], [0]>} : vector<14x14x3xf32>, vector<14x3x16xf32>, vector<14x14x16xf32> -> vector<14x14x16xf32>
    "tpu.trace_stop"() : () -> ()
    %64 = arith.addf %56, %63 : vector<14x14x16xf32>
    %c0_56 = arith.constant 0 : index
    %c2_57 = arith.constant 2 : index
    %c2_58 = arith.constant 2 : index
    %c0_59 = arith.constant 0 : index
    %65 = vector.load %arg1[%c0_56, %c2_57, %c2_58, %c0_59] : memref<1x16x16x3xf32, #tpu.memory_space<vmem>>, vector<1x14x14x3xf32>
    %66 = vector.shape_cast %65 : vector<1x14x14x3xf32> to vector<14x14x3xf32>
    %c8 = arith.constant 8 : index
    %c0_60 = arith.constant 0 : index
    %c0_61 = arith.constant 0 : index
    %67 = vector.load %arg2[%c8, %c0_60, %c0_61] : memref<9x3x16xf32, #tpu.memory_space<vmem>>, vector<1x3x16xf32>
    %68 = vector.shape_cast %67 : vector<1x3x16xf32> to vector<3x16xf32>
    %69 = vector.shape_cast %68 : vector<3x16xf32> to vector<1x3x16xf32>
    %70 = vector.broadcast %69 : vector<1x3x16xf32> to vector<14x3x16xf32>
    "tpu.trace_start"() <{level = 10 : i32, message = "bwc,bco->bwo"}> : () -> ()
    %cst_62 = arith.constant dense<0.000000e+00> : vector<14x14x16xf32>
    %71 = tpu.matmul %66, %70, %cst_62 {dimension_numbers = #tpu.dot_dimension_numbers<[2], [1], [1], [2], [0, 0, 0, 1, 1, 2], [0], [0]>} : vector<14x14x3xf32>, vector<14x3x16xf32>, vector<14x14x16xf32> -> vector<14x14x16xf32>
    "tpu.trace_stop"() : () -> ()
    %72 = arith.addf %64, %71 : vector<14x14x16xf32>
    %c0_63 = arith.constant 0 : index
    %c0_64 = arith.constant 0 : index
    %73 = vector.load %arg3[%c0_63, %c0_64] : memref<1x16xf32, #tpu.memory_space<vmem>>, vector<1x16xf32>
    %74 = vector.shape_cast %73 : vector<1x16xf32> to vector<1x1x16xf32>
    %75 = vector.broadcast %74 : vector<1x1x16xf32> to vector<14x14x16xf32>
    %76 = arith.addf %72, %75 : vector<14x14x16xf32>
    %cst_65 = arith.constant 0.000000e+00 : f32
    %77 = vector.broadcast %cst_65 : f32 to vector<14x14x16xf32>
    %78 = arith.maximumf %76, %77 : vector<14x14x16xf32>
    %79 = vector.shape_cast %78 : vector<14x14x16xf32> to vector<1x14x14x16xf32>
    %c0_66 = arith.constant 0 : index
    %c0_67 = arith.constant 0 : index
    %c0_68 = arith.constant 0 : index
    %c0_69 = arith.constant 0 : index
    %80 = vector.load %arg7[%c0_66, %c0_67, %c0_68, %c0_69] : memref<1x14x14x16xf32, #tpu.memory_space<vmem>>, vector<1x14x14x16xf32>
    tpu.vector_store %arg7[%c0_66, %c0_67, %c0_68, %c0_69], %79 {strides = array<i32>} : memref<1x14x14x16xf32, #tpu.memory_space<vmem>>, vector<1x14x14x16xf32>,
    %cst_70 = arith.constant 0.000000e+00 : f32
    %81 = vector.broadcast %cst_70 : f32 to vector<12x12x16xf32>
    %c0_71 = arith.constant 0 : index
    %c0_72 = arith.constant 0 : index
    %c0_73 = arith.constant 0 : index
    %c0_74 = arith.constant 0 : index
    %82 = vector.load %arg7[%c0_71, %c0_72, %c0_73, %c0_74] : memref<1x14x14x16xf32, #tpu.memory_space<vmem>>, vector<1x12x12x16xf32>
    %83 = vector.shape_cast %82 : vector<1x12x12x16xf32> to vector<12x12x16xf32>
    %c0_75 = arith.constant 0 : index
    %c0_76 = arith.constant 0 : index
    %c0_77 = arith.constant 0 : index
    %84 = vector.load %arg4[%c0_75, %c0_76, %c0_77] : memref<9x16x16xf32, #tpu.memory_space<vmem>>, vector<1x16x16xf32>
    %85 = vector.shape_cast %84 : vector<1x16x16xf32> to vector<16x16xf32>
    %86 = vector.shape_cast %85 : vector<16x16xf32> to vector<1x16x16xf32>
    %87 = vector.broadcast %86 : vector<1x16x16xf32> to vector<12x16x16xf32>
    "tpu.trace_start"() <{level = 10 : i32, message = "bwc,bco->bwo"}> : () -> ()
    %cst_78 = arith.constant dense<0.000000e+00> : vector<12x12x16xf32>
    %88 = tpu.matmul %83, %87, %cst_78 {dimension_numbers = #tpu.dot_dimension_numbers<[2], [1], [1], [2], [0, 0, 0, 1, 1, 2], [0], [0]>} : vector<12x12x16xf32>, vector<12x16x16xf32>, vector<12x12x16xf32> -> vector<12x12x16xf32>
    "tpu.trace_stop"() : () -> ()
    %89 = arith.addf %81, %88 : vector<12x12x16xf32>
    %c0_79 = arith.constant 0 : index
    %c0_80 = arith.constant 0 : index
    %c1_81 = arith.constant 1 : index
    %c0_82 = arith.constant 0 : index
    %90 = vector.load %arg7[%c0_79, %c0_80, %c1_81, %c0_82] : memref<1x14x14x16xf32, #tpu.memory_space<vmem>>, vector<1x12x12x16xf32>
    %91 = vector.shape_cast %90 : vector<1x12x12x16xf32> to vector<12x12x16xf32>
    %c1_83 = arith.constant 1 : index
    %c0_84 = arith.constant 0 : index
    %c0_85 = arith.constant 0 : index
    %92 = vector.load %arg4[%c1_83, %c0_84, %c0_85] : memref<9x16x16xf32, #tpu.memory_space<vmem>>, vector<1x16x16xf32>
    %93 = vector.shape_cast %92 : vector<1x16x16xf32> to vector<16x16xf32>
    %94 = vector.shape_cast %93 : vector<16x16xf32> to vector<1x16x16xf32>
    %95 = vector.broadcast %94 : vector<1x16x16xf32> to vector<12x16x16xf32>
    "tpu.trace_start"() <{level = 10 : i32, message = "bwc,bco->bwo"}> : () -> ()
    %cst_86 = arith.constant dense<0.000000e+00> : vector<12x12x16xf32>
    %96 = tpu.matmul %91, %95, %cst_86 {dimension_numbers = #tpu.dot_dimension_numbers<[2], [1], [1], [2], [0, 0, 0, 1, 1, 2], [0], [0]>} : vector<12x12x16xf32>, vector<12x16x16xf32>, vector<12x12x16xf32> -> vector<12x12x16xf32>
    "tpu.trace_stop"() : () -> ()
    %97 = arith.addf %89, %96 : vector<12x12x16xf32>
    %c0_87 = arith.constant 0 : index
    %c0_88 = arith.constant 0 : index
    %c2_89 = arith.constant 2 : index
    %c0_90 = arith.constant 0 : index
    %98 = vector.load %arg7[%c0_87, %c0_88, %c2_89, %c0_90] : memref<1x14x14x16xf32, #tpu.memory_space<vmem>>, vector<1x12x12x16xf32>
    %99 = vector.shape_cast %98 : vector<1x12x12x16xf32> to vector<12x12x16xf32>
    %c2_91 = arith.constant 2 : index
    %c0_92 = arith.constant 0 : index
    %c0_93 = arith.constant 0 : index
    %100 = vector.load %arg4[%c2_91, %c0_92, %c0_93] : memref<9x16x16xf32, #tpu.memory_space<vmem>>, vector<1x16x16xf32>
    %101 = vector.shape_cast %100 : vector<1x16x16xf32> to vector<16x16xf32>
    %102 = vector.shape_cast %101 : vector<16x16xf32> to vector<1x16x16xf32>
    %103 = vector.broadcast %102 : vector<1x16x16xf32> to vector<12x16x16xf32>
    "tpu.trace_start"() <{level = 10 : i32, message = "bwc,bco->bwo"}> : () -> ()
    %cst_94 = arith.constant dense<0.000000e+00> : vector<12x12x16xf32>
    %104 = tpu.matmul %99, %103, %cst_94 {dimension_numbers = #tpu.dot_dimension_numbers<[2], [1], [1], [2], [0, 0, 0, 1, 1, 2], [0], [0]>} : vector<12x12x16xf32>, vector<12x16x16xf32>, vector<12x12x16xf32> -> vector<12x12x16xf32>
    "tpu.trace_stop"() : () -> ()
    %105 = arith.addf %97, %104 : vector<12x12x16xf32>
    %c0_95 = arith.constant 0 : index
    %c1_96 = arith.constant 1 : index
    %c0_97 = arith.constant 0 : index
    %c0_98 = arith.constant 0 : index
    %106 = vector.load %arg7[%c0_95, %c1_96, %c0_97, %c0_98] : memref<1x14x14x16xf32, #tpu.memory_space<vmem>>, vector<1x12x12x16xf32>
    %107 = vector.shape_cast %106 : vector<1x12x12x16xf32> to vector<12x12x16xf32>
    %c3_99 = arith.constant 3 : index
    %c0_100 = arith.constant 0 : index
    %c0_101 = arith.constant 0 : index
    %108 = vector.load %arg4[%c3_99, %c0_100, %c0_101] : memref<9x16x16xf32, #tpu.memory_space<vmem>>, vector<1x16x16xf32>
    %109 = vector.shape_cast %108 : vector<1x16x16xf32> to vector<16x16xf32>
    %110 = vector.shape_cast %109 : vector<16x16xf32> to vector<1x16x16xf32>
    %111 = vector.broadcast %110 : vector<1x16x16xf32> to vector<12x16x16xf32>
    "tpu.trace_start"() <{level = 10 : i32, message = "bwc,bco->bwo"}> : () -> ()
    %cst_102 = arith.constant dense<0.000000e+00> : vector<12x12x16xf32>
    %112 = tpu.matmul %107, %111, %cst_102 {dimension_numbers = #tpu.dot_dimension_numbers<[2], [1], [1], [2], [0, 0, 0, 1, 1, 2], [0], [0]>} : vector<12x12x16xf32>, vector<12x16x16xf32>, vector<12x12x16xf32> -> vector<12x12x16xf32>
    "tpu.trace_stop"() : () -> ()
    %113 = arith.addf %105, %112 : vector<12x12x16xf32>
    %c0_103 = arith.constant 0 : index
    %c1_104 = arith.constant 1 : index
    %c1_105 = arith.constant 1 : index
    %c0_106 = arith.constant 0 : index
    %114 = vector.load %arg7[%c0_103, %c1_104, %c1_105, %c0_106] : memref<1x14x14x16xf32, #tpu.memory_space<vmem>>, vector<1x12x12x16xf32>
    %115 = vector.shape_cast %114 : vector<1x12x12x16xf32> to vector<12x12x16xf32>
    %c4_107 = arith.constant 4 : index
    %c0_108 = arith.constant 0 : index
    %c0_109 = arith.constant 0 : index
    %116 = vector.load %arg4[%c4_107, %c0_108, %c0_109] : memref<9x16x16xf32, #tpu.memory_space<vmem>>, vector<1x16x16xf32>
    %117 = vector.shape_cast %116 : vector<1x16x16xf32> to vector<16x16xf32>
    %118 = vector.shape_cast %117 : vector<16x16xf32> to vector<1x16x16xf32>
    %119 = vector.broadcast %118 : vector<1x16x16xf32> to vector<12x16x16xf32>
    "tpu.trace_start"() <{level = 10 : i32, message = "bwc,bco->bwo"}> : () -> ()
    %cst_110 = arith.constant dense<0.000000e+00> : vector<12x12x16xf32>
    %120 = tpu.matmul %115, %119, %cst_110 {dimension_numbers = #tpu.dot_dimension_numbers<[2], [1], [1], [2], [0, 0, 0, 1, 1, 2], [0], [0]>} : vector<12x12x16xf32>, vector<12x16x16xf32>, vector<12x12x16xf32> -> vector<12x12x16xf32>
    "tpu.trace_stop"() : () -> ()
    %121 = arith.addf %113, %120 : vector<12x12x16xf32>
    %c0_111 = arith.constant 0 : index
    %c1_112 = arith.constant 1 : index
    %c2_113 = arith.constant 2 : index
    %c0_114 = arith.constant 0 : index
    %122 = vector.load %arg7[%c0_111, %c1_112, %c2_113, %c0_114] : memref<1x14x14x16xf32, #tpu.memory_space<vmem>>, vector<1x12x12x16xf32>
    %123 = vector.shape_cast %122 : vector<1x12x12x16xf32> to vector<12x12x16xf32>
    %c5_115 = arith.constant 5 : index
    %c0_116 = arith.constant 0 : index
    %c0_117 = arith.constant 0 : index
    %124 = vector.load %arg4[%c5_115, %c0_116, %c0_117] : memref<9x16x16xf32, #tpu.memory_space<vmem>>, vector<1x16x16xf32>
    %125 = vector.shape_cast %124 : vector<1x16x16xf32> to vector<16x16xf32>
    %126 = vector.shape_cast %125 : vector<16x16xf32> to vector<1x16x16xf32>
    %127 = vector.broadcast %126 : vector<1x16x16xf32> to vector<12x16x16xf32>
    "tpu.trace_start"() <{level = 10 : i32, message = "bwc,bco->bwo"}> : () -> ()
    %cst_118 = arith.constant dense<0.000000e+00> : vector<12x12x16xf32>
    %128 = tpu.matmul %123, %127, %cst_118 {dimension_numbers = #tpu.dot_dimension_numbers<[2], [1], [1], [2], [0, 0, 0, 1, 1, 2], [0], [0]>} : vector<12x12x16xf32>, vector<12x16x16xf32>, vector<12x12x16xf32> -> vector<12x12x16xf32>
    "tpu.trace_stop"() : () -> ()
    %129 = arith.addf %121, %128 : vector<12x12x16xf32>
    %c0_119 = arith.constant 0 : index
    %c2_120 = arith.constant 2 : index
    %c0_121 = arith.constant 0 : index
    %c0_122 = arith.constant 0 : index
    %130 = vector.load %arg7[%c0_119, %c2_120, %c0_121, %c0_122] : memref<1x14x14x16xf32, #tpu.memory_space<vmem>>, vector<1x12x12x16xf32>
    %131 = vector.shape_cast %130 : vector<1x12x12x16xf32> to vector<12x12x16xf32>
    %c6_123 = arith.constant 6 : index
    %c0_124 = arith.constant 0 : index
    %c0_125 = arith.constant 0 : index
    %132 = vector.load %arg4[%c6_123, %c0_124, %c0_125] : memref<9x16x16xf32, #tpu.memory_space<vmem>>, vector<1x16x16xf32>
    %133 = vector.shape_cast %132 : vector<1x16x16xf32> to vector<16x16xf32>
    %134 = vector.shape_cast %133 : vector<16x16xf32> to vector<1x16x16xf32>
    %135 = vector.broadcast %134 : vector<1x16x16xf32> to vector<12x16x16xf32>
    "tpu.trace_start"() <{level = 10 : i32, message = "bwc,bco->bwo"}> : () -> ()
    %cst_126 = arith.constant dense<0.000000e+00> : vector<12x12x16xf32>
    %136 = tpu.matmul %131, %135, %cst_126 {dimension_numbers = #tpu.dot_dimension_numbers<[2], [1], [1], [2], [0, 0, 0, 1, 1, 2], [0], [0]>} : vector<12x12x16xf32>, vector<12x16x16xf32>, vector<12x12x16xf32> -> vector<12x12x16xf32>
    "tpu.trace_stop"() : () -> ()
    %137 = arith.addf %129, %136 : vector<12x12x16xf32>
    %c0_127 = arith.constant 0 : index
    %c2_128 = arith.constant 2 : index
    %c1_129 = arith.constant 1 : index
    %c0_130 = arith.constant 0 : index
    %138 = vector.load %arg7[%c0_127, %c2_128, %c1_129, %c0_130] : memref<1x14x14x16xf32, #tpu.memory_space<vmem>>, vector<1x12x12x16xf32>
    %139 = vector.shape_cast %138 : vector<1x12x12x16xf32> to vector<12x12x16xf32>
    %c7_131 = arith.constant 7 : index
    %c0_132 = arith.constant 0 : index
    %c0_133 = arith.constant 0 : index
    %140 = vector.load %arg4[%c7_131, %c0_132, %c0_133] : memref<9x16x16xf32, #tpu.memory_space<vmem>>, vector<1x16x16xf32>
    %141 = vector.shape_cast %140 : vector<1x16x16xf32> to vector<16x16xf32>
    %142 = vector.shape_cast %141 : vector<16x16xf32> to vector<1x16x16xf32>
    %143 = vector.broadcast %142 : vector<1x16x16xf32> to vector<12x16x16xf32>
    "tpu.trace_start"() <{level = 10 : i32, message = "bwc,bco->bwo"}> : () -> ()
    %cst_134 = arith.constant dense<0.000000e+00> : vector<12x12x16xf32>
    %144 = tpu.matmul %139, %143, %cst_134 {dimension_numbers = #tpu.dot_dimension_numbers<[2], [1], [1], [2], [0, 0, 0, 1, 1, 2], [0], [0]>} : vector<12x12x16xf32>, vector<12x16x16xf32>, vector<12x12x16xf32> -> vector<12x12x16xf32>
    "tpu.trace_stop"() : () -> ()
    %145 = arith.addf %137, %144 : vector<12x12x16xf32>
    %c0_135 = arith.constant 0 : index
    %c2_136 = arith.constant 2 : index
    %c2_137 = arith.constant 2 : index
    %c0_138 = arith.constant 0 : index
    %146 = vector.load %arg7[%c0_135, %c2_136, %c2_137, %c0_138] : memref<1x14x14x16xf32, #tpu.memory_space<vmem>>, vector<1x12x12x16xf32>
    %147 = vector.shape_cast %146 : vector<1x12x12x16xf32> to vector<12x12x16xf32>
    %c8_139 = arith.constant 8 : index
    %c0_140 = arith.constant 0 : index
    %c0_141 = arith.constant 0 : index
    %148 = vector.load %arg4[%c8_139, %c0_140, %c0_141] : memref<9x16x16xf32, #tpu.memory_space<vmem>>, vector<1x16x16xf32>
    %149 = vector.shape_cast %148 : vector<1x16x16xf32> to vector<16x16xf32>
    %150 = vector.shape_cast %149 : vector<16x16xf32> to vector<1x16x16xf32>
    %151 = vector.broadcast %150 : vector<1x16x16xf32> to vector<12x16x16xf32>
    "tpu.trace_start"() <{level = 10 : i32, message = "bwc,bco->bwo"}> : () -> ()
    %cst_142 = arith.constant dense<0.000000e+00> : vector<12x12x16xf32>
    %152 = tpu.matmul %147, %151, %cst_142 {dimension_numbers = #tpu.dot_dimension_numbers<[2], [1], [1], [2], [0, 0, 0, 1, 1, 2], [0], [0]>} : vector<12x12x16xf32>, vector<12x16x16xf32>, vector<12x12x16xf32> -> vector<12x12x16xf32>
    "tpu.trace_stop"() : () -> ()
    %153 = arith.addf %145, %152 : vector<12x12x16xf32>
    %c0_143 = arith.constant 0 : index
    %c0_144 = arith.constant 0 : index
    %154 = vector.load %arg5[%c0_143, %c0_144] : memref<1x16xf32, #tpu.memory_space<vmem>>, vector<1x16xf32>
    %155 = vector.shape_cast %154 : vector<1x16xf32> to vector<1x1x16xf32>
    %156 = vector.broadcast %155 : vector<1x1x16xf32> to vector<12x12x16xf32>
    %157 = arith.addf %153, %156 : vector<12x12x16xf32>
    %cst_145 = arith.constant 0.000000e+00 : f32
    %158 = vector.broadcast %cst_145 : f32 to vector<12x12x16xf32>
    %159 = arith.maximumf %157, %158 : vector<12x12x16xf32>
    %160 = vector.shape_cast %159 : vector<12x12x16xf32> to vector<1x12x12x16xf32>
    %c0_146 = arith.constant 0 : index
    %c0_147 = arith.constant 0 : index
    %c0_148 = arith.constant 0 : index
    %c0_149 = arith.constant 0 : index
    %161 = vector.load %arg8[%c0_146, %c0_147, %c0_148, %c0_149] : memref<1x12x12x16xf32, #tpu.memory_space<vmem>>, vector<1x12x12x16xf32>
    tpu.vector_store %arg8[%c0_146, %c0_147, %c0_148, %c0_149], %160 {strides = array<i32>} : memref<1x12x12x16xf32, #tpu.memory_space<vmem>>, vector<1x12x12x16xf32>,
    %c0_150 = arith.constant 0 : index
    %c0_151 = arith.constant 0 : index
    %c0_152 = arith.constant 0 : index
    %c0_153 = arith.constant 0 : index
    %162 = vector.load %arg8[%c0_150, %c0_151, %c0_152, %c0_153] : memref<1x12x12x16xf32, #tpu.memory_space<vmem>>, vector<1x1x12x16xf32>
    %c0_154 = arith.constant 0 : index
    %c1_155 = arith.constant 1 : index
    %c0_156 = arith.constant 0 : index
    %c0_157 = arith.constant 0 : index
    %163 = vector.load %arg8[%c0_154, %c1_155, %c0_156, %c0_157] : memref<1x12x12x16xf32, #tpu.memory_space<vmem>>, vector<1x1x12x16xf32>
    %164 = arith.maximumf %162, %163 : vector<1x1x12x16xf32>
    %c0_158 = arith.constant 0 : index
    %c0_159 = arith.constant 0 : index
    %c0_160 = arith.constant 0 : index
    %c0_161 = arith.constant 0 : index
    %165 = vector.load %arg9[%c0_158, %c0_159, %c0_160, %c0_161] : memref<1x6x12x16xf32, #tpu.memory_space<vmem>>, vector<1x1x12x16xf32>
    tpu.vector_store %arg9[%c0_158, %c0_159, %c0_160, %c0_161], %164 {strides = array<i32>} : memref<1x6x12x16xf32, #tpu.memory_space<vmem>>, vector<1x1x12x16xf32>,
    %c0_162 = arith.constant 0 : index
    %c2_163 = arith.constant 2 : index
    %c0_164 = arith.constant 0 : index
    %c0_165 = arith.constant 0 : index
    %166 = vector.load %arg8[%c0_162, %c2_163, %c0_164, %c0_165] : memref<1x12x12x16xf32, #tpu.memory_space<vmem>>, vector<1x1x12x16xf32>
    %c0_166 = arith.constant 0 : index
    %c3_167 = arith.constant 3 : index
    %c0_168 = arith.constant 0 : index
    %c0_169 = arith.constant 0 : index
    %167 = vector.load %arg8[%c0_166, %c3_167, %c0_168, %c0_169] : memref<1x12x12x16xf32, #tpu.memory_space<vmem>>, vector<1x1x12x16xf32>
    %168 = arith.maximumf %166, %167 : vector<1x1x12x16xf32>
    %c0_170 = arith.constant 0 : index
    %c1_171 = arith.constant 1 : index
    %c0_172 = arith.constant 0 : index
    %c0_173 = arith.constant 0 : index
    %169 = vector.load %arg9[%c0_170, %c1_171, %c0_172, %c0_173] : memref<1x6x12x16xf32, #tpu.memory_space<vmem>>, vector<1x1x12x16xf32>
    tpu.vector_store %arg9[%c0_170, %c1_171, %c0_172, %c0_173], %168 {strides = array<i32>} : memref<1x6x12x16xf32, #tpu.memory_space<vmem>>, vector<1x1x12x16xf32>,
    %c0_174 = arith.constant 0 : index
    %c4_175 = arith.constant 4 : index
    %c0_176 = arith.constant 0 : index
    %c0_177 = arith.constant 0 : index
    %170 = vector.load %arg8[%c0_174, %c4_175, %c0_176, %c0_177] : memref<1x12x12x16xf32, #tpu.memory_space<vmem>>, vector<1x1x12x16xf32>
    %c0_178 = arith.constant 0 : index
    %c5_179 = arith.constant 5 : index
    %c0_180 = arith.constant 0 : index
    %c0_181 = arith.constant 0 : index
    %171 = vector.load %arg8[%c0_178, %c5_179, %c0_180, %c0_181] : memref<1x12x12x16xf32, #tpu.memory_space<vmem>>, vector<1x1x12x16xf32>
    %172 = arith.maximumf %170, %171 : vector<1x1x12x16xf32>
    %c0_182 = arith.constant 0 : index
    %c2_183 = arith.constant 2 : index
    %c0_184 = arith.constant 0 : index
    %c0_185 = arith.constant 0 : index
    %173 = vector.load %arg9[%c0_182, %c2_183, %c0_184, %c0_185] : memref<1x6x12x16xf32, #tpu.memory_space<vmem>>, vector<1x1x12x16xf32>
    tpu.vector_store %arg9[%c0_182, %c2_183, %c0_184, %c0_185], %172 {strides = array<i32>} : memref<1x6x12x16xf32, #tpu.memory_space<vmem>>, vector<1x1x12x16xf32>,
    %c0_186 = arith.constant 0 : index
    %c6_187 = arith.constant 6 : index
    %c0_188 = arith.constant 0 : index
    %c0_189 = arith.constant 0 : index
    %174 = vector.load %arg8[%c0_186, %c6_187, %c0_188, %c0_189] : memref<1x12x12x16xf32, #tpu.memory_space<vmem>>, vector<1x1x12x16xf32>
    %c0_190 = arith.constant 0 : index
    %c7_191 = arith.constant 7 : index
    %c0_192 = arith.constant 0 : index
    %c0_193 = arith.constant 0 : index
    %175 = vector.load %arg8[%c0_190, %c7_191, %c0_192, %c0_193] : memref<1x12x12x16xf32, #tpu.memory_space<vmem>>, vector<1x1x12x16xf32>
    %176 = arith.maximumf %174, %175 : vector<1x1x12x16xf32>
    %c0_194 = arith.constant 0 : index
    %c3_195 = arith.constant 3 : index
    %c0_196 = arith.constant 0 : index
    %c0_197 = arith.constant 0 : index
    %177 = vector.load %arg9[%c0_194, %c3_195, %c0_196, %c0_197] : memref<1x6x12x16xf32, #tpu.memory_space<vmem>>, vector<1x1x12x16xf32>
    tpu.vector_store %arg9[%c0_194, %c3_195, %c0_196, %c0_197], %176 {strides = array<i32>} : memref<1x6x12x16xf32, #tpu.memory_space<vmem>>, vector<1x1x12x16xf32>,
    %c0_198 = arith.constant 0 : index
    %c8_199 = arith.constant 8 : index
    %c0_200 = arith.constant 0 : index
    %c0_201 = arith.constant 0 : index
    %178 = vector.load %arg8[%c0_198, %c8_199, %c0_200, %c0_201] : memref<1x12x12x16xf32, #tpu.memory_space<vmem>>, vector<1x1x12x16xf32>
    %c0_202 = arith.constant 0 : index
    %c9 = arith.constant 9 : index
    %c0_203 = arith.constant 0 : index
    %c0_204 = arith.constant 0 : index
    %179 = vector.load %arg8[%c0_202, %c9, %c0_203, %c0_204] : memref<1x12x12x16xf32, #tpu.memory_space<vmem>>, vector<1x1x12x16xf32>
    %180 = arith.maximumf %178, %179 : vector<1x1x12x16xf32>
    %c0_205 = arith.constant 0 : index
    %c4_206 = arith.constant 4 : index
    %c0_207 = arith.constant 0 : index
    %c0_208 = arith.constant 0 : index
    %181 = vector.load %arg9[%c0_205, %c4_206, %c0_207, %c0_208] : memref<1x6x12x16xf32, #tpu.memory_space<vmem>>, vector<1x1x12x16xf32>
    tpu.vector_store %arg9[%c0_205, %c4_206, %c0_207, %c0_208], %180 {strides = array<i32>} : memref<1x6x12x16xf32, #tpu.memory_space<vmem>>, vector<1x1x12x16xf32>,
    %c0_209 = arith.constant 0 : index
    %c10 = arith.constant 10 : index
    %c0_210 = arith.constant 0 : index
    %c0_211 = arith.constant 0 : index
    %182 = vector.load %arg8[%c0_209, %c10, %c0_210, %c0_211] : memref<1x12x12x16xf32, #tpu.memory_space<vmem>>, vector<1x1x12x16xf32>
    %c0_212 = arith.constant 0 : index
    %c11 = arith.constant 11 : index
    %c0_213 = arith.constant 0 : index
    %c0_214 = arith.constant 0 : index
    %183 = vector.load %arg8[%c0_212, %c11, %c0_213, %c0_214] : memref<1x12x12x16xf32, #tpu.memory_space<vmem>>, vector<1x1x12x16xf32>
    %184 = arith.maximumf %182, %183 : vector<1x1x12x16xf32>
    %c0_215 = arith.constant 0 : index
    %c5_216 = arith.constant 5 : index
    %c0_217 = arith.constant 0 : index
    %c0_218 = arith.constant 0 : index
    %185 = vector.load %arg9[%c0_215, %c5_216, %c0_217, %c0_218] : memref<1x6x12x16xf32, #tpu.memory_space<vmem>>, vector<1x1x12x16xf32>
    tpu.vector_store %arg9[%c0_215, %c5_216, %c0_217, %c0_218], %184 {strides = array<i32>} : memref<1x6x12x16xf32, #tpu.memory_space<vmem>>, vector<1x1x12x16xf32>,
    %c0_219 = arith.constant 0 : index
    %c0_220 = arith.constant 0 : index
    %c0_221 = arith.constant 0 : index
    %c0_222 = arith.constant 0 : index
    %186 = vector.load %arg9[%c0_219, %c0_220, %c0_221, %c0_222] : memref<1x6x12x16xf32, #tpu.memory_space<vmem>>, vector<1x6x1x16xf32>
    %c0_223 = arith.constant 0 : index
    %c0_224 = arith.constant 0 : index
    %c1_225 = arith.constant 1 : index
    %c0_226 = arith.constant 0 : index
    %187 = vector.load %arg9[%c0_223, %c0_224, %c1_225, %c0_226] : memref<1x6x12x16xf32, #tpu.memory_space<vmem>>, vector<1x6x1x16xf32>
    %188 = arith.maximumf %186, %187 : vector<1x6x1x16xf32>
    %c0_227 = arith.constant 0 : index
    %c0_228 = arith.constant 0 : index
    %c0_229 = arith.constant 0 : index
    %c0_230 = arith.constant 0 : index
    %189 = vector.load %arg6[%c0_227, %c0_228, %c0_229, %c0_230] : memref<1x6x6x16xf32, #tpu.memory_space<vmem>>, vector<1x6x1x16xf32>
    tpu.vector_store %arg6[%c0_227, %c0_228, %c0_229, %c0_230], %188 {strides = array<i32>} : memref<1x6x6x16xf32, #tpu.memory_space<vmem>>, vector<1x6x1x16xf32>,
    %c0_231 = arith.constant 0 : index
    %c0_232 = arith.constant 0 : index
    %c2_233 = arith.constant 2 : index
    %c0_234 = arith.constant 0 : index
    %190 = vector.load %arg9[%c0_231, %c0_232, %c2_233, %c0_234] : memref<1x6x12x16xf32, #tpu.memory_space<vmem>>, vector<1x6x1x16xf32>
    %c0_235 = arith.constant 0 : index
    %c0_236 = arith.constant 0 : index
    %c3_237 = arith.constant 3 : index
    %c0_238 = arith.constant 0 : index
    %191 = vector.load %arg9[%c0_235, %c0_236, %c3_237, %c0_238] : memref<1x6x12x16xf32, #tpu.memory_space<vmem>>, vector<1x6x1x16xf32>
    %192 = arith.maximumf %190, %191 : vector<1x6x1x16xf32>
    %c0_239 = arith.constant 0 : index
    %c0_240 = arith.constant 0 : index
    %c1_241 = arith.constant 1 : index
    %c0_242 = arith.constant 0 : index
    %193 = vector.load %arg6[%c0_239, %c0_240, %c1_241, %c0_242] : memref<1x6x6x16xf32, #tpu.memory_space<vmem>>, vector<1x6x1x16xf32>
    tpu.vector_store %arg6[%c0_239, %c0_240, %c1_241, %c0_242], %192 {strides = array<i32>} : memref<1x6x6x16xf32, #tpu.memory_space<vmem>>, vector<1x6x1x16xf32>,
    %c0_243 = arith.constant 0 : index
    %c0_244 = arith.constant 0 : index
    %c4_245 = arith.constant 4 : index
    %c0_246 = arith.constant 0 : index
    %194 = vector.load %arg9[%c0_243, %c0_244, %c4_245, %c0_246] : memref<1x6x12x16xf32, #tpu.memory_space<vmem>>, vector<1x6x1x16xf32>
    %c0_247 = arith.constant 0 : index
    %c0_248 = arith.constant 0 : index
    %c5_249 = arith.constant 5 : index
    %c0_250 = arith.constant 0 : index
    %195 = vector.load %arg9[%c0_247, %c0_248, %c5_249, %c0_250] : memref<1x6x12x16xf32, #tpu.memory_space<vmem>>, vector<1x6x1x16xf32>
    %196 = arith.maximumf %194, %195 : vector<1x6x1x16xf32>
    %c0_251 = arith.constant 0 : index
    %c0_252 = arith.constant 0 : index
    %c2_253 = arith.constant 2 : index
    %c0_254 = arith.constant 0 : index
    %197 = vector.load %arg6[%c0_251, %c0_252, %c2_253, %c0_254] : memref<1x6x6x16xf32, #tpu.memory_space<vmem>>, vector<1x6x1x16xf32>
    tpu.vector_store %arg6[%c0_251, %c0_252, %c2_253, %c0_254], %196 {strides = array<i32>} : memref<1x6x6x16xf32, #tpu.memory_space<vmem>>, vector<1x6x1x16xf32>,
    %c0_255 = arith.constant 0 : index
    %c0_256 = arith.constant 0 : index
    %c6_257 = arith.constant 6 : index
    %c0_258 = arith.constant 0 : index
    %198 = vector.load %arg9[%c0_255, %c0_256, %c6_257, %c0_258] : memref<1x6x12x16xf32, #tpu.memory_space<vmem>>, vector<1x6x1x16xf32>
    %c0_259 = arith.constant 0 : index
    %c0_260 = arith.constant 0 : index
    %c7_261 = arith.constant 7 : index
    %c0_262 = arith.constant 0 : index
    %199 = vector.load %arg9[%c0_259, %c0_260, %c7_261, %c0_262] : memref<1x6x12x16xf32, #tpu.memory_space<vmem>>, vector<1x6x1x16xf32>
    %200 = arith.maximumf %198, %199 : vector<1x6x1x16xf32>
    %c0_263 = arith.constant 0 : index
    %c0_264 = arith.constant 0 : index
    %c3_265 = arith.constant 3 : index
    %c0_266 = arith.constant 0 : index
    %201 = vector.load %arg6[%c0_263, %c0_264, %c3_265, %c0_266] : memref<1x6x6x16xf32, #tpu.memory_space<vmem>>, vector<1x6x1x16xf32>
    tpu.vector_store %arg6[%c0_263, %c0_264, %c3_265, %c0_266], %200 {strides = array<i32>} : memref<1x6x6x16xf32, #tpu.memory_space<vmem>>, vector<1x6x1x16xf32>,
    %c0_267 = arith.constant 0 : index
    %c0_268 = arith.constant 0 : index
    %c8_269 = arith.constant 8 : index
    %c0_270 = arith.constant 0 : index
    %202 = vector.load %arg9[%c0_267, %c0_268, %c8_269, %c0_270] : memref<1x6x12x16xf32, #tpu.memory_space<vmem>>, vector<1x6x1x16xf32>
    %c0_271 = arith.constant 0 : index
    %c0_272 = arith.constant 0 : index
    %c9_273 = arith.constant 9 : index
    %c0_274 = arith.constant 0 : index
    %203 = vector.load %arg9[%c0_271, %c0_272, %c9_273, %c0_274] : memref<1x6x12x16xf32, #tpu.memory_space<vmem>>, vector<1x6x1x16xf32>
    %204 = arith.maximumf %202, %203 : vector<1x6x1x16xf32>
    %c0_275 = arith.constant 0 : index
    %c0_276 = arith.constant 0 : index
    %c4_277 = arith.constant 4 : index
    %c0_278 = arith.constant 0 : index
    %205 = vector.load %arg6[%c0_275, %c0_276, %c4_277, %c0_278] : memref<1x6x6x16xf32, #tpu.memory_space<vmem>>, vector<1x6x1x16xf32>
    tpu.vector_store %arg6[%c0_275, %c0_276, %c4_277, %c0_278], %204 {strides = array<i32>} : memref<1x6x6x16xf32, #tpu.memory_space<vmem>>, vector<1x6x1x16xf32>,
    %c0_279 = arith.constant 0 : index
    %c0_280 = arith.constant 0 : index
    %c10_281 = arith.constant 10 : index
    %c0_282 = arith.constant 0 : index
    %206 = vector.load %arg9[%c0_279, %c0_280, %c10_281, %c0_282] : memref<1x6x12x16xf32, #tpu.memory_space<vmem>>, vector<1x6x1x16xf32>
    %c0_283 = arith.constant 0 : index
    %c0_284 = arith.constant 0 : index
    %c11_285 = arith.constant 11 : index
    %c0_286 = arith.constant 0 : index
    %207 = vector.load %arg9[%c0_283, %c0_284, %c11_285, %c0_286] : memref<1x6x12x16xf32, #tpu.memory_space<vmem>>, vector<1x6x1x16xf32>
    %208 = arith.maximumf %206, %207 : vector<1x6x1x16xf32>
    %c0_287 = arith.constant 0 : index
    %c0_288 = arith.constant 0 : index
    %c5_289 = arith.constant 5 : index
    %c0_290 = arith.constant 0 : index
    %209 = vector.load %arg6[%c0_287, %c0_288, %c5_289, %c0_290] : memref<1x6x6x16xf32, #tpu.memory_space<vmem>>, vector<1x6x1x16xf32>
    tpu.vector_store %arg6[%c0_287, %c0_288, %c5_289, %c0_290], %208 {strides = array<i32>} : memref<1x6x6x16xf32, #tpu.memory_space<vmem>>, vector<1x6x1x16xf32>,
    return
  }
  func.func @transform_0(%arg0: i32) -> (i32, i32, i32, i32) {
    %c0_i32 = arith.constant 0 : i32
    %c0_i32_0 = arith.constant 0 : i32
    %c0_i32_1 = arith.constant 0 : i32
    %c0_i32_2 = arith.constant 0 : i32
    return %arg0, %c0_i32, %c0_i32_0, %c0_i32_1 : i32, i32, i32, i32
  }
  func.func @transform_1(%arg0: i32) -> (i32, i32, i32) {
    %c0_i32 = arith.constant 0 : i32
    %c0_i32_0 = arith.constant 0 : i32
    %c0_i32_1 = arith.constant 0 : i32
    %c0_i32_2 = arith.constant 0 : i32
    return %c0_i32, %c0_i32_0, %c0_i32_1 : i32, i32, i32
  }
  func.func @transform_2(%arg0: i32) -> (i32, i32) {
    %c0_i32 = arith.constant 0 : i32
    %c0_i32_0 = arith.constant 0 : i32
    %c0_i32_1 = arith.constant 0 : i32
    return %c0_i32, %c0_i32_0 : i32, i32
  }
  func.func @transform_3(%arg0: i32) -> (i32, i32, i32) {
    %c0_i32 = arith.constant 0 : i32
    %c0_i32_0 = arith.constant 0 : i32
    %c0_i32_1 = arith.constant 0 : i32
    %c0_i32_2 = arith.constant 0 : i32
    return %c0_i32, %c0_i32_0, %c0_i32_1 : i32, i32, i32
  }
  func.func @transform_4(%arg0: i32) -> (i32, i32) {
    %c0_i32 = arith.constant 0 : i32
    %c0_i32_0 = arith.constant 0 : i32
    %c0_i32_1 = arith.constant 0 : i32
    return %c0_i32, %c0_i32_0 : i32, i32
  }
  func.func @transform_5(%arg0: i32) -> (i32, i32, i32, i32) {
    %c0_i32 = arith.constant 0 : i32
    %c0_i32_0 = arith.constant 0 : i32
    %c0_i32_1 = arith.constant 0 : i32
    %c0_i32_2 = arith.constant 0 : i32
    return %arg0, %c0_i32, %c0_i32_0, %c0_i32_1 : i32, i32, i32, i32
  }
}

</mosaic_0001>

<bundles_post_ra>
// kernel: conv_block_forward.1
= control target key start
LH: loop header
LB: loop body
LE: loop exit
PB: predicated region body
PF: predicated region fallthrough
CT: control target
= control target key end

     0   :  { %s23566_s18 = smov 0   ;;  %s26850_s0 = inlined_call_operand.vmem [shape: f32[2,16,16,3], index: 0, kind: input, shape index: {}]   ;;  %s26851_s1 = inlined_call_operand.vmem [shape: f32[9,3,16], index: 1, kind: input, shape index: {}]   ;;  %s26852_s2 = inlined_call_operand.vmem [shape: f32[1,16], index: 2, kind: input, shape index: {}]   ;;  %s26853_s3 = inlined_call_operand.vmem [shape: f32[9,16,16], index: 3, kind: input, shape index: {}]   ;;  %s26854_s4 = inlined_call_operand.vmem [shape: f32[1,16], index: 4, kind: input, shape index: {}]   ;;  %s26855_s5 = inlined_call_operand.vmem [shape: f32[2,6,6,16], index: 5, kind: output, shape index: {}]  }
   0x1 LB: > { %s20524_s19 = sadd.s32 4294967295, %s23534_s18   ;;  %p20528_p0 = scmp.ge.s32.totalorder %s23534_s18, 1  ;;  %s23534_s18 = sphi %s23566_s18, %s15_s18  }
   0x2   : > { %p187_p1 = scmp.lt.s32.totalorder %s23534_s18, 3 }
   0x4   : > { %p188_p2 = pnand %p20528_p0, %p187_p1 }
   0x6   : > { %191 = sbr.rel (%p188_p2) target bundleno = 1012 (0x3f4), region = 40 }
   0xb   : > { %v23577_v0 = vld [vmem:[%s26851_s1 + $0x4] sm:$0x7]  ;;  %vm291_vm0 = vcmask 1042432   ;;  %p215_p3 = scmp.lt.s32.totalorder %s20524_s19, 1  ;;  %vm284_vm1 = vcmask 23552   ;;  %vm10992_vm2 = vcmask 128000  }
   0xc   : > { %22133 = vmatprep.subr.msk.mxu0 %vm291_vm0, %v23577_v0  ;;  %22138 = vmatprep.subr.msk.mxu1 %vm291_vm0, %v23577_v0  ;;  %v23729_v27 = vld [vmem:[%s26851_s1] sm:$0x7]  ;;  %v23885_v56 = vld [vmem:[%s26851_s1 + $0x8] sm:$0x7]  ;;  %vm10990_vm3 = vcmask 130048   ;;  %vm20236_vm4 = vcmask 125952  }
   0xd   : > { %22134 = vmatpush3.msk.msra.mxu0 %vm291_vm0, %v23577_v0  ;;  %22139 = vmatpush3.msk.msra.mxu1 %vm291_vm0, %v23577_v0  ;;  %s27065_s19 = smov (!%p215_p3, %s20524_s19), 1  ;;  %vm20342_vm5 = vcmask 122880  }
   0xe   : > { %22143 = vmatprep.subr.msk.mxu0 %vm291_vm0, %v23577_v0  ;;  %22148 = vmatprep.subr.msk.mxu1 %vm291_vm0, %v23577_v0  ;;  %s21322_s22 = sshll.u32 %s27065_s19, 8  ;;  %s23519_s11 = smul.u32 48, %s27065_s19 }
   0xf   : > { %s23597_s25 = scalar_lea.vmem %s26850_s0, %s21322_s22 }
  0x10   : > { %v254_v1 = vld [vmem:[%s23597_s25 + $0x1] sm:$0xff]  ;;  %v23601_v2 = vld [vmem:[%s23597_s25 + $0x11] sm:$0xff]  ;;  %v255_v3 = vld [vmem:[%s23597_s25 + $0x9] sm:$0x3f]  ;;  %s26740_s13 = scalar_lea.vmem %s26855_s5, %s23519_s11 }
  0x11   : > { %22135 = vmatprep.mubr.msk.f32.mxu0 %vm284_vm1, %v254_v1  ;;  %22140 = vmatprep.mubr.msk.f32.mxu1 %vm284_vm1, %v23601_v2  ;;  %v257_v4 = vld [vmem:[%s23597_s25 + $0x19] sm:$0x3f]  ;;  %v23609_v5 = vld [vmem:[%s23597_s25 + $0x21] sm:$0xff]  ;;  %v23612_v6 = vld [vmem:[%s23597_s25 + $0x31] sm:$0xff] }
  0x12   : > { %22136 = vmatmul.mubr.msk.f32.vlgmr.msra.gmra.mxu0 %vm284_vm1, %v255_v3  ;;  %22141 = vmatmul.mubr.msk.f32.vlgmr.msra.gmra.mxu1 %vm284_vm1, %v257_v4  ;;  %v259_v7 = vld [vmem:[%s23597_s25 + $0x29] sm:$0x3f]  ;;  %v261_v8 = vld [vmem:[%s23597_s25 + $0x39] sm:$0x3f]  ;;  %v23631_v9 = vld [vmem:[%s23597_s25 + $0x41] sm:$0xff] }
  0x13   : > { %22144 = vmatpush3.msk.msra.mxu0 %vm291_vm0, %v23577_v0  ;;  %22149 = vmatpush3.msk.msra.mxu1 %vm291_vm0, %v23577_v0  ;;  %v23634_v10 = vld [vmem:[%s23597_s25 + $0x51] sm:$0xff]  ;;  %v263_v11 = vld [vmem:[%s23597_s25 + $0x49] sm:$0x3f]  ;;  %v265_v12 = vld [vmem:[%s23597_s25 + $0x59] sm:$0x3f] }
  0x14   : > { %22145 = vmatprep.mubr.msk.f32.mxu0 %vm284_vm1, %v23609_v5  ;;  %22150 = vmatprep.mubr.msk.f32.mxu1 %vm284_vm1, %v23612_v6  ;;  %v23653_v13 = vld [vmem:[%s23597_s25 + $0x61] sm:$0xff]  ;;  %v23656_v14 = vld [vmem:[%s23597_s25 + $0x71] sm:$0xff]  ;;  %v267_v15 = vld [vmem:[%s23597_s25 + $0x69] sm:$0x3f] }
  0x15   : > { %22153 = vmatprep.subr.msk.mxu0 %vm291_vm0, %v23577_v0  ;;  %22158 = vmatprep.subr.msk.mxu1 %vm291_vm0, %v23577_v0  ;;  %v269_v16 = vld [vmem:[%s23597_s25 + $0x79] sm:$0x3f]  ;;  %v23675_v17 = vld [vmem:[%s23597_s25 + $0x81] sm:$0xff]  ;;  %v23678_v18 = vld [vmem:[%s23597_s25 + $0x91] sm:$0xff] }
  0x16   : > { %22146 = vmatmul.mubr.msk.f32.vlgmr.msra.gmra.mxu0 %vm284_vm1, %v259_v7  ;;  %22151 = vmatmul.mubr.msk.f32.vlgmr.msra.gmra.mxu1 %vm284_vm1, %v261_v8  ;;  %v271_v19 = vld [vmem:[%s23597_s25 + $0x89] sm:$0x3f]  ;;  %v273_v20 = vld [vmem:[%s23597_s25 + $0x99] sm:$0x3f]  ;;  %v23697_v21 = vld [vmem:[%s23597_s25 + $0xa1] sm:$0xff] }
  0x17   : > { %22154 = vmatpush3.msk.msra.mxu0 %vm291_vm0, %v23577_v0  ;;  %22159 = vmatpush3.msk.msra.mxu1 %vm291_vm0, %v23577_v0  ;;  %v23700_v22 = vld [vmem:[%s23597_s25 + $0xb1] sm:$0xff]  ;;  %v275_v23 = vld [vmem:[%s23597_s25 + $0xa9] sm:$0x3f]  ;;  %v277_v24 = vld [vmem:[%s23597_s25 + $0xb9] sm:$0x3f] }
  0x18   : > { %22155 = vmatprep.mubr.msk.f32.mxu0 %vm284_vm1, %v23631_v9  ;;  %22160 = vmatprep.mubr.msk.f32.mxu1 %vm284_vm1, %v23634_v10  ;;  %v23719_v25 = vld [vmem:[%s23597_s25 + $0xc1] sm:$0xff]  ;;  %v23722_v26 = vld [vmem:[%s23597_s25 + $0xd1] sm:$0xff]  ;;  %v279_v28 = vld [vmem:[%s23597_s25 + $0xc9] sm:$0x3f] }
  0x19   : > { %22163 = vmatprep.subr.msk.mxu0 %vm291_vm0, %v23577_v0  ;;  %22168 = vmatprep.subr.msk.mxu1 %vm291_vm0, %v23577_v0  ;;  %v281_v29 = vld [vmem:[%s23597_s25 + $0xd9] sm:$0x3f]  ;;  %v225_v30 = vld [vmem:[%s23597_s25] sm:$0xff]  ;;  %v23747_v31 = vld [vmem:[%s23597_s25 + $0x10] sm:$0xff] }
  0x1a   : > { %22156 = vmatmul.mubr.msk.f32.vlgmr.msra.gmra.mxu0 %vm284_vm1, %v263_v11  ;;  %22161 = vmatmul.mubr.msk.f32.vlgmr.msra.gmra.mxu1 %vm284_vm1, %v265_v12  ;;  %v226_v32 = vld [vmem:[%s23597_s25 + $0x8] sm:$0x3f]  ;;  %v228_v33 = vld [vmem:[%s23597_s25 + $0x18] sm:$0x3f]  ;;  %v23765_v34 = vld [vmem:[%s23597_s25 + $0x20] sm:$0xff] }
  0x1b   : > { %22164 = vmatpush3.msk.msra.mxu0 %vm291_vm0, %v23577_v0  ;;  %22169 = vmatpush3.msk.msra.mxu1 %vm291_vm0, %v23577_v0  ;;  %v23768_v35 = vld [vmem:[%s23597_s25 + $0x30] sm:$0xff]  ;;  %v230_v36 = vld [vmem:[%s23597_s25 + $0x28] sm:$0x3f]  ;;  %v232_v37 = vld [vmem:[%s23597_s25 + $0x38] sm:$0x3f] }
  0x1c   : > { %22165 = vmatprep.mubr.msk.f32.mxu0 %vm284_vm1, %v23653_v13  ;;  %22170 = vmatprep.mubr.msk.f32.mxu1 %vm284_vm1, %v23656_v14  ;;  %v23787_v38 = vld [vmem:[%s23597_s25 + $0x40] sm:$0xff]  ;;  %v23790_v39 = vld [vmem:[%s23597_s25 + $0x50] sm:$0xff]  ;;  %v234_v40 = vld [vmem:[%s23597_s25 + $0x48] sm:$0x3f] }
  0x1d   : > { %22173 = vmatprep.subr.msk.mxu0 %vm291_vm0, %v23577_v0  ;;  %22178 = vmatprep.subr.msk.mxu1 %vm291_vm0, %v23577_v0  ;;  %v236_v41 = vld [vmem:[%s23597_s25 + $0x58] sm:$0x3f]  ;;  %v23809_v42 = vld [vmem:[%s23597_s25 + $0x60] sm:$0xff]  ;;  %v23812_v43 = vld [vmem:[%s23597_s25 + $0x70] sm:$0xff] }
  0x1e   : > { %22166 = vmatmul.mubr.msk.f32.vlgmr.msra.gmra.mxu0 %vm284_vm1, %v267_v15  ;;  %22171 = vmatmul.mubr.msk.f32.vlgmr.msra.gmra.mxu1 %vm284_vm1, %v269_v16  ;;  %v238_v44 = vld [vmem:[%s23597_s25 + $0x68] sm:$0x3f]  ;;  %v240_v45 = vld [vmem:[%s23597_s25 + $0x78] sm:$0x3f]  ;;  %v23831_v46 = vld [vmem:[%s23597_s25 + $0x80] sm:$0xff] }
  0x1f   : > { %22174 = vmatpush3.msk.msra.mxu0 %vm291_vm0, %v23577_v0  ;;  %22179 = vmatpush3.msk.msra.mxu1 %vm291_vm0, %v23577_v0  ;;  %v23834_v47 = vld [vmem:[%s23597_s25 + $0x90] sm:$0xff]  ;;  %v242_v48 = vld [vmem:[%s23597_s25 + $0x88] sm:$0x3f]  ;;  %v244_v49 = vld [vmem:[%s23597_s25 + $0x98] sm:$0x3f] }
  0x20   : > { %22175 = vmatprep.mubr.msk.f32.mxu0 %vm284_vm1, %v23675_v17  ;;  %22180 = vmatprep.mubr.msk.f32.mxu1 %vm284_vm1, %v23678_v18  ;;  %v23853_v50 = vld [vmem:[%s23597_s25 + $0xa0] sm:$0xff]  ;;  %v23856_v51 = vld [vmem:[%s23597_s25 + $0xb0] sm:$0xff]  ;;  %v246_v52 = vld [vmem:[%s23597_s25 + $0xa8] sm:$0x3f] }
  0x21   : > { %22183 = vmatprep.subr.msk.mxu0 %vm291_vm0, %v23577_v0  ;;  %22188 = vmatprep.subr.msk.mxu1 %vm291_vm0, %v23577_v0  ;;  %v248_v53 = vld [vmem:[%s23597_s25 + $0xb8] sm:$0x3f]  ;;  %v23875_v54 = vld [vmem:[%s23597_s25 + $0xc0] sm:$0xff]  ;;  %v23878_v55 = vld [vmem:[%s23597_s25 + $0xd0] sm:$0xff] }
  0x22   : > { %22176 = vmatmul.mubr.msk.f32.vlgmr.msra.gmra.mxu0 %vm284_vm1, %v271_v19  ;;  %22181 = vmatmul.mubr.msk.f32.vlgmr.msra.gmra.mxu1 %vm284_vm1, %v273_v20  ;;  %v250_v57 = vld [vmem:[%s23597_s25 + $0xc8] sm:$0x3f]  ;;  %v252_v58 = vld [vmem:[%s23597_s25 + $0xd8] sm:$0x3f] }
  0x23   : > { %22184 = vmatpush3.msk.msra.mxu0 %vm291_vm0, %v23577_v0  ;;  %22189 = vmatpush3.msk.msra.mxu1 %vm291_vm0, %v23577_v0  ;;  %v2560_v59 = vld [vmem:[%s23597_s25 + $0x2] sm:$0xff]  ;;  %v23903_v60 = vld [vmem:[%s23597_s25 + $0x12] sm:$0xff]  ;;  %v2561_v61 = vld [vmem:[%s23597_s25 + $0xa] sm:$0x3f] }
  0x24   : > { %22185 = vmatprep.mubr.msk.f32.mxu0 %vm284_vm1, %v23697_v21  ;;  %22190 = vmatprep.mubr.msk.f32.mxu1 %vm284_vm1, %v23700_v22  ;;  %v2563_v62 = vld [vmem:[%s23597_s25 + $0x1a] sm:$0x3f]  ;;  %v23921_v63 = vld [vmem:[%s23597_s25 + $0x22] sm:$0xff]  ;;  %v2565_v1 = vld [vmem:[%s23597_s25 + $0x2a] sm:$0x3f] }
  0x25   : > { %22193 = vmatprep.subr.msk.mxu0 %vm291_vm0, %v23577_v0  ;;  %22198 = vmatprep.subr.msk.mxu1 %vm291_vm0, %v23577_v0  ;;  %v2567_v3 = vld [vmem:[%s23597_s25 + $0x3a] sm:$0x3f]  ;;  %v23943_v4 = vld [vmem:[%s23597_s25 + $0x42] sm:$0xff]  ;;  %v23946_v7 = vld [vmem:[%s23597_s25 + $0x52] sm:$0xff] }
  0x26   : > { %22186 = vmatmul.mubr.msk.f32.vlgmr.msra.gmra.mxu0 %vm284_vm1, %v275_v23  ;;  %22191 = vmatmul.mubr.msk.f32.vlgmr.msra.gmra.mxu1 %vm284_vm1, %v277_v24  ;;  %v2569_v8 = vld [vmem:[%s23597_s25 + $0x4a] sm:$0x3f]  ;;  %v2571_v11 = vld [vmem:[%s23597_s25 + $0x5a] sm:$0x3f]  ;;  %v23965_v12 = vld [vmem:[%s23597_s25 + $0x62] sm:$0xff] }
  0x27   : > { %22194 = vmatpush3.msk.msra.mxu0 %vm291_vm0, %v23577_v0  ;;  %22199 = vmatpush3.msk.msra.mxu1 %vm291_vm0, %v23577_v0  ;;  %v23924_v0 = vld [vmem:[%s23597_s25 + $0x32] sm:$0xff]  ;;  %v2573_v16 = vld [vmem:[%s23597_s25 + $0x6a] sm:$0x3f]  ;;  %v2575_v19 = vld [vmem:[%s23597_s25 + $0x7a] sm:$0x3f] }
  0x28   : > { %22195 = vmatprep.mubr.msk.f32.mxu0 %vm284_vm1, %v23719_v25  ;;  %22200 = vmatprep.mubr.msk.f32.mxu1 %vm284_vm1, %v23722_v26  ;;  %v23968_v15 = vld [vmem:[%s23597_s25 + $0x72] sm:$0xff]  ;;  %v23987_v20 = vld [vmem:[%s23597_s25 + $0x82] sm:$0xff]  ;;  %v2577_v24 = vld [vmem:[%s23597_s25 + $0x8a] sm:$0x3f] }
  0x29   : > { %22203 = vmatprep.subr.msk.mxu0 %vm291_vm0, %v23729_v27  ;;  %22208 = vmatprep.subr.msk.mxu1 %vm291_vm0, %v23729_v27  ;;  %v23990_v23 = vld [vmem:[%s23597_s25 + $0x92] sm:$0xff] }
  0x2a   : > { %22196 = vmatmul.mubr.msk.f32.vlgmr.msra.gmra.mxu0 %vm284_vm1, %v279_v28  ;;  %22201 = vmatmul.mubr.msk.f32.vlgmr.msra.gmra.mxu1 %vm284_vm1, %v281_v29  ;;  %v24009_v28 = vld [vmem:[%s23597_s25 + $0xa2] sm:$0xff]  ;;  %v24012_v29 = vld [vmem:[%s23597_s25 + $0xb2] sm:$0xff] }
  0x2b   : > { %22204 = vmatpush3.msk.msra.mxu0 %vm291_vm0, %v23729_v27  ;;  %22209 = vmatpush3.msk.msra.mxu1 %vm291_vm0, %v23729_v27 }
  0x2c   : > { %22205 = vmatprep.mubr.msk.f32.mxu0 %vm284_vm1, %v225_v30  ;;  %22210 = vmatprep.mubr.msk.f32.mxu1 %vm284_vm1, %v23747_v31  ;;  %v2581_v30 = vld [vmem:[%s23597_s25 + $0xaa] sm:$0x3f] }
  0x2d   : > { %22213 = vmatprep.subr.msk.mxu0 %vm291_vm0, %v23729_v27  ;;  %22218 = vmatprep.subr.msk.mxu1 %vm291_vm0, %v23729_v27 }
  0x2e   : > { %22206 = vmatmul.mubr.msk.f32.vlgmr.msra.gmra.mxu0 %vm284_vm1, %v226_v32  ;;  %22211 = vmatmul.mubr.msk.f32.vlgmr.msra.gmra.mxu1 %vm284_vm1, %v228_v33  ;;  %v2583_v32 = vld [vmem:[%s23597_s25 + $0xba] sm:$0x3f]  ;;  %v24031_v33 = vld [vmem:[%s23597_s25 + $0xc2] sm:$0xff] }
  0x2f   : > { %22214 = vmatpush3.msk.msra.mxu0 %vm291_vm0, %v23729_v27  ;;  %22219 = vmatpush3.msk.msra.mxu1 %vm291_vm0, %v23729_v27 }
  0x30   : > { %22215 = vmatprep.mubr.msk.f32.mxu0 %vm284_vm1, %v23765_v34  ;;  %22220 = vmatprep.mubr.msk.f32.mxu1 %vm284_vm1, %v23768_v35 }
  0x31   : > { %22223 = vmatprep.subr.msk.mxu0 %vm291_vm0, %v23729_v27  ;;  %22228 = vmatprep.subr.msk.mxu1 %vm291_vm0, %v23729_v27 }
  0x32   : > { %22216 = vmatmul.mubr.msk.f32.vlgmr.msra.gmra.mxu0 %vm284_vm1, %v230_v36  ;;  %22221 = vmatmul.mubr.msk.f32.vlgmr.msra.gmra.mxu1 %vm284_vm1, %v232_v37  ;;  %v24034_v36 = vld [vmem:[%s23597_s25 + $0xd2] sm:$0xff]  ;;  %v24041_v37 = vld [vmem:[%s26851_s1 + $0xc] sm:$0x7] }
  0x33   : > { %22224 = vmatpush3.msk.msra.mxu0 %vm291_vm0, %v23729_v27  ;;  %22229 = vmatpush3.msk.msra.mxu1 %vm291_vm0, %v23729_v27 }
  0x34   : > { %22225 = vmatprep.mubr.msk.f32.mxu0 %vm284_vm1, %v23787_v38  ;;  %22230 = vmatprep.mubr.msk.f32.mxu1 %vm284_vm1, %v23790_v39 }
  0x35   : > { %22233 = vmatprep.subr.msk.mxu0 %vm291_vm0, %v23729_v27  ;;  %22238 = vmatprep.subr.msk.mxu1 %vm291_vm0, %v23729_v27 }
  0x36   : > { %22226 = vmatmul.mubr.msk.f32.vlgmr.msra.gmra.mxu0 %vm284_vm1, %v234_v40  ;;  %22231 = vmatmul.mubr.msk.f32.vlgmr.msra.gmra.mxu1 %vm284_vm1, %v236_v41  ;;  %v2585_v40 = vld [vmem:[%s23597_s25 + $0xca] sm:$0x3f]  ;;  %v2587_v41 = vld [vmem:[%s23597_s25 + $0xda] sm:$0x3f] }
  0x37   : > { %22234 = vmatpush3.msk.msra.mxu0 %vm291_vm0, %v23729_v27  ;;  %22239 = vmatpush3.msk.msra.mxu1 %vm291_vm0, %v23729_v27 }
  0x38   : > { %22235 = vmatprep.mubr.msk.f32.mxu0 %vm284_vm1, %v23809_v42  ;;  %22240 = vmatprep.mubr.msk.f32.mxu1 %vm284_vm1, %v23812_v43 }
  0x39   : > { %22243 = vmatprep.subr.msk.mxu0 %vm291_vm0, %v23729_v27  ;;  %22248 = vmatprep.subr.msk.mxu1 %vm291_vm0, %v23729_v27 }
  0x3a   : > { %22236 = vmatmul.mubr.msk.f32.vlgmr.msra.gmra.mxu0 %vm284_vm1, %v238_v44  ;;  %22241 = vmatmul.mubr.msk.f32.vlgmr.msra.gmra.mxu1 %vm284_vm1, %v240_v45  ;;  %v20661_v44 = vld [vmem:[%s23597_s25 + $0x18] sm:$0x3f]  ;;  %v20663_v45 = vld [vmem:[%s23597_s25 + $0x28] sm:$0x3f] }
  0x3b   : > { %22244 = vmatpush3.msk.msra.mxu0 %vm291_vm0, %v23729_v27  ;;  %22249 = vmatpush3.msk.msra.mxu1 %vm291_vm0, %v23729_v27 }
  0x3c   : > { %22245 = vmatprep.mubr.msk.f32.mxu0 %vm284_vm1, %v23831_v46  ;;  %22250 = vmatprep.mubr.msk.f32.mxu1 %vm284_vm1, %v23834_v47 }
  0x3d   : > { %22253 = vmatprep.subr.msk.mxu0 %vm291_vm0, %v23729_v27  ;;  %22258 = vmatprep.subr.msk.mxu1 %vm291_vm0, %v23729_v27 }
  0x3e   : > { %22246 = vmatmul.mubr.msk.f32.vlgmr.msra.gmra.mxu0 %vm284_vm1, %v242_v48  ;;  %22251 = vmatmul.mubr.msk.f32.vlgmr.msra.gmra.mxu1 %vm284_vm1, %v244_v49  ;;  %v20667_v48 = vld [vmem:[%s23597_s25 + $0x48] sm:$0x3f]  ;;  %v20669_v49 = vld [vmem:[%s23597_s25 + $0x58] sm:$0x3f] }
  0x3f   : > { %22254 = vmatpush3.msk.msra.mxu0 %vm291_vm0, %v23729_v27  ;;  %22259 = vmatpush3.msk.msra.mxu1 %vm291_vm0, %v23729_v27 }
  0x40   : > { %22255 = vmatprep.mubr.msk.f32.mxu0 %vm284_vm1, %v23853_v50  ;;  %22260 = vmatprep.mubr.msk.f32.mxu1 %vm284_vm1, %v23856_v51 }
  0x41   : > { %22263 = vmatprep.subr.msk.mxu0 %vm291_vm0, %v23729_v27  ;;  %22268 = vmatprep.subr.msk.mxu1 %vm291_vm0, %v23729_v27 }
  0x42   : > { %22256 = vmatmul.mubr.msk.f32.vlgmr.msra.gmra.mxu0 %vm284_vm1, %v246_v52  ;;  %22261 = vmatmul.mubr.msk.f32.vlgmr.msra.gmra.mxu1 %vm284_vm1, %v248_v53  ;;  %v20671_v52 = vld [vmem:[%s23597_s25 + $0x68] sm:$0x3f]  ;;  %v20673_v53 = vld [vmem:[%s23597_s25 + $0x78] sm:$0x3f] }
  0x43   : > { %22264 = vmatpush3.msk.msra.mxu0 %vm291_vm0, %v23729_v27  ;;  %22269 = vmatpush3.msk.msra.mxu1 %vm291_vm0, %v23729_v27  ;;  %v2579_v27 = vld [vmem:[%s23597_s25 + $0x9a] sm:$0x3f] }
  0x44   : > { %22265 = vmatprep.mubr.msk.f32.mxu0 %vm284_vm1, %v23875_v54  ;;  %22270 = vmatprep.mubr.msk.f32.mxu1 %vm284_vm1, %v23878_v55 }
  0x45   : > { %22273 = vmatprep.subr.msk.mxu0 %vm291_vm0, %v23885_v56  ;;  %22278 = vmatprep.subr.msk.mxu1 %vm291_vm0, %v23885_v56 }
  0x46   : > { %22266 = vmatmul.mubr.msk.f32.vlgmr.msra.gmra.mxu0 %vm284_vm1, %v250_v57  ;;  %22271 = vmatmul.mubr.msk.f32.vlgmr.msra.gmra.mxu1 %vm284_vm1, %v252_v58  ;;  %v20677_v57 = vld [vmem:[%s23597_s25 + $0x98] sm:$0x3f]  ;;  %v20679_v58 = vld [vmem:[%s23597_s25 + $0xa8] sm:$0x3f] }
  0x47   : > { %22274 = vmatpush3.msk.msra.mxu0 %vm291_vm0, %v23885_v56  ;;  %22279 = vmatpush3.msk.msra.mxu1 %vm291_vm0, %v23885_v56 }
  0x48   : > { %22275 = vmatprep.mubr.msk.f32.mxu0 %vm284_vm1, %v2560_v59  ;;  %22280 = vmatprep.mubr.msk.f32.mxu1 %vm284_vm1, %v23903_v60  ;;  %v20681_v59 = vld [vmem:[%s23597_s25 + $0xb8] sm:$0x3f] }
  0x49   : > { %22283 = vmatprep.subr.msk.mxu0 %vm291_vm0, %v23885_v56  ;;  %22288 = vmatprep.subr.msk.mxu1 %vm291_vm0, %v23885_v56 }
  0x4a   : > { %22276 = vmatmul.mubr.msk.f32.vlgmr.msra.gmra.mxu0 %vm284_vm1, %v2561_v61  ;;  %22281 = vmatmul.mubr.msk.f32.vlgmr.msra.gmra.mxu1 %vm284_vm1, %v2563_v62  ;;  %v20683_v61 = vld [vmem:[%s23597_s25 + $0xc8] sm:$0x3f]  ;;  %v24154_v62 = vld [vmem:[%s23597_s25 + $0xe0] sm:$0xff] }
  0x4b   : > { %22284 = vmatpush3.msk.msra.mxu0 %vm291_vm0, %v23885_v56  ;;  %22289 = vmatpush3.msk.msra.mxu1 %vm291_vm0, %v23885_v56 }
  0x4c   : > { %22285 = vmatprep.mubr.msk.f32.mxu0 %vm284_vm1, %v23921_v63  ;;  %22290 = vmatprep.mubr.msk.f32.mxu1 %vm284_vm1, %v23924_v0 }
  0x4d   : > { %22293 = vmatprep.subr.msk.mxu0 %vm291_vm0, %v23885_v56  ;;  %22298 = vmatprep.subr.msk.mxu1 %vm291_vm0, %v23885_v56 }
  0x4e   : > { %22286 = vmatmul.mubr.msk.f32.vlgmr.msra.gmra.mxu0 %vm284_vm1, %v2565_v1  ;;  %22291 = vmatmul.mubr.msk.f32.vlgmr.msra.gmra.mxu1 %vm284_vm1, %v2567_v3  ;;  %v24161_v1 = vld [vmem:[%s26851_s1 + $0x10] sm:$0x7]  ;;  %v20685_v3 = vld [vmem:[%s23597_s25 + $0xd8] sm:$0x3f] }
  0x4f   : > { %22294 = vmatpush3.msk.msra.mxu0 %vm291_vm0, %v23885_v56  ;;  %22299 = vmatpush3.msk.msra.mxu1 %vm291_vm0, %v23885_v56 }
  0x50   : > { %22295 = vmatprep.mubr.msk.f32.mxu0 %vm284_vm1, %v23943_v4  ;;  %22300 = vmatprep.mubr.msk.f32.mxu1 %vm284_vm1, %v23946_v7 }
  0x51   : > { %22303 = vmatprep.subr.msk.mxu0 %vm291_vm0, %v23885_v56  ;;  %22308 = vmatprep.subr.msk.mxu1 %vm291_vm0, %v23885_v56 }
  0x52   : > { %22296 = vmatmul.mubr.msk.f32.vlgmr.msra.gmra.mxu0 %vm284_vm1, %v2569_v8  ;;  %22301 = vmatmul.mubr.msk.f32.vlgmr.msra.gmra.mxu1 %vm284_vm1, %v2571_v11  ;;  %v20687_v8 = vld [vmem:[%s23597_s25 + $0xe8] sm:$0x3f]  ;;  %v20732_v11 = vld [vmem:[%s23597_s25 + $0x19] sm:$0x3f] }
  0x53   : > { %22304 = vmatpush3.msk.msra.mxu0 %vm291_vm0, %v23885_v56  ;;  %22309 = vmatpush3.msk.msra.mxu1 %vm291_vm0, %v23885_v56 }
  0x54   : > { %22305 = vmatprep.mubr.msk.f32.mxu0 %vm284_vm1, %v23965_v12  ;;  %22310 = vmatprep.mubr.msk.f32.mxu1 %vm284_vm1, %v23968_v15 }
  0x55   : > { %22313 = vmatprep.subr.msk.mxu0 %vm291_vm0, %v23885_v56  ;;  %22318 = vmatprep.subr.msk.mxu1 %vm291_vm0, %v23885_v56 }
  0x56   : > { %22306 = vmatmul.mubr.msk.f32.vlgmr.msra.gmra.mxu0 %vm284_vm1, %v2573_v16  ;;  %22311 = vmatmul.mubr.msk.f32.vlgmr.msra.gmra.mxu1 %vm284_vm1, %v2575_v19  ;;  %v20734_v16 = vld [vmem:[%s23597_s25 + $0x29] sm:$0x3f]  ;;  %v24274_v19 = vld [vmem:[%s23597_s25 + $0xe1] sm:$0xff] }
  0x57   : > { %22314 = vmatpush3.msk.msra.mxu0 %vm291_vm0, %v23885_v56  ;;  %22319 = vmatpush3.msk.msra.mxu1 %vm291_vm0, %v23885_v56 }
  0x58   : > { %22315 = vmatprep.mubr.msk.f32.mxu0 %vm284_vm1, %v23987_v20  ;;  %22320 = vmatprep.mubr.msk.f32.mxu1 %vm284_vm1, %v23990_v23 }
  0x59   : > { %22323 = vmatprep.subr.msk.mxu0 %vm291_vm0, %v23885_v56  ;;  %22328 = vmatprep.subr.msk.mxu1 %vm291_vm0, %v23885_v56 }
  0x5a   : > { %22316 = vmatmul.mubr.msk.f32.vlgmr.msra.gmra.mxu0 %vm284_vm1, %v2577_v24  ;;  %22321 = vmatmul.mubr.msk.f32.vlgmr.msra.gmra.mxu1 %vm284_vm1, %v2579_v27  ;;  %v20758_v24 = vld [vmem:[%s23597_s25 + $0xe9] sm:$0x3f] }
  0x5b   : > { %22324 = vmatpush3.msk.msra.mxu0 %vm291_vm0, %v23885_v56  ;;  %22329 = vmatpush3.msk.msra.mxu1 %vm291_vm0, %v23885_v56  ;;  %v20805_v27 = vld [vmem:[%s23597_s25 + $0x2a] sm:$0x3f] }
  0x5c   : > { %22325 = vmatprep.mubr.msk.f32.mxu0 %vm284_vm1, %v24009_v28  ;;  %22330 = vmatprep.mubr.msk.f32.mxu1 %vm284_vm1, %v24012_v29 }
  0x5d   : > { %22333 = vmatprep.subr.msk.mxu0 %vm291_vm0, %v23885_v56  ;;  %22338 = vmatprep.subr.msk.mxu1 %vm291_vm0, %v23885_v56 }
  0x5e   : > { %22326 = vmatmul.mubr.msk.f32.vlgmr.msra.gmra.mxu0 %vm284_vm1, %v2581_v30  ;;  %22331 = vmatmul.mubr.msk.f32.vlgmr.msra.gmra.mxu1 %vm284_vm1, %v2583_v32  ;;  %v24394_v30 = vld [vmem:[%s23597_s25 + $0xe2] sm:$0xff]  ;;  %v20827_v32 = vld [vmem:[%s23597_s25 + $0xda] sm:$0x3f] }
  0x5f   : > { %22334 = vmatpush3.msk.msra.mxu0 %vm291_vm0, %v23885_v56  ;;  %22339 = vmatpush3.msk.msra.mxu1 %vm291_vm0, %v23885_v56  ;;  %v20675_v56 = vld [vmem:[%s23597_s25 + $0x88] sm:$0x3f] }
  0x60   : > { %22335 = vmatprep.mubr.msk.f32.mxu0 %vm284_vm1, %v24031_v33  ;;  %22340 = vmatprep.mubr.msk.f32.mxu1 %vm284_vm1, %v24034_v36 }
  0x61   : > { %22343 = vmatprep.subr.msk.mxu0 %vm291_vm0, %v24041_v37  ;;  %22348 = vmatprep.subr.msk.mxu1 %vm291_vm0, %v24041_v37 }
  0x62   : > { %22336 = vmatmul.mubr.msk.f32.vlgmr.msra.gmra.mxu0 %vm284_vm1, %v2585_v40  ;;  %22341 = vmatmul.mubr.msk.f32.vlgmr.msra.gmra.mxu1 %vm284_vm1, %v2587_v41  ;;  %v20899_v40 = vld [vmem:[%s23597_s25 + $0xf0] sm:$0xff]  ;;  %v20900_v41 = vld [vmem:[%s23597_s25 + $0xf8] sm:$0x3f] }
  0x63   : > { %22344 = vmatpush3.msk.msra.mxu0 %vm291_vm0, %v24041_v37  ;;  %22349 = vmatpush3.msk.msra.mxu1 %vm291_vm0, %v24041_v37 }
  0x64   : > { %22345 = vmatprep.mubr.msk.f32.mxu0 %vm284_vm1, %v23747_v31  ;;  %22350 = vmatprep.mubr.msk.f32.mxu1 %vm284_vm1, %v23765_v34  ;;  %v20665_v31 = vld [vmem:[%s23597_s25 + $0x38] sm:$0x3f] }
  0x65   : > { %22353 = vmatprep.subr.msk.mxu0 %vm291_vm0, %v24041_v37  ;;  %22358 = vmatprep.subr.msk.mxu1 %vm291_vm0, %v24041_v37 }
  0x66   : > { %22346 = vmatmul.mubr.msk.f32.vlgmr.msra.gmra.mxu0 %vm284_vm1, %v20661_v44  ;;  %22351 = vmatmul.mubr.msk.f32.vlgmr.msra.gmra.mxu1 %vm284_vm1, %v20663_v45  ;;  %v20944_v44 = vld [vmem:[%s23597_s25 + $0x21] sm:$0xff]  ;;  %v20946_v45 = vld [vmem:[%s23597_s25 + $0x31] sm:$0xff] }
  0x67   : > { %22354 = vmatpush3.msk.msra.mxu0 %vm291_vm0, %v24041_v37  ;;  %22359 = vmatpush3.msk.msra.mxu1 %vm291_vm0, %v24041_v37 }
  0x68   : > { %22355 = vmatprep.mubr.msk.f32.mxu0 %vm284_vm1, %v23768_v35  ;;  %22360 = vmatprep.mubr.msk.f32.mxu1 %vm284_vm1, %v23787_v38 }
  0x69   : > { %22363 = vmatprep.subr.msk.mxu0 %vm291_vm0, %v24041_v37  ;;  %22368 = vmatprep.subr.msk.mxu1 %vm291_vm0, %v24041_v37 }
  0x6a   : > { %22356 = vmatmul.mubr.msk.f32.vlgmr.msra.gmra.mxu0 %vm284_vm1, %v20665_v31  ;;  %22361 = vmatmul.mubr.msk.f32.vlgmr.msra.gmra.mxu1 %vm284_vm1, %v20667_v48 }
  0x6b   : > { %22364 = vmatpush3.msk.msra.mxu0 %vm291_vm0, %v24041_v37  ;;  %22369 = vmatpush3.msk.msra.mxu1 %vm291_vm0, %v24041_v37 }
  0x6c   : > { %22365 = vmatprep.mubr.msk.f32.mxu0 %vm284_vm1, %v23790_v39  ;;  %22370 = vmatprep.mubr.msk.f32.mxu1 %vm284_vm1, %v23809_v42 }
  0x6d   : > { %22373 = vmatprep.subr.msk.mxu0 %vm291_vm0, %v24041_v37  ;;  %22378 = vmatprep.subr.msk.mxu1 %vm291_vm0, %v24041_v37 }
  0x6e   : > { %22366 = vmatmul.mubr.msk.f32.vlgmr.msra.gmra.mxu0 %vm284_vm1, %v20669_v49  ;;  %22371 = vmatmul.mubr.msk.f32.vlgmr.msra.gmra.mxu1 %vm284_vm1, %v20671_v52  ;;  %v20945_v49 = vld [vmem:[%s23597_s25 + $0x29] sm:$0x3f]  ;;  %v20947_v52 = vld [vmem:[%s23597_s25 + $0x39] sm:$0x3f] }
  0x6f   : > { %22374 = vmatpush3.msk.msra.mxu0 %vm291_vm0, %v24041_v37  ;;  %22379 = vmatpush3.msk.msra.mxu1 %vm291_vm0, %v24041_v37 }
  0x70   : > { %22375 = vmatprep.mubr.msk.f32.mxu0 %vm284_vm1, %v23812_v43  ;;  %22380 = vmatprep.mubr.msk.f32.mxu1 %vm284_vm1, %v23831_v46 }
  0x71   : > { %22383 = vmatprep.subr.msk.mxu0 %vm291_vm0, %v24041_v37  ;;  %22388 = vmatprep.subr.msk.mxu1 %vm291_vm0, %v24041_v37 }
  0x72   : > { %22376 = vmatmul.mubr.msk.f32.vlgmr.msra.gmra.mxu0 %vm284_vm1, %v20673_v53  ;;  %22381 = vmatmul.mubr.msk.f32.vlgmr.msra.gmra.mxu1 %vm284_vm1, %v20675_v56 }
  0x73   : > { %22384 = vmatpush3.msk.msra.mxu0 %vm291_vm0, %v24041_v37  ;;  %22389 = vmatpush3.msk.msra.mxu1 %vm291_vm0, %v24041_v37 }
  0x74   : > { %22385 = vmatprep.mubr.msk.f32.mxu0 %vm284_vm1, %v23834_v47  ;;  %22390 = vmatprep.mubr.msk.f32.mxu1 %vm284_vm1, %v23853_v50 }
  0x75   : > { %22393 = vmatprep.subr.msk.mxu0 %vm291_vm0, %v24041_v37  ;;  %22398 = vmatprep.subr.msk.mxu1 %vm291_vm0, %v24041_v37 }
  0x76   : > { %22386 = vmatmul.mubr.msk.f32.vlgmr.msra.gmra.mxu0 %vm284_vm1, %v20677_v57  ;;  %22391 = vmatmul.mubr.msk.f32.vlgmr.msra.gmra.mxu1 %vm284_vm1, %v20679_v58  ;;  %v20948_v57 = vld [vmem:[%s23597_s25 + $0x41] sm:$0xff]  ;;  %v20950_v58 = vld [vmem:[%s23597_s25 + $0x51] sm:$0xff] }
  0x77   : > { %22394 = vmatpush3.msk.msra.mxu0 %vm291_vm0, %v24041_v37  ;;  %22399 = vmatpush3.msk.msra.mxu1 %vm291_vm0, %v24041_v37 }
  0x78   : > { %22395 = vmatprep.mubr.msk.f32.mxu0 %vm284_vm1, %v23856_v51  ;;  %22400 = vmatprep.mubr.msk.f32.mxu1 %vm284_vm1, %v23875_v54 }
  0x79   : > { %22403 = vmatprep.subr.msk.mxu0 %vm291_vm0, %v24041_v37  ;;  %22408 = vmatprep.subr.msk.mxu1 %vm291_vm0, %v24041_v37 }
  0x7a   : > { %22396 = vmatmul.mubr.msk.f32.vlgmr.msra.gmra.mxu0 %vm284_vm1, %v20681_v59  ;;  %22401 = vmatmul.mubr.msk.f32.vlgmr.msra.gmra.mxu1 %vm284_vm1, %v20683_v61 }
  0x7b   : > { %22404 = vmatpush3.msk.msra.mxu0 %vm291_vm0, %v24041_v37  ;;  %22409 = vmatpush3.msk.msra.mxu1 %vm291_vm0, %v24041_v37  ;;  %v20876_v37 = vld [vmem:[%s23597_s25 + $0x38] sm:$0x3f] }
  0x7c   : > { %22405 = vmatprep.mubr.msk.f32.mxu0 %vm284_vm1, %v23878_v55  ;;  %22410 = vmatprep.mubr.msk.f32.mxu1 %vm284_vm1, %v24154_v62 }
  0x7d   : > { %22413 = vmatprep.subr.msk.mxu0 %vm291_vm0, %v24161_v1  ;;  %22418 = vmatprep.subr.msk.mxu1 %vm291_vm0, %v24161_v1 }
  0x7e   : > { %22406 = vmatmul.mubr.msk.f32.vlgmr.msra.gmra.mxu0 %vm284_vm1, %v20685_v3  ;;  %22411 = vmatmul.mubr.msk.f32.vlgmr.msra.gmra.mxu1 %vm284_vm1, %v20687_v8 }
  0x7f   : > { %22414 = vmatpush3.msk.msra.mxu0 %vm291_vm0, %v24161_v1  ;;  %22419 = vmatpush3.msk.msra.mxu1 %vm291_vm0, %v24161_v1 }
  0x80   : > { %22415 = vmatprep.mubr.msk.f32.mxu0 %vm284_vm1, %v23601_v2  ;;  %22420 = vmatprep.mubr.msk.f32.mxu1 %vm284_vm1, %v23609_v5  ;;  %v20736_v2 = vld [vmem:[%s23597_s25 + $0x39] sm:$0x3f]  ;;  %v20738_v5 = vld [vmem:[%s23597_s25 + $0x49] sm:$0x3f] }
  0x81   : > { %22423 = vmatprep.subr.msk.mxu0 %vm291_vm0, %v24161_v1  ;;  %22428 = vmatprep.subr.msk.mxu1 %vm291_vm0, %v24161_v1 }
  0x82   : > { %22416 = vmatmul.mubr.msk.f32.vlgmr.msra.gmra.mxu0 %vm284_vm1, %v20732_v11  ;;  %22421 = vmatmul.mubr.msk.f32.vlgmr.msra.gmra.mxu1 %vm284_vm1, %v20734_v16  ;;  %v20952_v11 = vld [vmem:[%s23597_s25 + $0x61] sm:$0xff]  ;;  %v20954_v16 = vld [vmem:[%s23597_s25 + $0x71] sm:$0xff] }
  0x83   : > { %22424 = vmatpush3.msk.msra.mxu0 %vm291_vm0, %v24161_v1  ;;  %22429 = vmatpush3.msk.msra.mxu1 %vm291_vm0, %v24161_v1 }
  0x84   : > { %22425 = vmatprep.mubr.msk.f32.mxu0 %vm284_vm1, %v23612_v6  ;;  %22430 = vmatprep.mubr.msk.f32.mxu1 %vm284_vm1, %v23631_v9  ;;  %v20740_v6 = vld [vmem:[%s23597_s25 + $0x59] sm:$0x3f]  ;;  %v20742_v9 = vld [vmem:[%s23597_s25 + $0x69] sm:$0x3f] }
  0x85   : > { %22433 = vmatprep.subr.msk.mxu0 %vm291_vm0, %v24161_v1  ;;  %22438 = vmatprep.subr.msk.mxu1 %vm291_vm0, %v24161_v1 }
  0x86   : > { %22426 = vmatmul.mubr.msk.f32.vlgmr.msra.gmra.mxu0 %vm284_vm1, %v20736_v2  ;;  %22431 = vmatmul.mubr.msk.f32.vlgmr.msra.gmra.mxu1 %vm284_vm1, %v20738_v5 }
  0x87   : > { %22434 = vmatpush3.msk.msra.mxu0 %vm291_vm0, %v24161_v1  ;;  %22439 = vmatpush3.msk.msra.mxu1 %vm291_vm0, %v24161_v1 }
  0x88   : > { %22435 = vmatprep.mubr.msk.f32.mxu0 %vm284_vm1, %v23634_v10  ;;  %22440 = vmatprep.mubr.msk.f32.mxu1 %vm284_vm1, %v23653_v13  ;;  %v20744_v10 = vld [vmem:[%s23597_s25 + $0x79] sm:$0x3f]  ;;  %v20746_v13 = vld [vmem:[%s23597_s25 + $0x89] sm:$0x3f] }
  0x89   : > { %22443 = vmatprep.subr.msk.mxu0 %vm291_vm0, %v24161_v1  ;;  %22448 = vmatprep.subr.msk.mxu1 %vm291_vm0, %v24161_v1 }
  0x8a   : > { %22436 = vmatmul.mubr.msk.f32.vlgmr.msra.gmra.mxu0 %vm284_vm1, %v20740_v6  ;;  %22441 = vmatmul.mubr.msk.f32.vlgmr.msra.gmra.mxu1 %vm284_vm1, %v20742_v9  ;;  %v20953_v6 = vld [vmem:[%s23597_s25 + $0x69] sm:$0x3f]  ;;  %v20955_v9 = vld [vmem:[%s23597_s25 + $0x79] sm:$0x3f] }
  0x8b   : > { %22444 = vmatpush3.msk.msra.mxu0 %vm291_vm0, %v24161_v1  ;;  %22449 = vmatpush3.msk.msra.mxu1 %vm291_vm0, %v24161_v1 }
  0x8c   : > { %22445 = vmatprep.mubr.msk.f32.mxu0 %vm284_vm1, %v23656_v14  ;;  %22450 = vmatprep.mubr.msk.f32.mxu1 %vm284_vm1, %v23675_v17  ;;  %v20748_v14 = vld [vmem:[%s23597_s25 + $0x99] sm:$0x3f]  ;;  %v20750_v17 = vld [vmem:[%s23597_s25 + $0xa9] sm:$0x3f] }
  0x8d   : > { %22453 = vmatprep.subr.msk.mxu0 %vm291_vm0, %v24161_v1  ;;  %22458 = vmatprep.subr.msk.mxu1 %vm291_vm0, %v24161_v1 }
  0x8e   : > { %22446 = vmatmul.mubr.msk.f32.vlgmr.msra.gmra.mxu0 %vm284_vm1, %v20744_v10  ;;  %22451 = vmatmul.mubr.msk.f32.vlgmr.msra.gmra.mxu1 %vm284_vm1, %v20746_v13 }
  0x8f   : > { %22454 = vmatpush3.msk.msra.mxu0 %vm291_vm0, %v24161_v1  ;;  %22459 = vmatpush3.msk.msra.mxu1 %vm291_vm0, %v24161_v1 }
  0x90   : > { %22455 = vmatprep.mubr.msk.f32.mxu0 %vm284_vm1, %v23678_v18  ;;  %22460 = vmatprep.mubr.msk.f32.mxu1 %vm284_vm1, %v23697_v21  ;;  %v20752_v18 = vld [vmem:[%s23597_s25 + $0xb9] sm:$0x3f]  ;;  %v20754_v21 = vld [vmem:[%s23597_s25 + $0xc9] sm:$0x3f] }
  0x91   : > { %22463 = vmatprep.subr.msk.mxu0 %vm291_vm0, %v24161_v1  ;;  %22468 = vmatprep.subr.msk.mxu1 %vm291_vm0, %v24161_v1 }
  0x92   : > { %22456 = vmatmul.mubr.msk.f32.vlgmr.msra.gmra.mxu0 %vm284_vm1, %v20748_v14  ;;  %22461 = vmatmul.mubr.msk.f32.vlgmr.msra.gmra.mxu1 %vm284_vm1, %v20750_v17  ;;  %v20956_v14 = vld [vmem:[%s23597_s25 + $0x81] sm:$0xff]  ;;  %v20958_v17 = vld [vmem:[%s23597_s25 + $0x91] sm:$0xff] }
  0x93   : > { %22464 = vmatpush3.msk.msra.mxu0 %vm291_vm0, %v24161_v1  ;;  %22469 = vmatpush3.msk.msra.mxu1 %vm291_vm0, %v24161_v1 }
  0x94   : > { %22465 = vmatprep.mubr.msk.f32.mxu0 %vm284_vm1, %v23700_v22  ;;  %22470 = vmatprep.mubr.msk.f32.mxu1 %vm284_vm1, %v23719_v25  ;;  %v24281_v22 = vld [vmem:[%s26851_s1 + $0x14] sm:$0x7]  ;;  %v20756_v25 = vld [vmem:[%s23597_s25 + $0xd9] sm:$0x3f] }
  0x95   : > { %22473 = vmatprep.subr.msk.mxu0 %vm291_vm0, %v24161_v1  ;;  %22478 = vmatprep.subr.msk.mxu1 %vm291_vm0, %v24161_v1 }
  0x96   : > { %22466 = vmatmul.mubr.msk.f32.vlgmr.msra.gmra.mxu0 %vm284_vm1, %v20752_v18  ;;  %22471 = vmatmul.mubr.msk.f32.vlgmr.msra.gmra.mxu1 %vm284_vm1, %v20754_v21 }
  0x97   : > { %22474 = vmatpush3.msk.msra.mxu0 %vm291_vm0, %v24161_v1  ;;  %22479 = vmatpush3.msk.msra.mxu1 %vm291_vm0, %v24161_v1  ;;  %v20951_v1 = vld [vmem:[%s23597_s25 + $0x59] sm:$0x3f] }
  0x98   : > { %22475 = vmatprep.mubr.msk.f32.mxu0 %vm284_vm1, %v23722_v26  ;;  %22480 = vmatprep.mubr.msk.f32.mxu1 %vm284_vm1, %v24274_v19  ;;  %v20803_v26 = vld [vmem:[%s23597_s25 + $0x1a] sm:$0x3f] }
  0x99   : > { %22483 = vmatprep.subr.msk.mxu0 %vm291_vm0, %v24281_v22  ;;  %22488 = vmatprep.subr.msk.mxu1 %vm291_vm0, %v24281_v22 }
  0x9a   : > { %22476 = vmatmul.mubr.msk.f32.vlgmr.msra.gmra.mxu0 %vm284_vm1, %v20756_v25  ;;  %22481 = vmatmul.mubr.msk.f32.vlgmr.msra.gmra.mxu1 %vm284_vm1, %v20758_v24  ;;  %v20959_v25 = vld [vmem:[%s23597_s25 + $0x99] sm:$0x3f] }
  0x9b   : > { %22484 = vmatpush3.msk.msra.mxu0 %vm291_vm0, %v24281_v22  ;;  %22489 = vmatpush3.msk.msra.mxu1 %vm291_vm0, %v24281_v22 }
  0x9c   : > { %22485 = vmatprep.mubr.msk.f32.mxu0 %vm284_vm1, %v23903_v60  ;;  %22490 = vmatprep.mubr.msk.f32.mxu1 %vm284_vm1, %v23921_v63  ;;  %v20807_v60 = vld [vmem:[%s23597_s25 + $0x3a] sm:$0x3f]  ;;  %v20809_v63 = vld [vmem:[%s23597_s25 + $0x4a] sm:$0x3f] }
  0x9d   : > { %22493 = vmatprep.subr.msk.mxu0 %vm291_vm0, %v24281_v22  ;;  %22498 = vmatprep.subr.msk.mxu1 %vm291_vm0, %v24281_v22 }
  0x9e   : > { %22486 = vmatmul.mubr.msk.f32.vlgmr.msra.gmra.mxu0 %vm284_vm1, %v20803_v26  ;;  %22491 = vmatmul.mubr.msk.f32.vlgmr.msra.gmra.mxu1 %vm284_vm1, %v20805_v27  ;;  %v20960_v27 = vld [vmem:[%s23597_s25 + $0xa1] sm:$0xff] }
  0x9f   : > { %22494 = vmatpush3.msk.msra.mxu0 %vm291_vm0, %v24281_v22  ;;  %22499 = vmatpush3.msk.msra.mxu1 %vm291_vm0, %v24281_v22 }
  0xa0   : > { %22495 = vmatprep.mubr.msk.f32.mxu0 %vm284_vm1, %v23924_v0  ;;  %22500 = vmatprep.mubr.msk.f32.mxu1 %vm284_vm1, %v23943_v4  ;;  %v20811_v0 = vld [vmem:[%s23597_s25 + $0x5a] sm:$0x3f]  ;;  %v20813_v4 = vld [vmem:[%s23597_s25 + $0x6a] sm:$0x3f] }
  0xa1   : > { %22503 = vmatprep.subr.msk.mxu0 %vm291_vm0, %v24281_v22  ;;  %22508 = vmatprep.subr.msk.mxu1 %vm291_vm0, %v24281_v22 }
  0xa2   : > { %22496 = vmatmul.mubr.msk.f32.vlgmr.msra.gmra.mxu0 %vm284_vm1, %v20807_v60  ;;  %22501 = vmatmul.mubr.msk.f32.vlgmr.msra.gmra.mxu1 %vm284_vm1, %v20809_v63  ;;  %v20962_v60 = vld [vmem:[%s23597_s25 + $0xb1] sm:$0xff] }
  0xa3   : > { %22504 = vmatpush3.msk.msra.mxu0 %vm291_vm0, %v24281_v22  ;;  %22509 = vmatpush3.msk.msra.mxu1 %vm291_vm0, %v24281_v22 }
  0xa4   : > { %22505 = vmatprep.mubr.msk.f32.mxu0 %vm284_vm1, %v23946_v7  ;;  %22510 = vmatprep.mubr.msk.f32.mxu1 %vm284_vm1, %v23965_v12  ;;  %v20815_v7 = vld [vmem:[%s23597_s25 + $0x7a] sm:$0x3f]  ;;  %v20817_v12 = vld [vmem:[%s23597_s25 + $0x8a] sm:$0x3f] }
  0xa5   : > { %22513 = vmatprep.subr.msk.mxu0 %vm291_vm0, %v24281_v22  ;;  %22518 = vmatprep.subr.msk.mxu1 %vm291_vm0, %v24281_v22 }
  0xa6   : > { %22506 = vmatmul.mubr.msk.f32.vlgmr.msra.gmra.mxu0 %vm284_vm1, %v20811_v0  ;;  %22511 = vmatmul.mubr.msk.f32.vlgmr.msra.gmra.mxu1 %vm284_vm1, %v20813_v4  ;;  %v20961_v4 = vld [vmem:[%s23597_s25 + $0xa9] sm:$0x3f] }
  0xa7   : > { %22514 = vmatpush3.msk.msra.mxu0 %vm291_vm0, %v24281_v22  ;;  %22519 = vmatpush3.msk.msra.mxu1 %vm291_vm0, %v24281_v22 }
  0xa8   : > { %22515 = vmatprep.mubr.msk.f32.mxu0 %vm284_vm1, %v23968_v15  ;;  %22520 = vmatprep.mubr.msk.f32.mxu1 %vm284_vm1, %v23987_v20  ;;  %v20819_v15 = vld [vmem:[%s23597_s25 + $0x9a] sm:$0x3f]  ;;  %v20821_v20 = vld [vmem:[%s23597_s25 + $0xaa] sm:$0x3f] }
  0xa9   : > { %22523 = vmatprep.subr.msk.mxu0 %vm291_vm0, %v24281_v22  ;;  %22528 = vmatprep.subr.msk.mxu1 %vm291_vm0, %v24281_v22 }
  0xaa   : > { %22516 = vmatmul.mubr.msk.f32.vlgmr.msra.gmra.mxu0 %vm284_vm1, %v20815_v7  ;;  %22521 = vmatmul.mubr.msk.f32.vlgmr.msra.gmra.mxu1 %vm284_vm1, %v20817_v12  ;;  %v20963_v7 = vld [vmem:[%s23597_s25 + $0xb9] sm:$0x3f] }
  0xab   : > { %22524 = vmatpush3.msk.msra.mxu0 %vm291_vm0, %v24281_v22  ;;  %22529 = vmatpush3.msk.msra.mxu1 %vm291_vm0, %v24281_v22 }
  0xac   : > { %22525 = vmatprep.mubr.msk.f32.mxu0 %vm284_vm1, %v23990_v23  ;;  %22530 = vmatprep.mubr.msk.f32.mxu1 %vm284_vm1, %v24009_v28  ;;  %v20823_v23 = vld [vmem:[%s23597_s25 + $0xba] sm:$0x3f]  ;;  %v20825_v28 = vld [vmem:[%s23597_s25 + $0xca] sm:$0x3f] }
  0xad   : > { %22533 = vmatprep.subr.msk.mxu0 %vm291_vm0, %v24281_v22  ;;  %22538 = vmatprep.subr.msk.mxu1 %vm291_vm0, %v24281_v22 }
  0xae   : > { %22526 = vmatmul.mubr.msk.f32.vlgmr.msra.gmra.mxu0 %vm284_vm1, %v20819_v15  ;;  %22531 = vmatmul.mubr.msk.f32.vlgmr.msra.gmra.mxu1 %vm284_vm1, %v20821_v20  ;;  %v20964_v20 = vld [vmem:[%s23597_s25 + $0xc1] sm:$0xff] }
  0xaf   : > { %22534 = vmatpush3.msk.msra.mxu0 %vm291_vm0, %v24281_v22  ;;  %22539 = vmatpush3.msk.msra.mxu1 %vm291_vm0, %v24281_v22 }
  0xb0   : > { %22535 = vmatprep.mubr.msk.f32.mxu0 %vm284_vm1, %v24012_v29  ;;  %22540 = vmatprep.mubr.msk.f32.mxu1 %vm284_vm1, %v24031_v33  ;;  %v24401_v29 = vld [vmem:[%s26851_s1 + $0x18] sm:$0x7]  ;;  %v20829_v33 = vld [vmem:[%s23597_s25 + $0xea] sm:$0x3f] }
  0xb1   : > { %22543 = vmatprep.subr.msk.mxu0 %vm291_vm0, %v24281_v22  ;;  %22548 = vmatprep.subr.msk.mxu1 %vm291_vm0, %v24281_v22 }
  0xb2   : > { %22536 = vmatmul.mubr.msk.f32.vlgmr.msra.gmra.mxu0 %vm284_vm1, %v20823_v23  ;;  %22541 = vmatmul.mubr.msk.f32.vlgmr.msra.gmra.mxu1 %vm284_vm1, %v20825_v28  ;;  %v20966_v23 = vld [vmem:[%s23597_s25 + $0xd1] sm:$0xff] }
  0xb3   : > { %22544 = vmatpush3.msk.msra.mxu0 %vm291_vm0, %v24281_v22  ;;  %22549 = vmatpush3.msk.msra.mxu1 %vm291_vm0, %v24281_v22  ;;  %v20957_v22 = vld [vmem:[%s23597_s25 + $0x89] sm:$0x3f] }
  0xb4   : > { %22545 = vmatprep.mubr.msk.f32.mxu0 %vm284_vm1, %v24034_v36  ;;  %22550 = vmatprep.mubr.msk.f32.mxu1 %vm284_vm1, %v24394_v30  ;;  %v20874_v36 = vld [vmem:[%s23597_s25 + $0x28] sm:$0x3f] }
  0xb5   : > { %22553 = vmatprep.subr.msk.mxu0 %vm291_vm0, %v24401_v29  ;;  %22558 = vmatprep.subr.msk.mxu1 %vm291_vm0, %v24401_v29 }
  0xb6   : > { %22546 = vmatmul.mubr.msk.f32.vlgmr.msra.gmra.mxu0 %vm284_vm1, %v20827_v32  ;;  %22551 = vmatmul.mubr.msk.f32.vlgmr.msra.gmra.mxu1 %vm284_vm1, %v20829_v33  ;;  %v20965_v32 = vld [vmem:[%s23597_s25 + $0xc9] sm:$0x3f]  ;;  %v20967_v33 = vld [vmem:[%s23597_s25 + $0xd9] sm:$0x3f] }
  0xb7   : > { %22554 = vmatpush3.msk.msra.mxu0 %vm291_vm0, %v24401_v29  ;;  %22559 = vmatpush3.msk.msra.mxu1 %vm291_vm0, %v24401_v29 }
  0xb8   : > { %22555 = vmatprep.mubr.msk.f32.mxu0 %vm284_vm1, %v23765_v34  ;;  %22560 = vmatprep.mubr.msk.f32.mxu1 %vm284_vm1, %v23768_v35  ;;  %v20878_v34 = vld [vmem:[%s23597_s25 + $0x48] sm:$0x3f]  ;;  %v20880_v35 = vld [vmem:[%s23597_s25 + $0x58] sm:$0x3f] }
  0xb9   : > { %22563 = vmatprep.subr.msk.mxu0 %vm291_vm0, %v24401_v29  ;;  %22568 = vmatprep.subr.msk.mxu1 %vm291_vm0, %v24401_v29 }
  0xba   : > { %22556 = vmatmul.mubr.msk.f32.vlgmr.msra.gmra.mxu0 %vm284_vm1, %v20874_v36  ;;  %22561 = vmatmul.mubr.msk.f32.vlgmr.msra.gmra.mxu1 %vm284_vm1, %v20876_v37 }
  0xbb   : > { %22564 = vmatpush3.msk.msra.mxu0 %vm291_vm0, %v24401_v29  ;;  %22569 = vmatpush3.msk.msra.mxu1 %vm291_vm0, %v24401_v29 }
  0xbc   : > { %22565 = vmatprep.mubr.msk.f32.mxu0 %vm284_vm1, %v23787_v38  ;;  %22570 = vmatprep.mubr.msk.f32.mxu1 %vm284_vm1, %v23790_v39  ;;  %v20882_v38 = vld [vmem:[%s23597_s25 + $0x68] sm:$0x3f]  ;;  %v20884_v39 = vld [vmem:[%s23597_s25 + $0x78] sm:$0x3f] }
  0xbd   : > { %22573 = vmatprep.subr.msk.mxu0 %vm291_vm0, %v24401_v29  ;;  %22578 = vmatprep.subr.msk.mxu1 %vm291_vm0, %v24401_v29 }
  0xbe   : > { %22566 = vmatmul.mubr.msk.f32.vlgmr.msra.gmra.mxu0 %vm284_vm1, %v20878_v34  ;;  %22571 = vmatmul.mubr.msk.f32.vlgmr.msra.gmra.mxu1 %vm284_vm1, %v20880_v35  ;;  %v20970_v34 = vld [vmem:[%s23597_s25 + $0xf1] sm:$0xff] }
  0xbf   : > { %22574 = vmatpush3.msk.msra.mxu0 %vm291_vm0, %v24401_v29  ;;  %22579 = vmatpush3.msk.msra.mxu1 %vm291_vm0, %v24401_v29 }
  0xc0   : > { %22575 = vmatprep.mubr.msk.f32.mxu0 %vm284_vm1, %v23809_v42  ;;  %22580 = vmatprep.mubr.msk.f32.mxu1 %vm284_vm1, %v23812_v43  ;;  %v20886_v42 = vld [vmem:[%s23597_s25 + $0x88] sm:$0x3f]  ;;  %v20888_v43 = vld [vmem:[%s23597_s25 + $0x98] sm:$0x3f] }
  0xc1   : > { %22583 = vmatprep.subr.msk.mxu0 %vm291_vm0, %v24401_v29  ;;  %22588 = vmatprep.subr.msk.mxu1 %vm291_vm0, %v24401_v29 }
  0xc2   : > { %22576 = vmatmul.mubr.msk.f32.vlgmr.msra.gmra.mxu0 %vm284_vm1, %v20882_v38  ;;  %22581 = vmatmul.mubr.msk.f32.vlgmr.msra.gmra.mxu1 %vm284_vm1, %v20884_v39  ;;  %v24688_v39 = vld [vmem:[%s26851_s1 + $0x20] sm:$0x7] }
  0xc3   : > { %22584 = vmatpush3.msk.msra.mxu0 %vm291_vm0, %v24401_v29  ;;  %22589 = vmatpush3.msk.msra.mxu1 %vm291_vm0, %v24401_v29 }
  0xc4   : > { %22585 = vmatprep.mubr.msk.f32.mxu0 %vm284_vm1, %v23831_v46  ;;  %22590 = vmatprep.mubr.msk.f32.mxu1 %vm284_vm1, %v23834_v47  ;;  %v20890_v46 = vld [vmem:[%s23597_s25 + $0xa8] sm:$0x3f]  ;;  %v20892_v47 = vld [vmem:[%s23597_s25 + $0xb8] sm:$0x3f] }
  0xc5   : > { %22593 = vmatprep.subr.msk.mxu0 %vm291_vm0, %v24401_v29  ;;  %22598 = vmatprep.subr.msk.mxu1 %vm291_vm0, %v24401_v29 }
  0xc6   : > { %22586 = vmatmul.mubr.msk.f32.vlgmr.msra.gmra.mxu0 %vm284_vm1, %v20886_v42  ;;  %22591 = vmatmul.mubr.msk.f32.vlgmr.msra.gmra.mxu1 %vm284_vm1, %v20888_v43  ;;  %v20969_v42 = vld [vmem:[%s23597_s25 + $0xe9] sm:$0x3f]  ;;  %v20971_v43 = vld [vmem:[%s23597_s25 + $0xf9] sm:$0x3f] }
  0xc7   : > { %22594 = vmatpush3.msk.msra.mxu0 %vm291_vm0, %v24401_v29  ;;  %22599 = vmatpush3.msk.msra.mxu1 %vm291_vm0, %v24401_v29 }
  0xc8   : > { %22595 = vmatprep.mubr.msk.f32.mxu0 %vm284_vm1, %v23853_v50  ;;  %22600 = vmatprep.mubr.msk.f32.mxu1 %vm284_vm1, %v23856_v51  ;;  %v20894_v50 = vld [vmem:[%s23597_s25 + $0xc8] sm:$0x3f]  ;;  %v20896_v51 = vld [vmem:[%s23597_s25 + $0xd8] sm:$0x3f] }
  0xc9   : > { %22603 = vmatprep.subr.msk.mxu0 %vm291_vm0, %v24401_v29  ;;  %22608 = vmatprep.subr.msk.mxu1 %vm291_vm0, %v24401_v29 }
  0xca   : > { %22596 = vmatmul.mubr.msk.f32.vlgmr.msra.gmra.mxu0 %vm284_vm1, %v20890_v46  ;;  %22601 = vmatmul.mubr.msk.f32.vlgmr.msra.gmra.mxu1 %vm284_vm1, %v20892_v47 }
  0xcb   : > { %22604 = vmatpush3.msk.msra.mxu0 %vm291_vm0, %v24401_v29  ;;  %22609 = vmatpush3.msk.msra.mxu1 %vm291_vm0, %v24401_v29 }
  0xcc   : > { %22605 = vmatprep.mubr.msk.f32.mxu0 %vm284_vm1, %v23875_v54  ;;  %22610 = vmatprep.mubr.msk.f32.mxu1 %vm284_vm1, %v23878_v55  ;;  %v24519_v54 = vld [vmem:[%s26851_s1 + $0x1c] sm:$0x7]  ;;  %v20898_v55 = vld [vmem:[%s23597_s25 + $0xe8] sm:$0x3f] }
  0xcd   : > { %22613 = vmatprep.subr.msk.mxu0 %vm291_vm0, %v24401_v29  ;;  %22618 = vmatprep.subr.msk.mxu1 %vm291_vm0, %v24401_v29 }
  0xce   : > { %22606 = vmatmul.mubr.msk.f32.vlgmr.msra.gmra.mxu0 %vm284_vm1, %v20894_v50  ;;  %22611 = vmatmul.mubr.msk.f32.vlgmr.msra.gmra.mxu1 %vm284_vm1, %v20896_v51  ;;  %v21015_v50 = vld [vmem:[%s23597_s25 + $0x22] sm:$0xff]  ;;  %v21017_v51 = vld [vmem:[%s23597_s25 + $0x32] sm:$0xff] }
  0xcf   : > { %22614 = vmatpush3.msk.msra.mxu0 %vm291_vm0, %v24401_v29  ;;  %22619 = vmatpush3.msk.msra.mxu1 %vm291_vm0, %v24401_v29 }
  0xd0   : > { %22615 = vmatprep.mubr.msk.f32.mxu0 %vm284_vm1, %v24154_v62  ;;  %22620 = vmatprep.mubr.msk.f32.mxu1 %vm284_vm1, %v20899_v40  ;;  %v20949_v62 = vld [vmem:[%s23597_s25 + $0x49] sm:$0x3f] }
  0xd1   : > { %22623 = vmatprep.subr.msk.mxu0 %vm291_vm0, %v24519_v54  ;;  %22628 = vmatprep.subr.msk.mxu1 %vm291_vm0, %v24519_v54 }
  0xd2   : > { %v24536_v31 = vpop.f32.mrf.mxu0  ;;  %v24538_v48 = vpop.f32.mrf.mxu1  ;;  %22616 = vmatmul.mubr.msk.f32.vlgmr.msra.gmra.mxu0 %vm284_vm1, %v20898_v55  ;;  %22621 = vmatmul.mubr.msk.f32.vlgmr.msra.gmra.mxu1 %vm284_vm1, %v20900_v41  ;;  %v21016_v41 = vld [vmem:[%s23597_s25 + $0x2a] sm:$0x3f] }
  0xd3   : > { %22624 = vmatpush3.msk.msra.mxu0 %vm291_vm0, %v24519_v54  ;;  %22629 = vmatpush3.msk.msra.mxu1 %vm291_vm0, %v24519_v54 }
  0xd4   : > { %v24548_v53 = vpop.f32.mrf.mxu0  ;;  %v24550_v56 = vpop.f32.mrf.mxu1  ;;  %22625 = vmatprep.mubr.msk.f32.mxu0 %vm284_vm1, %v20944_v44  ;;  %22630 = vmatprep.mubr.msk.f32.mxu1 %vm284_vm1, %v20946_v45  ;;  %v21018_v44 = vld [vmem:[%s23597_s25 + $0x3a] sm:$0x3f] }
  0xd5   : > { %22633 = vmatprep.subr.msk.mxu0 %vm291_vm0, %v24519_v54  ;;  %22638 = vmatprep.subr.msk.mxu1 %vm291_vm0, %v24519_v54 }
  0xd6   : > { %v24560_v59 = vpop.f32.mrf.mxu0  ;;  %v24562_v61 = vpop.f32.mrf.mxu1  ;;  %22626 = vmatmul.mubr.msk.f32.vlgmr.msra.gmra.mxu0 %vm284_vm1, %v20945_v49  ;;  %22631 = vmatmul.mubr.msk.f32.vlgmr.msra.gmra.mxu1 %vm284_vm1, %v20947_v52 }
  0xd7   : > { %22634 = vmatpush3.msk.msra.mxu0 %vm291_vm0, %v24519_v54  ;;  %22639 = vmatpush3.msk.msra.mxu1 %vm291_vm0, %v24519_v54 }
  0xd8   : > { %v24572_v3 = vpop.f32.mrf.mxu0  ;;  %v24574_v8 = vpop.f32.mrf.mxu1  ;;  %22635 = vmatprep.mubr.msk.f32.mxu0 %vm284_vm1, %v20948_v57  ;;  %22640 = vmatprep.mubr.msk.f32.mxu1 %vm284_vm1, %v20950_v58 }
  0xd9   : > { %22643 = vmatprep.subr.msk.mxu0 %vm291_vm0, %v24519_v54  ;;  %22648 = vmatprep.subr.msk.mxu1 %vm291_vm0, %v24519_v54 }
  0xda   : > { %v24584_v2 = vpop.f32.mrf.mxu0  ;;  %v24586_v5 = vpop.f32.mrf.mxu1  ;;  %22636 = vmatmul.mubr.msk.f32.vlgmr.msra.gmra.mxu0 %vm284_vm1, %v20949_v62  ;;  %22641 = vmatmul.mubr.msk.f32.vlgmr.msra.gmra.mxu1 %vm284_vm1, %v20951_v1  ;;  %v21020_v1 = vld [vmem:[%s23597_s25 + $0x4a] sm:$0x3f] }
  0xdb   : > { %22644 = vmatpush3.msk.msra.mxu0 %vm291_vm0, %v24519_v54  ;;  %22649 = vmatpush3.msk.msra.mxu1 %vm291_vm0, %v24519_v54 }
  0xdc   : > { %v24596_v10 = vpop.f32.mrf.mxu0  ;;  %v24598_v13 = vpop.f32.mrf.mxu1  ;;  %22645 = vmatprep.mubr.msk.f32.mxu0 %vm284_vm1, %v20952_v11  ;;  %22650 = vmatprep.mubr.msk.f32.mxu1 %vm284_vm1, %v20954_v16  ;;  %v21022_v11 = vld [vmem:[%s23597_s25 + $0x5a] sm:$0x3f] }
  0xdd   : > { %22653 = vmatprep.subr.msk.mxu0 %vm291_vm0, %v24519_v54  ;;  %22658 = vmatprep.subr.msk.mxu1 %vm291_vm0, %v24519_v54 }
  0xde   : > { %v24608_v18 = vpop.f32.mrf.mxu0  ;;  %v24610_v21 = vpop.f32.mrf.mxu1  ;;  %22646 = vmatmul.mubr.msk.f32.vlgmr.msra.gmra.mxu0 %vm284_vm1, %v20953_v6  ;;  %22651 = vmatmul.mubr.msk.f32.vlgmr.msra.gmra.mxu1 %vm284_vm1, %v20955_v9 }
  0xdf   : > { %22654 = vmatpush3.msk.msra.mxu0 %vm291_vm0, %v24519_v54  ;;  %22659 = vmatpush3.msk.msra.mxu1 %vm291_vm0, %v24519_v54 }
  0xe0   : > { %v24620_v24 = vpop.f32.mrf.mxu0  ;;  %v24622_v26 = vpop.f32.mrf.mxu1  ;;  %22655 = vmatprep.mubr.msk.f32.mxu0 %vm284_vm1, %v20956_v14  ;;  %22660 = vmatprep.mubr.msk.f32.mxu1 %vm284_vm1, %v20958_v17 }
  0xe1   : > { %22663 = vmatprep.subr.msk.mxu0 %vm291_vm0, %v24519_v54  ;;  %22668 = vmatprep.subr.msk.mxu1 %vm291_vm0, %v24519_v54 }
  0xe2   : > { %v24632_v63 = vpop.f32.mrf.mxu0  ;;  %v24634_v0 = vpop.f32.mrf.mxu1  ;;  %22656 = vmatmul.mubr.msk.f32.vlgmr.msra.gmra.mxu0 %vm284_vm1, %v20957_v22  ;;  %22661 = vmatmul.mubr.msk.f32.vlgmr.msra.gmra.mxu1 %vm284_vm1, %v20959_v25  ;;  %v21024_v25 = vld [vmem:[%s23597_s25 + $0x6a] sm:$0x3f] }
  0xe3   : > { %22664 = vmatpush3.msk.msra.mxu0 %vm291_vm0, %v24519_v54  ;;  %22669 = vmatpush3.msk.msra.mxu1 %vm291_vm0, %v24519_v54 }
  0xe4   : > { %v24644_v12 = vpop.f32.mrf.mxu0  ;;  %v24646_v15 = vpop.f32.mrf.mxu1  ;;  %22665 = vmatprep.mubr.msk.f32.mxu0 %vm284_vm1, %v20960_v27  ;;  %22670 = vmatprep.mubr.msk.f32.mxu1 %vm284_vm1, %v20962_v60  ;;  %v21026_v27 = vld [vmem:[%s23597_s25 + $0x7a] sm:$0x3f] }
  0xe5   : > { %22673 = vmatprep.subr.msk.mxu0 %vm291_vm0, %v24519_v54  ;;  %22678 = vmatprep.subr.msk.mxu1 %vm291_vm0, %v24519_v54 }
  0xe6   : > { %v24656_v28 = vpop.f32.mrf.mxu0  ;;  %v24658_v29 = vpop.f32.mrf.mxu1  ;;  %22666 = vmatmul.mubr.msk.f32.vlgmr.msra.gmra.mxu0 %vm284_vm1, %v20961_v4  ;;  %22671 = vmatmul.mubr.msk.f32.vlgmr.msra.gmra.mxu1 %vm284_vm1, %v20963_v7 }
  0xe7   : > { %22674 = vmatpush3.msk.msra.mxu0 %vm291_vm0, %v24519_v54  ;;  %22679 = vmatpush3.msk.msra.mxu1 %vm291_vm0, %v24519_v54 }
  0xe8   : > { %v24668_v36 = vpop.f32.mrf.mxu0  ;;  %v24670_v37 = vpop.f32.mrf.mxu1  ;;  %22675 = vmatprep.mubr.msk.f32.mxu0 %vm284_vm1, %v20964_v20  ;;  %22680 = vmatprep.mubr.msk.f32.mxu1 %vm284_vm1, %v20966_v23 }
  0xe9   : > { %22683 = vmatprep.subr.msk.mxu0 %vm291_vm0, %v24519_v54  ;;  %22688 = vmatprep.subr.msk.mxu1 %vm291_vm0, %v24519_v54 }
  0xea   : > { %v24679_v35 = vpop.f32.mrf.mxu0  ;;  %v24681_v38 = vpop.f32.mrf.mxu1  ;;  %22676 = vmatmul.mubr.msk.f32.vlgmr.msra.gmra.mxu0 %vm284_vm1, %v20965_v32  ;;  %22681 = vmatmul.mubr.msk.f32.vlgmr.msra.gmra.mxu1 %vm284_vm1, %v20967_v33  ;;  %v21028_v33 = vld [vmem:[%s23597_s25 + $0x8a] sm:$0x3f] }
  0xeb   : > { %22684 = vmatpush3.msk.msra.mxu0 %vm291_vm0, %v24519_v54  ;;  %22689 = vmatpush3.msk.msra.mxu1 %vm291_vm0, %v24519_v54 }
  0xec   : > { %v24696_v46 = vpop.f32.mrf.mxu0  ;;  %v24698_v47 = vpop.f32.mrf.mxu1  ;;  %22685 = vmatprep.mubr.msk.f32.mxu0 %vm284_vm1, %v24274_v19  ;;  %22690 = vmatprep.mubr.msk.f32.mxu1 %vm284_vm1, %v20970_v34  ;;  %v21030_v34 = vld [vmem:[%s23597_s25 + $0x9a] sm:$0x3f] }
  0xed   : > { %22693 = vmatprep.subr.msk.mxu0 %vm291_vm0, %v24688_v39  ;;  %22698 = vmatprep.subr.msk.mxu1 %vm291_vm0, %v24688_v39 }
  0xee   : > { %v22207_v40 = vpop.f32.mrf.mxu0  ;;  %v22212_v54 = vpop.f32.mrf.mxu1  ;;  %22686 = vmatmul.mubr.msk.f32.vlgmr.msra.gmra.mxu0 %vm284_vm1, %v20969_v42  ;;  %22691 = vmatmul.mubr.msk.f32.vlgmr.msra.gmra.mxu1 %vm284_vm1, %v20971_v43 }
  0xef   : > { %v24712_v19 = vadd.f32 %v22207_v40, %v24536_v31  ;;  %v24715_v55 = vadd.f32 %v22212_v54, %v24538_v48  ;;  %22694 = vmatpush3.msk.msra.mxu0 %vm291_vm0, %v24688_v39  ;;  %22699 = vmatpush3.msk.msra.mxu1 %vm291_vm0, %v24688_v39  ;;  %v21019_v31 = vld [vmem:[%s23597_s25 + $0x42] sm:$0xff]  ;;  %v21021_v48 = vld [vmem:[%s23597_s25 + $0x52] sm:$0xff] }
  0xf0   : > { %v24723_v45 = vpop.f32.mrf.mxu0  ;;  %v24725_v49 = vpop.f32.mrf.mxu1  ;;  %22695 = vmatprep.mubr.msk.f32.mxu0 %vm284_vm1, %v21015_v50  ;;  %22700 = vmatprep.mubr.msk.f32.mxu1 %vm284_vm1, %v21017_v51 }
  0xf1   : > { %22703 = vmatprep.subr.msk.mxu0 %vm291_vm0, %v24688_v39  ;;  %22708 = vmatprep.subr.msk.mxu1 %vm291_vm0, %v24688_v39 }
  0xf2   : > { %v22217_v52 = vpop.f32.mrf.mxu0  ;;  %v22222_v57 = vpop.f32.mrf.mxu1  ;;  %22696 = vmatmul.mubr.msk.f32.vlgmr.msra.gmra.mxu0 %vm284_vm1, %v21016_v41  ;;  %22701 = vmatmul.mubr.msk.f32.vlgmr.msra.gmra.mxu1 %vm284_vm1, %v21018_v44  ;;  %v21032_v41 = vld [vmem:[%s23597_s25 + $0xaa] sm:$0x3f]  ;;  %v21034_v44 = vld [vmem:[%s23597_s25 + $0xba] sm:$0x3f] }
  0xf3   : > { %v24738_v58 = vadd.f32 %v22217_v52, %v24560_v59  ;;  %v24741_v62 = vadd.f32 %v22222_v57, %v24562_v61  ;;  %22704 = vmatpush3.msk.msra.mxu0 %vm291_vm0, %v24688_v39  ;;  %22709 = vmatpush3.msk.msra.mxu1 %vm291_vm0, %v24688_v39  ;;  %v21023_v59 = vld [vmem:[%s23597_s25 + $0x62] sm:$0xff]  ;;  %v21025_v61 = vld [vmem:[%s23597_s25 + $0x72] sm:$0xff] }
  0xf4   : > { %v24749_v16 = vpop.f32.mrf.mxu0  ;;  %v24751_v6 = vpop.f32.mrf.mxu1  ;;  %22705 = vmatprep.mubr.msk.f32.mxu0 %vm284_vm1, %v21019_v31  ;;  %22710 = vmatprep.mubr.msk.f32.mxu1 %vm284_vm1, %v21021_v48 }
  0xf5   : > { %22713 = vmatprep.subr.msk.mxu0 %vm291_vm0, %v24688_v39  ;;  %22718 = vmatprep.subr.msk.mxu1 %vm291_vm0, %v24688_v39 }
  0xf6   : > { %v22227_v9 = vpop.f32.mrf.mxu0  ;;  %v22232_v14 = vpop.f32.mrf.mxu1  ;;  %22706 = vmatmul.mubr.msk.f32.vlgmr.msra.gmra.mxu0 %vm284_vm1, %v21020_v1  ;;  %22711 = vmatmul.mubr.msk.f32.vlgmr.msra.gmra.mxu1 %vm284_vm1, %v21022_v11 }
  0xf7   : > { %v24764_v17 = vadd.f32 %v22227_v9, %v24584_v2  ;;  %v24767_v22 = vadd.f32 %v22232_v14, %v24586_v5  ;;  %22714 = vmatpush3.msk.msra.mxu0 %vm291_vm0, %v24688_v39  ;;  %22719 = vmatpush3.msk.msra.mxu1 %vm291_vm0, %v24688_v39  ;;  %v21027_v2 = vld [vmem:[%s23597_s25 + $0x82] sm:$0xff]  ;;  %v21029_v5 = vld [vmem:[%s23597_s25 + $0x92] sm:$0xff] }
  0xf8   : > { %v24775_v60 = vpop.f32.mrf.mxu0  ;;  %v24777_v4 = vpop.f32.mrf.mxu1  ;;  %22715 = vmatprep.mubr.msk.f32.mxu0 %vm284_vm1, %v21023_v59  ;;  %22720 = vmatprep.mubr.msk.f32.mxu1 %vm284_vm1, %v21025_v61  ;;  %v21036_v59 = vld [vmem:[%s23597_s25 + $0xca] sm:$0x3f]  ;;  %v21038_v61 = vld [vmem:[%s23597_s25 + $0xda] sm:$0x3f] }
  0xf9   : > { %22723 = vmatprep.subr.msk.mxu0 %vm291_vm0, %v24688_v39  ;;  %22728 = vmatprep.subr.msk.mxu1 %vm291_vm0, %v24688_v39 }
  0xfa   : > { %v22237_v7 = vpop.f32.mrf.mxu0  ;;  %v22242_v20 = vpop.f32.mrf.mxu1  ;;  %22716 = vmatmul.mubr.msk.f32.vlgmr.msra.gmra.mxu0 %vm284_vm1, %v21024_v25  ;;  %22721 = vmatmul.mubr.msk.f32.vlgmr.msra.gmra.mxu1 %vm284_vm1, %v21026_v27 }
  0xfb   : > { %v24790_v23 = vadd.f32 %v22237_v7, %v24608_v18  ;;  %v24793_v32 = vadd.f32 %v22242_v20, %v24610_v21  ;;  %22724 = vmatpush3.msk.msra.mxu0 %vm291_vm0, %v24688_v39  ;;  %22729 = vmatpush3.msk.msra.mxu1 %vm291_vm0, %v24688_v39  ;;  %v21031_v18 = vld [vmem:[%s23597_s25 + $0xa2] sm:$0xff]  ;;  %v21033_v21 = vld [vmem:[%s23597_s25 + $0xb2] sm:$0xff]  ;;  %v21042_v7 = vld [vmem:[%s23597_s25 + $0xfa] sm:$0x3f] }
  0xfc   : > { %v24801_v42 = vpop.f32.mrf.mxu0  ;;  %v24803_v43 = vpop.f32.mrf.mxu1  ;;  %22725 = vmatprep.mubr.msk.f32.mxu0 %vm284_vm1, %v21027_v2  ;;  %22730 = vmatprep.mubr.msk.f32.mxu1 %vm284_vm1, %v21029_v5  ;;  %v21040_v5 = vld [vmem:[%s23597_s25 + $0xea] sm:$0x3f] }
  0xfd   : > { %22733 = vmatprep.subr.msk.mxu0 %vm291_vm0, %v24688_v39  ;;  %22738 = vmatprep.subr.msk.mxu1 %vm291_vm0, %v24688_v39 }
  0xfe   : > { %v22247_v50 = vpop.f32.mrf.mxu0  ;;  %v22252_v51 = vpop.f32.mrf.mxu1  ;;  %22726 = vmatmul.mubr.msk.f32.vlgmr.msra.gmra.mxu0 %vm284_vm1, %v21028_v33  ;;  %22731 = vmatmul.mubr.msk.f32.vlgmr.msra.gmra.mxu1 %vm284_vm1, %v21030_v34 }
  0xff   : > { %v24816_v40 = vadd.f32 %v22247_v50, %v24632_v63  ;;  %v24819_v54 = vadd.f32 %v22252_v51, %v24634_v0  ;;  %22734 = vmatpush3.msk.msra.mxu0 %vm291_vm0, %v24688_v39  ;;  %22739 = vmatpush3.msk.msra.mxu1 %vm291_vm0, %v24688_v39  ;;  %v21035_v63 = vld [vmem:[%s23597_s25 + $0xc2] sm:$0xff]  ;;  %v21037_v0 = vld [vmem:[%s23597_s25 + $0xd2] sm:$0xff] }
 0x100   : > { %v24827_v31 = vpop.f32.mrf.mxu0  ;;  %v24829_v48 = vpop.f32.mrf.mxu1  ;;  %22735 = vmatprep.mubr.msk.f32.mxu0 %vm284_vm1, %v21031_v18  ;;  %22740 = vmatprep.mubr.msk.f32.mxu1 %vm284_vm1, %v21033_v21 }
 0x101   : > { %22743 = vmatprep.subr.msk.mxu0 %vm291_vm0, %v24688_v39  ;;  %22748 = vmatprep.subr.msk.mxu1 %vm291_vm0, %v24688_v39 }
 0x102   : > { %v22257_v52 = vpop.f32.mrf.mxu0  ;;  %v22262_v57 = vpop.f32.mrf.mxu1  ;;  %22736 = vmatmul.mubr.msk.f32.vlgmr.msra.gmra.mxu0 %vm284_vm1, %v21032_v41  ;;  %22741 = vmatmul.mubr.msk.f32.vlgmr.msra.gmra.mxu1 %vm284_vm1, %v21034_v44 }
 0x103   : > { %v2314_v1 = vadd.f32 %v22257_v52, %v24656_v28  ;;  %v2395_v11 = vadd.f32 %v22262_v57, %v24658_v29  ;;  %22744 = vmatpush3.msk.msra.mxu0 %vm291_vm0, %v24688_v39  ;;  %22749 = vmatpush3.msk.msra.mxu1 %vm291_vm0, %v24688_v39  ;;  %v21041_v28 = vld [vmem:[%s23597_s25 + $0xf2] sm:$0xff] }
 0x104   : > { %v24849_v9 = vpop.f32.mrf.mxu0  ;;  %v24851_v14 = vpop.f32.mrf.mxu1  ;;  %22745 = vmatprep.mubr.msk.f32.mxu0 %vm284_vm1, %v21035_v63  ;;  %22750 = vmatprep.mubr.msk.f32.mxu1 %vm284_vm1, %v21037_v0 }
 0x105   : > { %22753 = vmatprep.subr.msk.mxu0 %vm291_vm0, %v24688_v39  ;;  %22758 = vmatprep.subr.msk.mxu1 %vm291_vm0, %v24688_v39 }
 0x106   : > { %v22267_v29 = vpop.f32.mrf.mxu0  ;;  %v22272_v25 = vpop.f32.mrf.mxu1  ;;  %22746 = vmatmul.mubr.msk.f32.vlgmr.msra.gmra.mxu0 %vm284_vm1, %v21036_v59  ;;  %22751 = vmatmul.mubr.msk.f32.vlgmr.msra.gmra.mxu1 %vm284_vm1, %v21038_v61 }
 0x107   : > { %v2476_v27 = vadd.f32 %v22267_v29, %v24679_v35  ;;  %v2557_v2 = vadd.f32 %v22272_v25, %v24681_v38  ;;  %22754 = vmatpush3.msk.msra.mxu0 %vm291_vm0, %v24688_v39  ;;  %22755 = vmatprep.mubr.msk.f32.mxu0 %vm284_vm1, %v24394_v30 }
 0x108   : > { %v24870_v20 = vpop.f32.mrf.mxu0  ;;  %v24872_v33 = vpop.f32.mrf.mxu1  ;;  %22759 = vmatpush3.msk.msra.mxu1 %vm291_vm0, %v24688_v39  ;;  %22760 = vmatprep.mubr.msk.f32.mxu1 %vm284_vm1, %v21041_v28 }
 0x10a   : > { %v22277_v35 = vpop.f32.mrf.mxu0  ;;  %v22282_v34 = vpop.f32.mrf.mxu1  ;;  %22756 = vmatmul.mubr.msk.f32.vlgmr.msra.gmra.mxu0 %vm284_vm1, %v21040_v5  ;;  %22761 = vmatmul.mubr.msk.f32.vlgmr.msra.gmra.mxu1 %vm284_vm1, %v21042_v7 }
 0x10b   : > { %v3728_v38 = vadd.f32 %v22277_v35, %v24712_v19  ;;  %v3730_v30 = vadd.f32 %v22282_v34, %v24715_v55 }
 0x10c   : > { %v24881_v18 = vpop.f32.mrf.mxu0  ;;  %v24883_v21 = vpop.f32.mrf.mxu1 }
 0x10e   : > { %v22287_v50 = vpop.f32.mrf.mxu0  ;;  %v22292_v51 = vpop.f32.mrf.mxu1 }
 0x10f   : > { %v3732_v39 = vadd.f32 %v22287_v50, %v24738_v58  ;;  %v3734_v41 = vadd.f32 %v22292_v51, %v24741_v62 }
 0x110   : > { %v24887_v44 = vpop.f32.mrf.mxu0  ;;  %v24889_v63 = vpop.f32.mrf.mxu1 }
 0x112   : > { %v22297_v0 = vpop.f32.mrf.mxu0  ;;  %v22302_v52 = vpop.f32.mrf.mxu1 }
 0x113   : > { %v3736_v19 = vadd.f32 %v22297_v0, %v24764_v17  ;;  %v3738_v55 = vadd.f32 %v22302_v52, %v24767_v22 }
 0x114   : > { %v24893_v57 = vpop.f32.mrf.mxu0  ;;  %v24895_v59 = vpop.f32.mrf.mxu1 }
 0x115   : > { %26860 = vst [vmem:[#allocation5_spill] sm:$0xff] %v24895_v59 }
 0x116   : > { %v22307_v61 = vpop.f32.mrf.mxu0  ;;  %v22312_v28 = vpop.f32.mrf.mxu1 }
 0x117   : > { %v3740_v58 = vadd.f32 %v22307_v61, %v24790_v23  ;;  %v3742_v62 = vadd.f32 %v22312_v28, %v24793_v32 }
 0x118   : > { %v24899_v29 = vpop.f32.mrf.mxu0  ;;  %v24901_v25 = vpop.f32.mrf.mxu1 }
 0x119   : > { %26861 = vst [vmem:[#allocation6_spill] sm:$0xff] %v24899_v29  ;;  %26862 = vst [vmem:[#allocation7_spill] sm:$0xff] %v24901_v25 }
 0x11a   : > { %v22317_v5 = vpop.f32.mrf.mxu0  ;;  %v22322_v7 = vpop.f32.mrf.mxu1 }
 0x11b   : > { %v3744_v17 = vadd.f32 %v22317_v5, %v24816_v40  ;;  %v3746_v22 = vadd.f32 %v22322_v7, %v24819_v54 }
 0x11c   : > { %v24905_v35 = vpop.f32.mrf.mxu0  ;;  %v24907_v34 = vpop.f32.mrf.mxu1 }
 0x11d   : > { %26863 = vst [vmem:[#allocation8_spill] sm:$0xff] %v24905_v35  ;;  %26864 = vst [vmem:[#allocation9_spill] sm:$0xff] %v24907_v34 }
 0x11e   : > { %v22327_v50 = vpop.f32.mrf.mxu0  ;;  %v22332_v51 = vpop.f32.mrf.mxu1 }
 0x11f   : > { %v3748_v0 = vadd.f32 %v22327_v50, %v2314_v1  ;;  %v3750_v23 = vadd.f32 %v22332_v51, %v2395_v11 }
 0x120   : > { %v24909_v52 = vpop.f32.mrf.mxu0  ;;  %v24911_v32 = vpop.f32.mrf.mxu1 }
 0x121   : > { %26865 = vst [vmem:[#allocation10_spill] sm:$0xff] %v24909_v52  ;;  %26866 = vst [vmem:[#allocation11_spill] sm:$0xff] %v24911_v32 }
 0x122   : > { %v22337_v61 = vpop.f32.mrf.mxu0  ;;  %v22342_v28 = vpop.f32.mrf.mxu1 }
 0x123   : > { %v3752_v25 = vadd.f32 %v22337_v61, %v2476_v27  ;;  %v3754_v29 = vadd.f32 %v22342_v28, %v2557_v2 }
 0x124   : > { %v24913_v59 = vpop.f32.mrf.mxu0  ;;  %v24915_v40 = vpop.f32.mrf.mxu1 }
 0x125   : > { %26867 = vst [vmem:[#allocation12_spill] sm:$0xff] %v24913_v59  ;;  %26868 = vst [vmem:[#allocation13_spill] sm:$0xff] %v24915_v40 }
 0x126   : > { %v22347_v54 = vpop.f32.mrf.mxu0  ;;  %v22352_v5 = vpop.f32.mrf.mxu1 }
 0x127   : > { %v4924_v7 = vadd.f32 %v22347_v54, %v3728_v38  ;;  %v4926_v34 = vadd.f32 %v22352_v5, %v3730_v30 }
 0x128   : > { %v24917_v35 = vpop.f32.mrf.mxu0  ;;  %v24919_v1 = vpop.f32.mrf.mxu1 }
 0x129   : > { %26869 = vst [vmem:[#allocation14_spill] sm:$0xff] %v24917_v35  ;;  %26870 = vst [vmem:[#allocation15_spill] sm:$0xff] %v24919_v1 }
 0x12a   : > { %v22357_v11 = vpop.f32.mrf.mxu0  ;;  %v22362_v50 = vpop.f32.mrf.mxu1 }
 0x12b   : > { %v4928_v51 = vadd.f32 %v22357_v11, %v3732_v39  ;;  %v4930_v32 = vadd.f32 %v22362_v50, %v3734_v41 }
 0x12c   : > { %v24921_v52 = vpop.f32.mrf.mxu0  ;;  %v24923_v27 = vpop.f32.mrf.mxu1 }
 0x12d   : > { %26871 = vst [vmem:[#allocation16_spill] sm:$0xff] %v24921_v52  ;;  %26872 = vst [vmem:[#allocation17_spill] sm:$0xff] %v24923_v27 }
 0x12e   : > { %v22367_v2 = vpop.f32.mrf.mxu0  ;;  %v22372_v61 = vpop.f32.mrf.mxu1 }
 0x12f   : > { %v4932_v28 = vadd.f32 %v22367_v2, %v3736_v19  ;;  %v4934_v40 = vadd.f32 %v22372_v61, %v3738_v55 }
 0x130   : > { %v24925_v59 = vpop.f32.mrf.mxu0  ;;  %v24927_v38 = vpop.f32.mrf.mxu1 }
 0x131   : > { %26873 = vst [vmem:[#allocation18_spill] sm:$0xff] %v24925_v59  ;;  %26874 = vst [vmem:[#allocation19_spill] sm:$0xff] %v24927_v38 }
 0x132   : > { %v22377_v30 = vpop.f32.mrf.mxu0  ;;  %v22382_v54 = vpop.f32.mrf.mxu1 }
 0x133   : > { %v4936_v5 = vadd.f32 %v22377_v30, %v3740_v58  ;;  %v4938_v1 = vadd.f32 %v22382_v54, %v3742_v62 }
 0x134   : > { %v24929_v35 = vpop.f32.mrf.mxu0  ;;  %v24931_v39 = vpop.f32.mrf.mxu1 }
 0x135   : > { %26875 = vst [vmem:[#allocation20_spill] sm:$0xff] %v24929_v35  ;;  %26876 = vst [vmem:[#allocation21_spill] sm:$0xff] %v24931_v39 }
 0x136   : > { %v22387_v41 = vpop.f32.mrf.mxu0  ;;  %v22392_v11 = vpop.f32.mrf.mxu1 }
 0x137   : > { %v4940_v50 = vadd.f32 %v22387_v41, %v3744_v17  ;;  %v4942_v27 = vadd.f32 %v22392_v11, %v3746_v22  ;;  %v24948_v22 = vld [vmem:[%s26853_s3 + $0x18] sm:$0xff] }
 0x138   : > { %v24933_v52 = vpop.f32.mrf.mxu0  ;;  %v24935_v19 = vpop.f32.mrf.mxu1  ;;  %26883 = vst [vmem:[#allocation28_spill] sm:$0xff] %v24948_v22  ;;  %22763 = vmatprep.subr.mxu0 %v24948_v22  ;;  %22770 = vmatprep.subr.mxu1 %v24948_v22 }
 0x139   : > { %26877 = vst [vmem:[#allocation22_spill] sm:$0xff] %v24933_v52  ;;  %26878 = vst [vmem:[#allocation23_spill] sm:$0xff] %v24935_v19  ;;  %22764 = vmatpush3.msra.mxu0 %v24948_v22  ;;  %22771 = vmatpush3.msra.mxu1 %v24948_v22 }
 0x13a   : > { %v22397_v55 = vpop.f32.mrf.mxu0  ;;  %v22402_v2 = vpop.f32.mrf.mxu1 }
 0x13b   : > { %v4944_v61 = vadd.f32 %v22397_v55, %v3748_v0  ;;  %v4946_v38 = vadd.f32 %v22402_v2, %v3750_v23 }
 0x13c   : > { %v24937_v59 = vpop.f32.mrf.mxu0  ;;  %v24939_v58 = vpop.f32.mrf.mxu1 }
 0x13d   : > { %26879 = vst [vmem:[#allocation24_spill] sm:$0xff] %v24937_v59  ;;  %26880 = vst [vmem:[#allocation25_spill] sm:$0xff] %v24939_v58 }
 0x13e   : > { %v22407_v62 = vpop.f32.mrf.mxu0  ;;  %v22412_v30 = vpop.f32.mrf.mxu1 }
 0x13f   : > { %v4948_v54 = vadd.f32 %v22407_v62, %v3752_v25  ;;  %v4950_v39 = vadd.f32 %v22412_v30, %v3754_v29  ;;  %v24957_v29 = vld [vmem:[%s26853_s3 + $0x10] sm:$0xff] }
 0x140   : > { %v24941_v35 = vpop.f32.mrf.mxu0  ;;  %v24943_v17 = vpop.f32.mrf.mxu1  ;;  %26884 = vst [vmem:[#allocation29_spill] sm:$0xff] %v24957_v29  ;;  %22765 = vmatprep.subr.mxu0 %v24957_v29  ;;  %22772 = vmatprep.subr.mxu1 %v24957_v29 }
 0x141   : > { %26881 = vst [vmem:[#allocation26_spill] sm:$0xff] %v24941_v35  ;;  %26882 = vst [vmem:[#allocation27_spill] sm:$0xff] %v24943_v17  ;;  %22766 = vmatpush3.msra.mxu0 %v24957_v29  ;;  %22773 = vmatpush3.msra.mxu1 %v24957_v29 }
 0x142   : > { %v22417_v0 = vpop.f32.mrf.mxu0  ;;  %v22422_v23 = vpop.f32.mrf.mxu1  ;;  %22777 = vmatprep.subr.mxu0 %v24948_v22  ;;  %22784 = vmatprep.subr.mxu1 %v24948_v22 }
 0x143   : > { %v6119_v25 = vadd.f32 %v22417_v0, %v4924_v7  ;;  %v6121_v41 = vadd.f32 %v22422_v23, %v4926_v34 }
 0x144   : > { %v24961_v11 = vpop.f32.mrf.mxu0  ;;  %v24963_v55 = vpop.f32.mrf.mxu1 }
 0x145   : > { %26885 = vst [vmem:[#allocation30_spill] sm:$0xff] %v24961_v11  ;;  %26886 = vst [vmem:[#allocation31_spill] sm:$0xff] %v24963_v55 }
 0x146   : > { %v22427_v2 = vpop.f32.mrf.mxu0  ;;  %v22432_v62 = vpop.f32.mrf.mxu1 }
 0x147   : > { %v6123_v7 = vadd.f32 %v22427_v2, %v4928_v51  ;;  %v6125_v34 = vadd.f32 %v22432_v62, %v4930_v32 }
 0x148   : > { %v24969_v30 = vpop.f32.mrf.mxu0  ;;  %v24971_v0 = vpop.f32.mrf.mxu1 }
 0x149   : > { %26887 = vst [vmem:[#allocation32_spill] sm:$0xff] %v24969_v30  ;;  %26888 = vst [vmem:[#allocation33_spill] sm:$0xff] %v24971_v0 }
 0x14a   : > { %v22437_v23 = vpop.f32.mrf.mxu0  ;;  %v22442_v11 = vpop.f32.mrf.mxu1 }
 0x14b   : > { %v6127_v17 = vadd.f32 %v22437_v23, %v4932_v28  ;;  %v6129_v55 = vadd.f32 %v22442_v11, %v4934_v40 }
 0x14c   : > { %v24973_v35 = vpop.f32.mrf.mxu0  ;;  %v24975_v58 = vpop.f32.mrf.mxu1 }
 0x14d   : > { %26889 = vst [vmem:[#allocation34_spill] sm:$0xff] %v24973_v35  ;;  %26890 = vst [vmem:[#allocation35_spill] sm:$0xff] %v24975_v58 }
 0x14e   : > { %v22447_v29 = vpop.f32.mrf.mxu0  ;;  %v22452_v59 = vpop.f32.mrf.mxu1 }
 0x14f   : > { %v6131_v19 = vadd.f32 %v22447_v29, %v4936_v5  ;;  %v6133_v22 = vadd.f32 %v22452_v59, %v4938_v1 }
 0x150   : > { %v24977_v52 = vpop.f32.mrf.mxu0  ;;  %v24979_v51 = vpop.f32.mrf.mxu1 }
 0x151   : > { %26891 = vst [vmem:[#allocation36_spill] sm:$0xff] %v24977_v52  ;;  %26892 = vst [vmem:[#allocation37_spill] sm:$0xff] %v24979_v51 }
 0x152   : > { %v22457_v32 = vpop.f32.mrf.mxu0  ;;  %v22462_v2 = vpop.f32.mrf.mxu1 }
 0x153   : > { %v6135_v62 = vadd.f32 %v22457_v32, %v4940_v50  ;;  %v6137_v0 = vadd.f32 %v22462_v2, %v4942_v27 }
 0x154   : > { %v24981_v30 = vpop.f32.mrf.mxu0  ;;  %v24983_v28 = vpop.f32.mrf.mxu1 }
 0x155   : > { %26893 = vst [vmem:[#allocation38_spill] sm:$0xff] %v24983_v28 }
 0x156   : > { %v22467_v40 = vpop.f32.mrf.mxu0  ;;  %v22472_v11 = vpop.f32.mrf.mxu1 }
 0x157   : > { %v6139_v23 = vadd.f32 %v22467_v40, %v4944_v61  ;;  %v6141_v58 = vadd.f32 %v22472_v11, %v4946_v38 }
 0x158   : > { %v24985_v35 = vpop.f32.mrf.mxu0  ;;  %v24987_v5 = vpop.f32.mrf.mxu1 }
 0x159   : > { %26894 = vst [vmem:[#allocation39_spill] sm:$0xff] %v24987_v5 }
 0x15a   : > { %v22477_v59 = vpop.f32.mrf.mxu0  ;;  %v22482_v1 = vpop.f32.mrf.mxu1 }
 0x15b   : > { %v6143_v29 = vadd.f32 %v22477_v59, %v4948_v54  ;;  %v6145_v51 = vadd.f32 %v22482_v1, %v4950_v39 }
 0x15c   : > { %v24989_v52 = vpop.f32.mrf.mxu0  ;;  %v24991_v50 = vpop.f32.mrf.mxu1 }
 0x15d   : > { %26895 = vst [vmem:[#allocation40_spill] sm:$0xff] %v24991_v50 }
 0x15e   : > { %v22487_v27 = vpop.f32.mrf.mxu0  ;;  %v22492_v32 = vpop.f32.mrf.mxu1 }
 0x15f   : > { %v24993_v2 = vadd.f32 %v22487_v27, %v6119_v25  ;;  %v24995_v28 = vadd.f32 %v22492_v32, %v6121_v41 }
 0x160   : > { %v24997_v61 = vpop.f32.mrf.mxu0  ;;  %v24999_v38 = vpop.f32.mrf.mxu1 }
 0x161   : > { %26896 = vst [vmem:[#allocation41_spill] sm:$0xff] %v24993_v2  ;;  %26897 = vst [vmem:[#allocation42_spill] sm:$0xff] %v24995_v28 }
 0x162   : > { %v22497_v40 = vpop.f32.mrf.mxu0  ;;  %v22502_v11 = vpop.f32.mrf.mxu1 }
 0x163   : > { %v25001_v5 = vadd.f32 %v22497_v40, %v6123_v7  ;;  %v25003_v54 = vadd.f32 %v22502_v11, %v6125_v34 }
 0x164   : > { %v25005_v39 = vpop.f32.mrf.mxu0  ;;  %v25007_v59 = vpop.f32.mrf.mxu1 }
 0x165   : > { %26898 = vst [vmem:[#allocation43_spill] sm:$0xff] %v25001_v5  ;;  %26899 = vst [vmem:[#allocation44_spill] sm:$0xff] %v25003_v54 }
 0x166   : > { %v22507_v1 = vpop.f32.mrf.mxu0  ;;  %v22512_v50 = vpop.f32.mrf.mxu1 }
 0x167   : > { %v25009_v25 = vadd.f32 %v22507_v1, %v6127_v17  ;;  %v25011_v41 = vadd.f32 %v22512_v50, %v6129_v55 }
 0x168   : > { %v25013_v27 = vpop.f32.mrf.mxu0  ;;  %v25015_v32 = vpop.f32.mrf.mxu1 }
 0x169   : > { %26900 = vst [vmem:[#allocation45_spill] sm:$0xff] %v25009_v25  ;;  %26901 = vst [vmem:[#allocation46_spill] sm:$0xff] %v25011_v41 }
 0x16a   : > { %v22517_v28 = vpop.f32.mrf.mxu0  ;;  %v22522_v2 = vpop.f32.mrf.mxu1 }
 0x16b   : > { %v25017_v7 = vadd.f32 %v22517_v28, %v6131_v19  ;;  %v25019_v34 = vadd.f32 %v22522_v2, %v6133_v22 }
 0x16c   : > { %v25021_v40 = vpop.f32.mrf.mxu0  ;;  %v25023_v11 = vpop.f32.mrf.mxu1 }
 0x16d   : > { %26902 = vst [vmem:[#allocation47_spill] sm:$0xff] %v25017_v7  ;;  %26903 = vst [vmem:[#allocation48_spill] sm:$0xff] %v25019_v34 }
 0x16e   : > { %v22527_v54 = vpop.f32.mrf.mxu0  ;;  %v22532_v5 = vpop.f32.mrf.mxu1 }
 0x16f   : > { %v25025_v17 = vadd.f32 %v22527_v54, %v6135_v62  ;;  %v25027_v55 = vadd.f32 %v22532_v5, %v6137_v0 }
 0x170   : > { %v25029_v50 = vpop.f32.mrf.mxu0  ;;  %v25031_v1 = vpop.f32.mrf.mxu1 }
 0x171   : > { %26904 = vst [vmem:[#allocation49_spill] sm:$0xff] %v25025_v17  ;;  %26905 = vst [vmem:[#allocation50_spill] sm:$0xff] %v25027_v55 }
 0x172   : > { %v22537_v41 = vpop.f32.mrf.mxu0  ;;  %v22542_v25 = vpop.f32.mrf.mxu1 }
 0x173   : > { %v25033_v19 = vadd.f32 %v22537_v41, %v6139_v23  ;;  %v25035_v22 = vadd.f32 %v22542_v25, %v6141_v58 }
 0x174   : > { %v25037_v28 = vpop.f32.mrf.mxu0  ;;  %v25039_v2 = vpop.f32.mrf.mxu1 }
 0x175   : > { %26906 = vst [vmem:[#allocation51_spill] sm:$0xff] %v25033_v19  ;;  %26907 = vst [vmem:[#allocation52_spill] sm:$0xff] %v25035_v22 }
 0x176   : > { %v22547_v34 = vpop.f32.mrf.mxu0  ;;  %v22552_v7 = vpop.f32.mrf.mxu1 }
 0x177   : > { %v25041_v62 = vadd.f32 %v22547_v34, %v6143_v29  ;;  %v25043_v0 = vadd.f32 %v22552_v7, %v6145_v51 }
 0x178   : > { %v25045_v5 = vpop.f32.mrf.mxu0  ;;  %v25047_v54 = vpop.f32.mrf.mxu1 }
 0x179   : > { %26908 = vst [vmem:[#allocation53_spill] sm:$0xff] %v25041_v62  ;;  %26909 = vst [vmem:[#allocation54_spill] sm:$0xff] %v25043_v0 }
 0x17a   : > { %v25049_v55 = vpop.f32.mrf.mxu0  ;;  %v25051_v23 = vpop.f32.mrf.mxu1 }
 0x17c   : > { %v25053_v58 = vpop.f32.mrf.mxu0  ;;  %v25055_v25 = vpop.f32.mrf.mxu1 }
 0x17d   : > { %26910 = vst [vmem:[#allocation55_spill] sm:$0xff] %v25055_v25 }
 0x17e   : > { %v25057_v41 = vpop.f32.mrf.mxu0  ;;  %v25059_v22 = vpop.f32.mrf.mxu1 }
 0x17f   : > { %26911 = vst [vmem:[#allocation56_spill] sm:$0xff] %v25057_v41  ;;  %26912 = vst [vmem:[#allocation57_spill] sm:$0xff] %v25059_v22 }
 0x180   : > { %v25061_v29 = vpop.f32.mrf.mxu0  ;;  %v25063_v51 = vpop.f32.mrf.mxu1 }
 0x181   : > { %26913 = vst [vmem:[#allocation58_spill] sm:$0xff] %v25061_v29  ;;  %26914 = vst [vmem:[#allocation59_spill] sm:$0xff] %v25063_v51 }
 0x182   : > { %v25065_v7 = vpop.f32.mrf.mxu0  ;;  %v25067_v34 = vpop.f32.mrf.mxu1 }
 0x183   : > { %26915 = vst [vmem:[#allocation60_spill] sm:$0xff] %v25065_v7  ;;  %26916 = vst [vmem:[#allocation61_spill] sm:$0xff] %v25067_v34 }
 0x184   : > { %v25069_v0 = vpop.f32.mrf.mxu0  ;;  %v25071_v62 = vpop.f32.mrf.mxu1 }
 0x185   : > { %26917 = vst [vmem:[#allocation62_spill] sm:$0xff] %v25069_v0  ;;  %26918 = vst [vmem:[#allocation63_spill] sm:$0xff] %v25071_v62 }
 0x186   : > { %v25073_v19 = vpop.f32.mrf.mxu0  ;;  %v25075_v17 = vpop.f32.mrf.mxu1 }
 0x187   : > { %26919 = vst [vmem:[#allocation64_spill] sm:$0xff] %v25073_v19  ;;  %26920 = vst [vmem:[#allocation65_spill] sm:$0xff] %v25075_v17 }
 0x188   : > { %v25077_v25 = vpop.f32.mrf.mxu0  ;;  %v25079_v41 = vpop.f32.mrf.mxu1 }
 0x189   : > { %26921 = vst [vmem:[#allocation66_spill] sm:$0xff] %v25077_v25  ;;  %26922 = vst [vmem:[#allocation67_spill] sm:$0xff] %v25079_v41 }
 0x18a   : > { %v25081_v22 = vpop.f32.mrf.mxu0  ;;  %v25083_v29 = vpop.f32.mrf.mxu1 }
 0x18b   : > { %26923 = vst [vmem:[#allocation68_spill] sm:$0xff] %v25081_v22  ;;  %26924 = vst [vmem:[#allocation69_spill] sm:$0xff] %v25083_v29 }
 0x18c   : > { %v25085_v51 = vpop.f32.mrf.mxu0  ;;  %v25087_v7 = vpop.f32.mrf.mxu1 }
 0x18d   : > { %26925 = vst [vmem:[#allocation70_spill] sm:$0xff] %v25085_v51  ;;  %26926 = vst [vmem:[#allocation71_spill] sm:$0xff] %v25087_v7 }
 0x18e   : > { %v25089_v34 = vpop.f32.mrf.mxu0  ;;  %v25091_v0 = vpop.f32.mrf.mxu1 }
 0x18f   : > { %26927 = vst [vmem:[#allocation72_spill] sm:$0xff] %v25089_v34 }
 0x190   : > { %v25093_v62 = vpop.f32.mrf.mxu0  ;;  %v25095_v19 = vpop.f32.mrf.mxu1 }
 0x191   : > { %26928 = vst [vmem:[#allocation73_spill] sm:$0xff] %v25093_v62  ;;  %26929 = vst [vmem:[#allocation74_spill] sm:$0xff] %v25095_v19  ;;  %v1499_v62 = vadd.f32 %v24723_v45, %v24548_v53  ;;  %v1985_v53 = vadd.f32 %v24801_v42, %v24620_v24  ;;  %v2147_v45 = vadd.f32 %v24827_v31, %v24644_v12  ;;  %v26938_v31 = vld [vmem:[#allocation7_spill] sm:$0xff] }
 0x192   : > { %v25097_v17 = vpop.f32.mrf.mxu0  ;;  %v25099_v25 = vpop.f32.mrf.mxu1  ;;  %v2471_v24 = vadd.f32 %v24870_v20, %v24696_v46  ;;  %v26937_v46 = vld [vmem:[#allocation6_spill] sm:$0xff] }
 0x193   : > { %26930 = vst [vmem:[#allocation75_spill] sm:$0xff] %v25097_v17  ;;  %26931 = vst [vmem:[#allocation76_spill] sm:$0xff] %v25099_v25  ;;  %v1580_v17 = vadd.f32 %v24725_v49, %v24550_v56  ;;  %v2066_v56 = vadd.f32 %v24803_v43, %v24622_v26  ;;  %v2552_v26 = vadd.f32 %v24872_v33, %v24698_v47  ;;  %v26941_v33 = vld [vmem:[#allocation10_spill] sm:$0xff] }
 0x194   : > { %v25101_v41 = vpop.f32.mrf.mxu0  ;;  %v25103_v22 = vpop.f32.mrf.mxu1  ;;  %v3727_v12 = vadd.f32 %v24881_v18, %v1499_v62  ;;  %v3739_v43 = vadd.f32 %v26937_v46, %v1985_v53  ;;  %v26944_v62 = vld [vmem:[#allocation13_spill] sm:$0xff]  ;;  %v26946_v53 = vld [vmem:[#allocation15_spill] sm:$0xff] }
 0x195   : > { %26932 = vst [vmem:[#allocation77_spill] sm:$0xff] %v25101_v41  ;;  %26933 = vst [vmem:[#allocation78_spill] sm:$0xff] %v25103_v22  ;;  %v1661_v22 = vadd.f32 %v24749_v16, %v24572_v3  ;;  %v1742_v41 = vadd.f32 %v24751_v6, %v24574_v8  ;;  %v2228_v3 = vadd.f32 %v24829_v48, %v24646_v15  ;;  %v26939_v48 = vld [vmem:[#allocation8_spill] sm:$0xff]  ;;  %v26948_v46 = vld [vmem:[#allocation17_spill] sm:$0xff] }
 0x196   : > { %v25105_v29 = vpop.f32.mrf.mxu0  ;;  %v25107_v51 = vpop.f32.mrf.mxu1  ;;  %v3729_v15 = vadd.f32 %v24883_v21, %v1580_v17  ;;  %v3741_v47 = vadd.f32 %v26938_v31, %v2066_v56  ;;  %v26942_v21 = vld [vmem:[#allocation11_spill] sm:$0xff]  ;;  %v26949_v31 = vld [vmem:[#allocation18_spill] sm:$0xff] }
 0x197   : > { %v3731_v16 = vadd.f32 %v24887_v44, %v1661_v22  ;;  %v3733_v6 = vadd.f32 %v24889_v63, %v1742_v41  ;;  %v26943_v22 = vld [vmem:[#allocation12_spill] sm:$0xff]  ;;  %v3753_v41 = vadd.f32 %v26944_v62, %v2552_v26  ;;  %v26955_v62 = vld [vmem:[#allocation22_spill] sm:$0xff] }
 0x198   : > { %v25109_v7 = vpop.f32.mrf.mxu0  ;;  %v25111_v34 = vpop.f32.mrf.mxu1  ;;  %v4925_v56 = vadd.f32 %v26946_v53, %v3729_v15  ;;  %v26957_v53 = vld [vmem:[#allocation24_spill] sm:$0xff] }
 0x199   : > { %26934 = vst [vmem:[#allocation79_spill] sm:$0xff] %v25109_v7  ;;  %26935 = vst [vmem:[#allocation80_spill] sm:$0xff] %v25111_v34  ;;  %v1823_v7 = vadd.f32 %v24775_v60, %v24596_v10  ;;  %v1904_v34 = vadd.f32 %v24777_v4, %v24598_v13  ;;  %v2309_v10 = vadd.f32 %v24849_v9, %v24668_v36  ;;  %v26936_v4 = vld [vmem:[#allocation5_spill] sm:$0xff] }
 0x19a   : > { %v25117_v19 = vpop.f32.mrf.mxu0  ;;  %v25119_v25 = vpop.f32.mrf.mxu1  ;;  %v2390_v13 = vadd.f32 %v24851_v14, %v24670_v37  ;;  %v3743_v9 = vadd.f32 %v26939_v48, %v2147_v45  ;;  %v26940_v14 = vld [vmem:[#allocation9_spill] sm:$0xff]  ;;  %v26950_v48 = vld [vmem:[#allocation19_spill] sm:$0xff] }
 0x19b   : > { %v3735_v37 = vadd.f32 %v24893_v57, %v1823_v7  ;;  %v3737_v42 = vadd.f32 %v26936_v4, %v1904_v34  ;;  %v3745_v20 = vadd.f32 %v26940_v14, %v2228_v3  ;;  %v3747_v18 = vadd.f32 %v26941_v33, %v2309_v10  ;;  %v26945_v7 = vld [vmem:[#allocation14_spill] sm:$0xff]  ;;  %v26947_v4 = vld [vmem:[#allocation16_spill] sm:$0xff] }
 0x19c   : > { %v25137_v49 = vpop.f32.mrf.mxu0  ;;  %v25139_v8 = vpop.f32.mrf.mxu1  ;;  %v3749_v44 = vadd.f32 %v26942_v21, %v2390_v13  ;;  %v3751_v57 = vadd.f32 %v26943_v22, %v2471_v24  ;;  %v4923_v34 = vadd.f32 %v26945_v7, %v3727_v12  ;;  %v4927_v45 = vadd.f32 %v26947_v4, %v3731_v16  ;;  %v26953_v21 = vld [vmem:[#allocation20_spill] sm:$0xff]  ;;  %v26954_v22 = vld [vmem:[#allocation21_spill] sm:$0xff]  ;;  %v26956_v7 = vld [vmem:[#allocation23_spill] sm:$0xff] }
 0x19d   : > { %v4929_v3 = vadd.f32 %v26948_v46, %v3733_v6  ;;  %v4931_v10 = vadd.f32 %v26949_v31, %v3735_v37  ;;  %v4933_v13 = vadd.f32 %v26950_v48, %v3737_v42  ;;  %v4935_v24 = vadd.f32 %v26953_v21, %v3739_v43  ;;  %v26958_v4 = vld [vmem:[#allocation25_spill] sm:$0xff]  ;;  %v26959_v46 = vld [vmem:[#allocation26_spill] sm:$0xff]  ;;  %v26960_v31 = vld [vmem:[#allocation27_spill] sm:$0xff] }
 0x19e   : > { %v25153_v60 = vpop.f32.mrf.mxu0  ;;  %v25155_v36 = vpop.f32.mrf.mxu1  ;;  %v4937_v26 = vadd.f32 %v26954_v22, %v3741_v47  ;;  %v4939_v12 = vadd.f32 %v26955_v62, %v3743_v9  ;;  %v4941_v15 = vadd.f32 %v26956_v7, %v3745_v20  ;;  %v4943_v16 = vadd.f32 %v26957_v53, %v3747_v18  ;;  %v26963_v21 = vld [vmem:[#allocation31_spill] sm:$0xff]  ;;  %v26964_v22 = vld [vmem:[#allocation32_spill] sm:$0xff]  ;;  %v26965_v62 = vld [vmem:[#allocation33_spill] sm:$0xff] }
 0x19f   : > { %v4945_v6 = vadd.f32 %v26958_v4, %v3749_v44  ;;  %v4947_v37 = vadd.f32 %v26959_v46, %v3751_v57  ;;  %v4949_v42 = vadd.f32 %v26960_v31, %v3753_v41  ;;  %v6120_v47 = vadd.f32 %v26963_v21, %v4925_v56  ;;  %v26966_v7 = vld [vmem:[#allocation34_spill] sm:$0xff]  ;;  %v26967_v53 = vld [vmem:[#allocation35_spill] sm:$0xff]  ;;  %v26968_v4 = vld [vmem:[#allocation36_spill] sm:$0xff] }
 0x1a0   : > { %v25165_v63 = vpop.f32.mrf.mxu0  ;;  %v25167_v17 = vpop.f32.mrf.mxu1  ;;  %v6122_v9 = vadd.f32 %v26964_v22, %v4927_v45  ;;  %v6124_v20 = vadd.f32 %v26965_v62, %v4929_v3  ;;  %v6126_v18 = vadd.f32 %v26966_v7, %v4931_v10  ;;  %v6128_v44 = vadd.f32 %v26967_v53, %v4933_v13  ;;  %v26969_v46 = vld [vmem:[#allocation37_spill] sm:$0xff]  ;;  %v26971_v21 = vld [vmem:[#allocation39_spill] sm:$0xff]  ;;  %v26972_v22 = vld [vmem:[#allocation40_spill] sm:$0xff] }
 0x1a1   : > { %v6130_v57 = vadd.f32 %v26968_v4, %v4935_v24  ;;  %v6132_v41 = vadd.f32 %v26969_v46, %v4937_v26  ;;  %v6138_v45 = vadd.f32 %v24985_v35, %v4943_v16  ;;  %v6140_v3 = vadd.f32 %v26971_v21, %v4945_v6  ;;  %v26979_v53 = vld [vmem:[#allocation57_spill] sm:$0xff]  ;;  %v26987_v21 = vld [vmem:[#allocation63_spill] sm:$0xff] }
 0x1a2   : > { %v25177_v14 = vpop.f32.mrf.mxu0  ;;  %v25179_v33 = vpop.f32.mrf.mxu1  ;;  %v6142_v10 = vadd.f32 %v24989_v52, %v4947_v37  ;;  %v6144_v13 = vadd.f32 %v26972_v22, %v4949_v42  ;;  %v7315_v26 = vadd.f32 %v24999_v38, %v6120_v47  ;;  %v7321_v35 = vadd.f32 %v25013_v27, %v6126_v18  ;;  %v26973_v42 = vld [vmem:[#allocation41_spill] sm:$0xff] }
 0x1a3   : > { %26951 = vst [vmem:[#allocation5_spill] sm:$0xff] %v25177_v14  ;;  %26952 = vst [vmem:[#allocation6_spill] sm:$0xff] %v25179_v33  ;;  %v26962_v33 = vld [vmem:[#allocation30_spill] sm:$0xff]  ;;  %v7325_v52 = vadd.f32 %v25021_v40, %v6130_v57  ;;  %v7327_v16 = vadd.f32 %v25023_v11, %v6132_v41  ;;  %v8510_v40 = vadd.f32 %v25049_v55, %v26973_v42  ;;  %v26981_v55 = vld [vmem:[#allocation59_spill] sm:$0xff] }
 0x1a4   : > { %v25189_v48 = vpop.f32.mrf.mxu0  ;;  %v25191_v14 = vpop.f32.mrf.mxu1  ;;  %v6118_v43 = vadd.f32 %v26962_v33, %v4923_v34  ;;  %v6134_v34 = vadd.f32 %v24981_v30, %v4939_v12  ;;  %v26970_v33 = vld [vmem:[#allocation38_spill] sm:$0xff]  ;;  %v7317_v30 = vadd.f32 %v25005_v39, %v6122_v9  ;;  %v7319_v12 = vadd.f32 %v25007_v59, %v6124_v20  ;;  %v26982_v46 = vld [vmem:[#allocation45_spill] sm:$0xff] }
 0x1a5   : > { %26961 = vst [vmem:[#allocation7_spill] sm:$0xff] %v25189_v48  ;;  %v6136_v56 = vadd.f32 %v26970_v33, %v4941_v15  ;;  %v7323_v15 = vadd.f32 %v25015_v32, %v6128_v44  ;;  %v7333_v39 = vadd.f32 %v25037_v28, %v6138_v45  ;;  %v7335_v59 = vadd.f32 %v25039_v2, %v6140_v3  ;;  %v26974_v11 = vld [vmem:[#allocation42_spill] sm:$0xff]  ;;  %v26976_v28 = vld [vmem:[#allocation43_spill] sm:$0xff]  ;;  %v26977_v2 = vld [vmem:[#allocation56_spill] sm:$0xff] }
 0x1a6   : > { %v25201_v31 = vpop.f32.mrf.mxu0  ;;  %v25203_v48 = vpop.f32.mrf.mxu1  ;;  %v7313_v24 = vadd.f32 %v24997_v61, %v6118_v43  ;;  %v7329_v61 = vadd.f32 %v25029_v50, %v6134_v34  ;;  %v7337_v27 = vadd.f32 %v25045_v5, %v6142_v10  ;;  %v7339_v32 = vadd.f32 %v25047_v54, %v6144_v13  ;;  %v26975_v43 = vld [vmem:[#allocation55_spill] sm:$0xff]  ;;  %v26978_v5 = vld [vmem:[#allocation44_spill] sm:$0xff]  ;;  %v26980_v44 = vld [vmem:[#allocation58_spill] sm:$0xff] }
 0x1a7   : > { %v7331_v38 = vadd.f32 %v25031_v1, %v6136_v56  ;;  %v8512_v50 = vadd.f32 %v25051_v23, %v26974_v11  ;;  %v8511_v47 = vadd.f32 %v26975_v43, %v7315_v26  ;;  %v8514_v18 = vadd.f32 %v26977_v2, %v26976_v28  ;;  %v26983_v23 = vld [vmem:[#allocation60_spill] sm:$0xff]  ;;  %v26985_v34 = vld [vmem:[#allocation61_spill] sm:$0xff]  ;;  %v26986_v56 = vld [vmem:[#allocation62_spill] sm:$0xff] }
 0x1a8   : > { %v25213_v62 = vpop.f32.mrf.mxu0  ;;  %v25215_v7 = vpop.f32.mrf.mxu1  ;;  %v8509_v1 = vadd.f32 %v25053_v58, %v7313_v24  ;;  %v8516_v54 = vadd.f32 %v26979_v53, %v26978_v5  ;;  %v8513_v4 = vadd.f32 %v26980_v44, %v7317_v30  ;;  %v8515_v57 = vadd.f32 %v26981_v55, %v7319_v12  ;;  %v26984_v58 = vld [vmem:[#allocation46_spill] sm:$0xff]  ;;  %v26989_v13 = vld [vmem:[#allocation47_spill] sm:$0xff]  ;;  %v26990_v24 = vld [vmem:[#allocation64_spill] sm:$0xff] }
 0x1a9   : > { %v8518_v41 = vadd.f32 %v26983_v23, %v26982_v46  ;;  %v8520_v33 = vadd.f32 %v26985_v34, %v26984_v58  ;;  %v8517_v45 = vadd.f32 %v26986_v56, %v7321_v35  ;;  %v8519_v3 = vadd.f32 %v26987_v21, %v7323_v15  ;;  %v26991_v30 = vld [vmem:[#allocation48_spill] sm:$0xff]  ;;  %v26992_v12 = vld [vmem:[#allocation65_spill] sm:$0xff]  ;;  %v26993_v11 = vld [vmem:[#allocation66_spill] sm:$0xff] }
 0x1aa   : > { %v25225_v6 = vpop.f32.mrf.mxu0  ;;  %v25227_v37 = vpop.f32.mrf.mxu1  ;;  %v8522_v26 = vadd.f32 %v26990_v24, %v26989_v13  ;;  %v8524_v42 = vadd.f32 %v26992_v12, %v26991_v30  ;;  %v25264_v43 = vadd.f32 %v26993_v11, %v7325_v52  ;;  %v26994_v28 = vld [vmem:[#allocation67_spill] sm:$0xff]  ;;  %v26995_v35 = vld [vmem:[#allocation49_spill] sm:$0xff]  ;;  %v26996_v5 = vld [vmem:[#allocation68_spill] sm:$0xff]  ;;  %v9705_v12 = vadd.f32 %v25105_v29, %v8510_v40 }
 0x1ab   : > { %v25267_v2 = vadd.f32 %v26994_v28, %v7327_v16  ;;  %v25271_v15 = vadd.f32 %v26996_v5, %v26995_v35  ;;  %v26997_v53 = vld [vmem:[#allocation50_spill] sm:$0xff]  ;;  %v26998_v44 = vld [vmem:[#allocation69_spill] sm:$0xff]  ;;  %v27000_v58 = vld [vmem:[#allocation71_spill] sm:$0xff] }
 0x1ac   : > { %v25239_v9 = vpop.f32.mrf.mxu0  ;;  %v25241_v20 = vpop.f32.mrf.mxu1  ;;  %v25275_v55 = vadd.f32 %v26998_v44, %v26997_v53  ;;  %v26999_v46 = vld [vmem:[#allocation70_spill] sm:$0xff]  ;;  %v25281_v34 = vadd.f32 %v27000_v58, %v7331_v38  ;;  %v27003_v16 = vld [vmem:[#allocation51_spill] sm:$0xff]  ;;  %v27004_v21 = vld [vmem:[#allocation72_spill] sm:$0xff] }
 0x1ad   : > { %v25278_v23 = vadd.f32 %v26999_v46, %v7329_v61  ;;  %v25289_v13 = vadd.f32 %v27004_v21, %v27003_v16  ;;  %v27005_v24 = vld [vmem:[#allocation52_spill] sm:$0xff]  ;;  %v9707_v61 = vadd.f32 %v25107_v51, %v8512_v50  ;;  %v27006_v11 = vld [vmem:[#allocation73_spill] sm:$0xff]  ;;  %v27007_v28 = vld [vmem:[#allocation74_spill] sm:$0xff] }
 0x1ae   : > { %v25255_v10 = vpop.f32.mrf.mxu0  ;;  %v25257_v22 = vpop.f32.mrf.mxu1  ;;  %v25293_v30 = vadd.f32 %v25091_v0, %v27005_v24  ;;  %v25298_v38 = vadd.f32 %v27006_v11, %v7333_v39  ;;  %v25301_v35 = vadd.f32 %v27007_v28, %v7335_v59  ;;  %v27008_v5 = vld [vmem:[#allocation53_spill] sm:$0xff]  ;;  %v27009_v53 = vld [vmem:[#allocation75_spill] sm:$0xff]  ;;  %v27010_v46 = vld [vmem:[#allocation54_spill] sm:$0xff] }
 0x1af   : > { %26988 = vst [vmem:[#allocation8_spill] sm:$0xff] %v25257_v22  ;;  %v25305_v44 = vadd.f32 %v27009_v53, %v27008_v5  ;;  %v27011_v58 = vld [vmem:[#allocation76_spill] sm:$0xff]  ;;  %v25314_v29 = vld [vmem:[%s26852_s2] ss:$0 sm:$0xff]  ;;  %v27012_v39 = vld [vmem:[#allocation79_spill] sm:$0xff] }
 0x1b0   : > { %v25283_v56 = vpop.f32.mrf.mxu0  ;;  %v25285_v52 = vpop.f32.mrf.mxu1  ;;  %v25309_v16 = vadd.f32 %v27011_v58, %v27010_v46  ;;  %v9704_v40 = vadd.f32 %v27012_v39, %v8509_v1  ;;  %v27013_v50 = vld [vmem:[#allocation80_spill] sm:$0xff]  ;;  %v27014_v11 = vld [vmem:[#allocation77_spill] sm:$0xff]  ;;  %v27015_v5 = vld [vmem:[#allocation78_spill] sm:$0xff]  ;;  %v9709_v46 = vadd.f32 %v25117_v19, %v8514_v18  ;;  %v9711_v58 = vadd.f32 %v25119_v25, %v8516_v54 }
 0x1b1   : > { %27001 = vst [vmem:[#allocation9_spill] sm:$0xff] %v25283_v56  ;;  %27002 = vst [vmem:[#allocation10_spill] sm:$0xff] %v25285_v52  ;;  %v9706_v59 = vadd.f32 %v27013_v50, %v8511_v47  ;;  %v25319_v28 = vadd.f32 %v27014_v11, %v7337_v27  ;;  %v25322_v53 = vadd.f32 %v27015_v5, %v7339_v32 }
 0x1b2   : > { %v22697_v0 = vpop.f32.mrf.mxu0  ;;  %v22702_v51 = vpop.f32.mrf.mxu1  ;;  %v9710_v27 = vadd.f32 %v25139_v8, %v8515_v57  ;;  %v9715_v32 = vadd.f32 %v25155_v36, %v8520_v33  ;;  %v9712_v50 = vadd.f32 %v25165_v63, %v8517_v45  ;;  %v27016_v33 = vld [vmem:[#allocation5_spill] sm:$0xff] }
 0x1b3   : > { %v10900_v21 = vadd.f32 %v22697_v0, %v9705_v12  ;;  %v10902_v24 = vadd.f32 %v22702_v51, %v9707_v61  ;;  %v9708_v12 = vadd.f32 %v25137_v49, %v8513_v4  ;;  %v9713_v61 = vadd.f32 %v25153_v60, %v8518_v41 }
 0x1b4   : > { %v9837_v52 = vpop.f32.mrf.mxu0  ;;  %v9918_v56 = vpop.f32.mrf.mxu1 }
 0x1b5   : > { %v10935_v22 = vadd.f32 %v25314_v29, %v10900_v21  ;;  %v10937_v1 = vadd.f32 %v25314_v29, %v10902_v24  ;;  %v10899_v39 = vadd.f32 %v9837_v52, %v9704_v40  ;;  %v10901_v47 = vadd.f32 %v9918_v56, %v9706_v59  ;;  %v27017_v40 = vld [vmem:[#allocation6_spill] sm:$0xff] }
 0x1b6   : > { %v22707_v0 = vpop.f32.mrf.mxu0  ;;  %v22712_v19 = vpop.f32.mrf.mxu1  ;;  %v9714_v56 = vadd.f32 %v25167_v17, %v8519_v3  ;;  %v9719_v59 = vadd.f32 %v27017_v40, %v8524_v42  ;;  %v9718_v42 = vadd.f32 %v25191_v14, %v25267_v2 }
 0x1b7   : > { %v10963_v18 = vmax.f32 %v10935_v22, 0.0  ;;  %v10965_v25 = vmax.f32 %v10937_v1, 0.0  ;;  %v10934_v54 = vadd.f32 %v25314_v29, %v10899_v39  ;;  %v10936_v51 = vadd.f32 %v25314_v29, %v10901_v47 }
 0x1b8   : > { %v10904_v52 = vadd.f32 %v22707_v0, %v9709_v46  ;;  %v10906_v49 = vadd.f32 %v22712_v19, %v9711_v58  ;;  %v9999_v4 = vpop.f32.mrf.mxu0  ;;  %v10080_v8 = vpop.f32.mrf.mxu1  ;;  %v9717_v22 = vadd.f32 %v27016_v33, %v8522_v26  ;;  %v27018_v26 = vld [vmem:[#allocation7_spill] sm:$0xff] }
 0x1b9   : > { %10993 = vst.msk [vmem:[#allocation2 + $0x8] sm:$0x3f] %vm10992_vm2, %v10963_v18  ;;  %10995 = vst.msk [vmem:[#allocation2 + $0x18] sm:$0x3f] %vm10992_vm2, %v10965_v25  ;;  %v10962_v60 = vmax.f32 %v10934_v54, 0.0  ;;  %v10964_v36 = vmax.f32 %v10936_v51, 0.0  ;;  %v10903_v57 = vadd.f32 %v9999_v4, %v9708_v12  ;;  %v10905_v41 = vadd.f32 %v10080_v8, %v9710_v27 }
 0x1ba   : > { %v10939_v63 = vadd.f32 %v25314_v29, %v10904_v52  ;;  %v10941_v17 = vadd.f32 %v25314_v29, %v10906_v49  ;;  %v22717_v45 = vpop.f32.mrf.mxu0  ;;  %v22722_v3 = vpop.f32.mrf.mxu1  ;;  %v9716_v46 = vadd.f32 %v27018_v26, %v25264_v43 }
 0x1bb   : > { %10991 = vst.msk [vmem:[#allocation2] sm:$0xff] %vm10990_vm3, %v10962_v60  ;;  %10994 = vst.msk [vmem:[#allocation2 + $0x10] sm:$0xff] %vm10990_vm3, %v10964_v36  ;;  %v10938_v21 = vadd.f32 %v25314_v29, %v10903_v57  ;;  %v10940_v24 = vadd.f32 %v25314_v29, %v10905_v41  ;;  %v10908_v11 = vadd.f32 %v22717_v45, %v9713_v61 }
 0x1bc   : > { %v10910_v5 = vadd.f32 %v22722_v3, %v9715_v32  ;;  %v10967_v58 = vmax.f32 %v10939_v63, 0.0  ;;  %v10969_v1 = vmax.f32 %v10941_v17, 0.0  ;;  %v10161_v39 = vpop.f32.mrf.mxu0  ;;  %v10242_v47 = vpop.f32.mrf.mxu1  ;;  %v9721_v61 = vadd.f32 %v25201_v31, %v25271_v15 }
 0x1bd   : > { %v10966_v12 = vmax.f32 %v10938_v21, 0.0  ;;  %v10968_v27 = vmax.f32 %v10940_v24, 0.0  ;;  %v10943_v0 = vadd.f32 %v25314_v29, %v10908_v11  ;;  %v9723_v32 = vadd.f32 %v25203_v48, %v25275_v55 }
 0x1be   : > { %v10945_v19 = vadd.f32 %v25314_v29, %v10910_v5  ;;  %10997 = vst.msk [vmem:[#allocation2 + $0x28] sm:$0x3f] %vm10992_vm2, %v10967_v58  ;;  %10999 = vst.msk [vmem:[#allocation2 + $0x38] sm:$0x3f] %vm10992_vm2, %v10969_v1  ;;  %v10907_v14 = vadd.f32 %v10161_v39, %v9712_v50  ;;  %v10909_v43 = vadd.f32 %v10242_v47, %v9714_v56  ;;  %v22727_v2 = vpop.f32.mrf.mxu0  ;;  %v22732_v18 = vpop.f32.mrf.mxu1 }
 0x1bf   : > { %10996 = vst.msk [vmem:[#allocation2 + $0x20] sm:$0xff] %vm10990_vm3, %v10966_v12  ;;  %10998 = vst.msk [vmem:[#allocation2 + $0x30] sm:$0xff] %vm10990_vm3, %v10968_v27  ;;  %v10971_v25 = vmax.f32 %v10943_v0, 0.0  ;;  %v10912_v51 = vadd.f32 %v22727_v2, %v9717_v22  ;;  %v10914_v52 = vadd.f32 %v22732_v18, %v9719_v59  ;;  %v9720_v31 = vadd.f32 %v25213_v62, %v25278_v23 }
 0x1c0   : > { %v10973_v54 = vmax.f32 %v10945_v19, 0.0  ;;  %v9722_v48 = vadd.f32 %v25215_v7, %v25281_v34  ;;  %v10942_v15 = vadd.f32 %v25314_v29, %v10907_v14  ;;  %v10944_v55 = vadd.f32 %v25314_v29, %v10909_v43  ;;  %v10323_v50 = vpop.f32.mrf.mxu0  ;;  %v10404_v56 = vpop.f32.mrf.mxu1  ;;  %v27021_v19 = vld [vmem:[#allocation8_spill] sm:$0xff] }
 0x1c1   : > { %11001 = vst.msk [vmem:[#allocation2 + $0x48] sm:$0x3f] %vm10992_vm2, %v10971_v25  ;;  %v10947_v49 = vadd.f32 %v25314_v29, %v10912_v51  ;;  %v10949_v4 = vadd.f32 %v25314_v29, %v10914_v52  ;;  %v10911_v8 = vadd.f32 %v10323_v50, %v9716_v46  ;;  %v10913_v60 = vadd.f32 %v10404_v56, %v9718_v42  ;;  %v27020_v42 = vld [vmem:[#allocation29_spill] sm:$0xff] }
 0x1c2   : > { %11003 = vst.msk [vmem:[#allocation2 + $0x58] sm:$0x3f] %vm10992_vm2, %v10973_v54  ;;  %v9725_v62 = vadd.f32 %v25225_v6, %v25289_v13  ;;  %v9727_v7 = vadd.f32 %v25227_v37, %v25293_v30  ;;  %v10970_v23 = vmax.f32 %v10942_v15, 0.0  ;;  %v10972_v34 = vmax.f32 %v10944_v55, 0.0  ;;  %v22737_v36 = vpop.f32.mrf.mxu0  ;;  %v22742_v57 = vpop.f32.mrf.mxu1  ;;  %v11046_v41 = vld [vmem:[#allocation2 + $0x1] sm:$0xff]  ;;  %v25374_v33 = vld [vmem:[#allocation2 + $0x11] sm:$0xff] }
 0x1c3   : > { %v10975_v22 = vmax.f32 %v10947_v49, 0.0  ;;  %v10977_v40 = vmax.f32 %v10949_v4, 0.0  ;;  %v10946_v59 = vadd.f32 %v25314_v29, %v10911_v8  ;;  %v10948_v63 = vadd.f32 %v25314_v29, %v10913_v60  ;;  %22767 = vmatprep.mubr.msk.f32.mxu0 %vm10990_vm3, %v11046_v41  ;;  %22774 = vmatprep.mubr.msk.f32.mxu1 %vm10990_vm3, %v25374_v33  ;;  %v11047_v6 = vld [vmem:[#allocation2 + $0x9] sm:$0xf]  ;;  %v11049_v37 = vld [vmem:[#allocation2 + $0x19] sm:$0xf] }
 0x1c4   : > { %v9724_v13 = vadd.f32 %v25239_v9, %v25298_v38  ;;  %11000 = vst.msk [vmem:[#allocation2 + $0x40] sm:$0xff] %vm10990_vm3, %v10970_v23  ;;  %11002 = vst.msk [vmem:[#allocation2 + $0x50] sm:$0xff] %vm10990_vm3, %v10972_v34  ;;  %v10916_v30 = vadd.f32 %v22737_v36, %v9721_v61  ;;  %v10918_v17 = vadd.f32 %v22742_v57, %v9723_v32  ;;  %v10485_v45 = vpop.f32.mrf.mxu0  ;;  %v10566_v3 = vpop.f32.mrf.mxu1  ;;  %22768 = vmatmul.mubr.msk.f32.vlgmr.msra.gmra.mxu0 %vm10990_vm3, %v11047_v6  ;;  %v27019_v38 = vld [vmem:[#allocation28_spill] sm:$0xff]  ;;  %v27023_v8 = vld [vmem:[#allocation10_spill] sm:$0xff] }
 0x1c5   : > { %22775 = vmatmul.mubr.msk.f32.vlgmr.msra.gmra.mxu1 %vm10990_vm3, %v11049_v37  ;;  %11005 = vst.msk [vmem:[#allocation2 + $0x68] sm:$0x3f] %vm10992_vm2, %v10975_v22  ;;  %11007 = vst.msk [vmem:[#allocation2 + $0x78] sm:$0x3f] %vm10992_vm2, %v10977_v40  ;;  %v10974_v21 = vmax.f32 %v10946_v59, 0.0  ;;  %v10976_v24 = vmax.f32 %v10948_v63, 0.0  ;;  %v10915_v11 = vadd.f32 %v10485_v45, %v9720_v31  ;;  %v10917_v9 = vadd.f32 %v10566_v3, %v9722_v48 }
 0x1c6   : > { %22778 = vmatpush3.msra.mxu0 %v27019_v38  ;;  %22785 = vmatpush3.msra.mxu1 %v27019_v38  ;;  %v9726_v5 = vadd.f32 %v25241_v20, %v25301_v35  ;;  %v10951_v26 = vadd.f32 %v25314_v29, %v10916_v30  ;;  %v10953_v46 = vadd.f32 %v25314_v29, %v10918_v17  ;;  %v22747_v58 = vpop.f32.mrf.mxu0  ;;  %v22752_v1 = vpop.f32.mrf.mxu1  ;;  %v25397_v39 = vld [vmem:[#allocation2 + $0x21] sm:$0xff]  ;;  %v25399_v47 = vld [vmem:[#allocation2 + $0x31] sm:$0xff]  ;;  %v11053_v48 = vld [vmem:[#allocation2 + $0x39] sm:$0xf] }
 0x1c7   : > { %22779 = vmatprep.subr.mxu0 %v27020_v42  ;;  %22786 = vmatprep.subr.mxu1 %v27020_v42  ;;  %11004 = vst.msk [vmem:[#allocation2 + $0x60] sm:$0xff] %vm10990_vm3, %v10974_v21  ;;  %11006 = vst.msk [vmem:[#allocation2 + $0x70] sm:$0xff] %vm10990_vm3, %v10976_v24  ;;  %v10950_v20 = vadd.f32 %v25314_v29, %v10915_v11  ;;  %v10952_v35 = vadd.f32 %v25314_v29, %v10917_v9 }
 0x1c8   : > { %v10920_v12 = vadd.f32 %v22747_v58, %v9725_v62  ;;  %v10922_v27 = vadd.f32 %v22752_v1, %v9727_v7  ;;  %22780 = vmatpush3.msra.mxu0 %v27020_v42  ;;  %v9729_v0 = vadd.f32 %v25255_v10, %v25305_v44  ;;  %v9731_v61 = vadd.f32 %v27021_v19, %v25309_v16  ;;  %v10647_v43 = vpop.f32.mrf.mxu0  ;;  %v10728_v2 = vpop.f32.mrf.mxu1  ;;  %v11051_v10 = vld [vmem:[#allocation2 + $0x29] sm:$0xf]  ;;  %v27022_v44 = vld [vmem:[#allocation9_spill] sm:$0xff]  ;;  %v11023_v19 = vld [vmem:[#allocation2 + $0x18] sm:$0xf] }
 0x1c9   : > { %v10979_v32 = vmax.f32 %v10951_v26, 0.0  ;;  %v10981_v14 = vmax.f32 %v10953_v46, 0.0  ;;  %22787 = vmatpush3.msra.mxu1 %v27020_v42  ;;  %22781 = vmatprep.mubr.msk.f32.mxu0 %vm10990_vm3, %v25397_v39  ;;  %v10978_v18 = vmax.f32 %v10950_v20, 0.0  ;;  %v10980_v25 = vmax.f32 %v10952_v35, 0.0  ;;  %v11057_v17 = vld [vmem:[#allocation2 + $0x59] sm:$0xf] }
 0x1ca   : > { %v10955_v54 = vadd.f32 %v25314_v29, %v10920_v12  ;;  %v10957_v51 = vadd.f32 %v25314_v29, %v10922_v27  ;;  %22788 = vmatprep.mubr.msk.f32.mxu1 %vm10990_vm3, %v25399_v47  ;;  %22791 = vmatprep.subr.mxu0 %v27019_v38  ;;  %v9728_v16 = vadd.f32 %v27022_v44, %v25319_v28  ;;  %v22757_v15 = vpop.f32.mrf.mxu0  ;;  %v22762_v55 = vpop.f32.mrf.mxu1  ;;  %v25507_v20 = vld [vmem:[%s26853_s3 + $0x8] sm:$0xff]  ;;  %v25520_v35 = vld [vmem:[%s26853_s3] sm:$0xff]  ;;  %v25530_v27 = vld [vmem:[#allocation2 + $0x10] sm:$0xff] }
 0x1cb   : > { %11009 = vst.msk [vmem:[#allocation2 + $0x88] sm:$0x3f] %vm10992_vm2, %v10979_v32  ;;  %11011 = vst.msk [vmem:[#allocation2 + $0x98] sm:$0x3f] %vm10992_vm2, %v10981_v14  ;;  %22798 = vmatprep.subr.mxu1 %v27019_v38  ;;  %v10919_v52 = vadd.f32 %v10647_v43, %v9724_v13  ;;  %v10921_v31 = vadd.f32 %v10728_v2, %v9726_v5  ;;  %22782 = vmatmul.mubr.msk.f32.vlgmr.msra.gmra.mxu0 %vm10990_vm3, %v11051_v10  ;;  %v25428_v4 = vld [vmem:[#allocation2 + $0x41] sm:$0xff]  ;;  %v25436_v23 = vld [vmem:[#allocation2 + $0x51] sm:$0xff] }
 0x1cc   : > { %11008 = vst.msk [vmem:[#allocation2 + $0x80] sm:$0xff] %vm10990_vm3, %v10978_v18  ;;  %11010 = vst.msk [vmem:[#allocation2 + $0x90] sm:$0xff] %vm10990_vm3, %v10980_v25  ;;  %v10983_v50 = vmax.f32 %v10955_v54, 0.0  ;;  %v10985_v56 = vmax.f32 %v10957_v51, 0.0  ;;  %22789 = vmatmul.mubr.msk.f32.vlgmr.msra.gmra.mxu1 %vm10990_vm3, %v11053_v48  ;;  %22792 = vmatpush3.msra.mxu0 %v27019_v38  ;;  %v10924_v28 = vadd.f32 %v22757_v15, %v9729_v0  ;;  %v10809_v34 = vpop.f32.mrf.mxu0  ;;  %v10890_v36 = vpop.f32.mrf.mxu1  ;;  %v11055_v13 = vld [vmem:[#allocation2 + $0x49] sm:$0xf] }
 0x1cd   : > { %v10926_v49 = vadd.f32 %v22762_v55, %v9731_v61  ;;  %v9730_v60 = vadd.f32 %v27023_v8, %v25322_v53  ;;  %v10954_v62 = vadd.f32 %v25314_v29, %v10919_v52  ;;  %v10956_v7 = vadd.f32 %v25314_v29, %v10921_v31  ;;  %22799 = vmatpush3.msra.mxu1 %v27019_v38  ;;  %v11059_v24 = vld [vmem:[#allocation2 + $0x69] sm:$0xf]  ;;  %v11061_v11 = vld [vmem:[#allocation2 + $0x79] sm:$0xf]  ;;  %v25543_v61 = vld [vmem:[#allocation2 + $0x20] sm:$0xff] }
 0x1ce   : > { %22793 = vmatprep.subr.mxu0 %v27020_v42  ;;  %11013 = vst.msk [vmem:[#allocation2 + $0xa8] sm:$0x3f] %vm10992_vm2, %v10983_v50  ;;  %11015 = vst.msk [vmem:[#allocation2 + $0xb8] sm:$0x3f] %vm10992_vm2, %v10985_v56  ;;  %22800 = vmatprep.subr.mxu1 %v27020_v42  ;;  %v10959_v53 = vadd.f32 %v25314_v29, %v10924_v28  ;;  %v10923_v41 = vadd.f32 %v10809_v34, %v9728_v16  ;;  %v25460_v3 = vld [vmem:[#allocation2 + $0x61] sm:$0xff]  ;;  %v25548_v32 = vld [vmem:[#allocation2 + $0x30] sm:$0xff] }
 0x1cf   : > { %v10961_v57 = vadd.f32 %v25314_v29, %v10926_v49  ;;  %22794 = vmatpush3.msra.mxu0 %v27020_v42  ;;  %v10982_v22 = vmax.f32 %v10954_v62, 0.0  ;;  %v10984_v40 = vmax.f32 %v10956_v7, 0.0  ;;  %22801 = vmatpush3.msra.mxu1 %v27020_v42  ;;  %v10925_v59 = vadd.f32 %v10890_v36, %v9730_v60  ;;  %v11021_v0 = vld [vmem:[#allocation2 + $0x8] sm:$0xf]  ;;  %v11027_v43 = vld [vmem:[#allocation2 + $0x38] sm:$0xf] }
 0x1d0   : > { %22795 = vmatprep.mubr.msk.f32.mxu0 %vm10990_vm3, %v25428_v4  ;;  %v10987_v63 = vmax.f32 %v10959_v53, 0.0  ;;  %22802 = vmatprep.mubr.msk.f32.mxu1 %vm10990_vm3, %v25436_v23  ;;  %v10958_v37 = vadd.f32 %v25314_v29, %v10923_v41  ;;  %v11025_v14 = vld [vmem:[#allocation2 + $0x28] sm:$0xf]  ;;  %v25561_v2 = vld [vmem:[#allocation2 + $0x40] sm:$0xff]  ;;  %v25566_v18 = vld [vmem:[#allocation2 + $0x50] sm:$0xff] }
 0x1d1   : > { %v10989_v6 = vmax.f32 %v10961_v57, 0.0  ;;  %22805 = vmatprep.subr.mxu0 %v27019_v38  ;;  %11012 = vst.msk [vmem:[#allocation2 + $0xa0] sm:$0xff] %vm10990_vm3, %v10982_v22  ;;  %11014 = vst.msk [vmem:[#allocation2 + $0xb0] sm:$0xff] %vm10990_vm3, %v10984_v40  ;;  %22812 = vmatprep.subr.mxu1 %v27019_v38  ;;  %v10960_v30 = vadd.f32 %v25314_v29, %v10925_v59  ;;  %v25464_v29 = vld [vmem:[#allocation2 + $0x71] sm:$0xff]  ;;  %v11029_v25 = vld [vmem:[#allocation2 + $0x48] sm:$0xf] }
 0x1d2   : > { %22796 = vmatmul.mubr.msk.f32.vlgmr.msra.gmra.mxu0 %vm10990_vm3, %v11055_v13  ;;  %11017 = vst.msk [vmem:[#allocation2 + $0xc8] sm:$0x3f] %vm10992_vm2, %v10987_v63  ;;  %v10986_v45 = vmax.f32 %v10958_v37, 0.0  ;;  %22803 = vmatmul.mubr.msk.f32.vlgmr.msra.gmra.mxu1 %vm10990_vm3, %v11057_v17  ;;  %v11063_v26 = vld [vmem:[#allocation2 + $0x89] sm:$0xf]  ;;  %v25579_v51 = vld [vmem:[#allocation2 + $0x60] sm:$0xff] }
 0x1d3   : > { %11019 = vst.msk [vmem:[#allocation2 + $0xd8] sm:$0x3f] %vm10992_vm2, %v10989_v6  ;;  %22806 = vmatpush3.msra.mxu0 %v27019_v38  ;;  %v10988_v21 = vmax.f32 %v10960_v30, 0.0  ;;  %22813 = vmatpush3.msra.mxu1 %v27019_v38  ;;  %v25480_v9 = vld [vmem:[#allocation2 + $0x81] sm:$0xff]  ;;  %v25484_v5 = vld [vmem:[#allocation2 + $0x91] sm:$0xff] }
 0x1d4   : > { %22807 = vmatprep.subr.mxu0 %v27020_v42  ;;  %11016 = vst.msk [vmem:[#allocation2 + $0xc0] sm:$0xff] %vm10990_vm3, %v10986_v45  ;;  %22814 = vmatprep.subr.mxu1 %v27020_v42  ;;  %v11065_v46 = vld [vmem:[#allocation2 + $0x99] sm:$0xf]  ;;  %v25584_v10 = vld [vmem:[#allocation2 + $0x70] sm:$0xff]  ;;  %v11033_v44 = vld [vmem:[#allocation2 + $0x68] sm:$0xf] }
 0x1d5   : > { %22808 = vmatpush3.msra.mxu0 %v27020_v42  ;;  %11018 = vst.msk [vmem:[#allocation2 + $0xd0] sm:$0xff] %vm10990_vm3, %v10988_v21  ;;  %22815 = vmatpush3.msra.mxu1 %v27020_v42  ;;  %v11069_v12 = vld [vmem:[#allocation2 + $0xb9] sm:$0xf]  ;;  %v25597_v52 = vld [vmem:[#allocation2 + $0x80] sm:$0xff]  ;;  %v25602_v31 = vld [vmem:[#allocation2 + $0x90] sm:$0xff] }
 0x1d6   : > { %22809 = vmatprep.mubr.msk.f32.mxu0 %vm10990_vm3, %v25460_v3  ;;  %22816 = vmatprep.mubr.msk.f32.mxu1 %vm10990_vm3, %v25464_v29  ;;  %v11031_v54 = vld [vmem:[#allocation2 + $0x58] sm:$0xf]  ;;  %v11037_v48 = vld [vmem:[#allocation2 + $0x88] sm:$0xf]  ;;  %v25635_v49 = vld [vmem:[%s26853_s3 + $0x20] sm:$0xff] }
 0x1d7   : > { %22819 = vmatprep.subr.mxu0 %v27019_v38  ;;  %22826 = vmatprep.subr.mxu1 %v27019_v38  ;;  %v11035_v16 = vld [vmem:[#allocation2 + $0x78] sm:$0xf]  ;;  %v25620_v50 = vld [vmem:[%s26853_s3 + $0x28] sm:$0xff] }
 0x1d8   : > { %22810 = vmatmul.mubr.msk.f32.vlgmr.msra.gmra.mxu0 %vm10990_vm3, %v11059_v24  ;;  %22817 = vmatmul.mubr.msk.f32.vlgmr.msra.gmra.mxu1 %vm10990_vm3, %v11061_v11  ;;  %v25498_v58 = vld [vmem:[#allocation2 + $0xa1] sm:$0xff]  ;;  %v25502_v1 = vld [vmem:[#allocation2 + $0xb1] sm:$0xff]  ;;  %v13018_v7 = vld [vmem:[#allocation2 + $0xa] sm:$0xf] }
 0x1d9   : > { %22820 = vmatpush3.msra.mxu0 %v27019_v38  ;;  %22827 = vmatpush3.msra.mxu1 %v27019_v38  ;;  %v11039_v15 = vld [vmem:[#allocation2 + $0x98] sm:$0xf]  ;;  %v25615_v55 = vld [vmem:[#allocation2 + $0xa0] sm:$0xff]  ;;  %v25625_v56 = vld [vmem:[#allocation2 + $0xb0] sm:$0xff] }
 0x1da   : > { %22821 = vmatprep.subr.mxu0 %v27020_v42  ;;  %22828 = vmatprep.subr.mxu1 %v27020_v42  ;;  %v11041_v28 = vld [vmem:[#allocation2 + $0xa8] sm:$0xf]  ;;  %v11043_v8 = vld [vmem:[#allocation2 + $0xb8] sm:$0xf] }
 0x1db   : > { %22822 = vmatpush3.msra.mxu0 %v27020_v42  ;;  %22829 = vmatpush3.msra.mxu1 %v27020_v42  ;;  %v13017_v60 = vld [vmem:[#allocation2 + $0x2] sm:$0xff]  ;;  %v25645_v62 = vld [vmem:[#allocation2 + $0x12] sm:$0xff]  ;;  %v13020_v34 = vld [vmem:[#allocation2 + $0x1a] sm:$0xf] }
 0x1dc   : > { %22823 = vmatprep.mubr.msk.f32.mxu0 %vm10990_vm3, %v25480_v9  ;;  %22830 = vmatprep.mubr.msk.f32.mxu1 %vm10990_vm3, %v25484_v5  ;;  %v25658_v36 = vld [vmem:[#allocation2 + $0x22] sm:$0xff]  ;;  %v25663_v53 = vld [vmem:[#allocation2 + $0x32] sm:$0xff]  ;;  %v13022_v57 = vld [vmem:[#allocation2 + $0x2a] sm:$0xf] }
 0x1dd   : > { %22833 = vmatprep.subr.mxu0 %v27019_v38  ;;  %22840 = vmatprep.subr.mxu1 %v27019_v38  ;;  %v13024_v41 = vld [vmem:[#allocation2 + $0x3a] sm:$0xf]  ;;  %v25676_v22 = vld [vmem:[#allocation2 + $0x42] sm:$0xff]  ;;  %v25681_v40 = vld [vmem:[#allocation2 + $0x52] sm:$0xff] }
 0x1de   : > { %22824 = vmatmul.mubr.msk.f32.vlgmr.msra.gmra.mxu0 %vm10990_vm3, %v11063_v26  ;;  %22831 = vmatmul.mubr.msk.f32.vlgmr.msra.gmra.mxu1 %vm10990_vm3, %v11065_v46  ;;  %v13026_v59 = vld [vmem:[#allocation2 + $0x4a] sm:$0xf]  ;;  %v13028_v63 = vld [vmem:[#allocation2 + $0x5a] sm:$0xf]  ;;  %v25694_v6 = vld [vmem:[#allocation2 + $0x62] sm:$0xff] }
 0x1df   : > { %22834 = vmatpush3.msra.mxu0 %v27019_v38  ;;  %22841 = vmatpush3.msra.mxu1 %v27019_v38  ;;  %v11067_v38 = vld [vmem:[#allocation2 + $0xa9] sm:$0xf]  ;;  %v25699_v37 = vld [vmem:[#allocation2 + $0x72] sm:$0xff]  ;;  %v13032_v30 = vld [vmem:[#allocation2 + $0x7a] sm:$0xf] }
 0x1e0   : > { %22835 = vmatprep.subr.mxu0 %v27020_v42  ;;  %22842 = vmatprep.subr.mxu1 %v27020_v42  ;;  %v13030_v13 = vld [vmem:[#allocation2 + $0x6a] sm:$0xf]  ;;  %v25712_v17 = vld [vmem:[#allocation2 + $0x82] sm:$0xff]  ;;  %v25717_v45 = vld [vmem:[#allocation2 + $0x92] sm:$0xff] }
 0x1e1   : > { %22836 = vmatpush3.msra.mxu0 %v27020_v42  ;;  %22843 = vmatpush3.msra.mxu1 %v27020_v42  ;;  %v11020_v42 = vld [vmem:[#allocation2] sm:$0xff]  ;;  %v13034_v21 = vld [vmem:[#allocation2 + $0x8a] sm:$0xf]  ;;  %v13036_v24 = vld [vmem:[#allocation2 + $0x9a] sm:$0xf] }
 0x1e2   : > { %22837 = vmatprep.mubr.msk.f32.mxu0 %vm10990_vm3, %v25498_v58  ;;  %22844 = vmatprep.mubr.msk.f32.mxu1 %vm10990_vm3, %v25502_v1  ;;  %v25730_v11 = vld [vmem:[#allocation2 + $0xa2] sm:$0xff]  ;;  %v25735_v26 = vld [vmem:[%s26853_s3 + $0x38] sm:$0xff] }
 0x1e3   : > { %22847 = vmatprep.subr.mxu0 %v25507_v20  ;;  %22854 = vmatprep.subr.mxu1 %v25507_v20  ;;  %v25740_v46 = vld [vmem:[#allocation2 + $0xb2] sm:$0xff] }
 0x1e4   : > { %22838 = vmatmul.mubr.msk.f32.vlgmr.msra.gmra.mxu0 %vm10990_vm3, %v11067_v38  ;;  %22845 = vmatmul.mubr.msk.f32.vlgmr.msra.gmra.mxu1 %vm10990_vm3, %v11069_v12  ;;  %v25750_v38 = vld [vmem:[%s26853_s3 + $0x30] sm:$0xff]  ;;  %v14042_v12 = vld [vmem:[#allocation2 + $0x18] sm:$0xf] }
 0x1e5   : > { %22848 = vmatpush3.msra.mxu0 %v25507_v20  ;;  %22855 = vmatpush3.msra.mxu1 %v25507_v20 }
 0x1e6   : > { %22849 = vmatprep.subr.mxu0 %v25520_v35  ;;  %22851 = vmatprep.mubr.msk.f32.mxu0 %vm10990_vm3, %v11020_v42  ;;  %v14044_v42 = vld [vmem:[#allocation2 + $0x28] sm:$0xf] }
 0x1e7   : > { %22856 = vmatprep.subr.mxu1 %v25520_v35  ;;  %22858 = vmatprep.mubr.msk.f32.mxu1 %vm10990_vm3, %v25530_v27 }
 0x1e8   : > { %22850 = vmatpush3.msra.mxu0 %v25520_v35  ;;  %22857 = vmatpush3.msra.mxu1 %v25520_v35 }
 0x1e9   : > { %22861 = vmatprep.subr.mxu0 %v25507_v20  ;;  %22868 = vmatprep.subr.mxu1 %v25507_v20 }
 0x1ea   : > { %22852 = vmatmul.mubr.msk.f32.vlgmr.msra.gmra.mxu0 %vm10990_vm3, %v11021_v0  ;;  %22859 = vmatmul.mubr.msk.f32.vlgmr.msra.gmra.mxu1 %vm10990_vm3, %v11023_v19  ;;  %v14048_v0 = vld [vmem:[#allocation2 + $0x48] sm:$0xf]  ;;  %v14050_v19 = vld [vmem:[#allocation2 + $0x58] sm:$0xf] }
 0x1eb   : > { %22862 = vmatpush3.msra.mxu0 %v25507_v20  ;;  %22869 = vmatpush3.msra.mxu1 %v25507_v20 }
 0x1ec   : > { %22863 = vmatprep.subr.mxu0 %v25520_v35  ;;  %22865 = vmatprep.mubr.msk.f32.mxu0 %vm10990_vm3, %v25543_v61 }
 0x1ed   : > { %22870 = vmatprep.subr.mxu1 %v25520_v35  ;;  %22872 = vmatprep.mubr.msk.f32.mxu1 %vm10990_vm3, %v25548_v32 }
 0x1ee   : > { %22864 = vmatpush3.msra.mxu0 %v25520_v35  ;;  %22871 = vmatpush3.msra.mxu1 %v25520_v35 }
 0x1ef   : > { %22875 = vmatprep.subr.mxu0 %v25507_v20  ;;  %22882 = vmatprep.subr.mxu1 %v25507_v20 }
 0x1f0   : > { %22866 = vmatmul.mubr.msk.f32.vlgmr.msra.gmra.mxu0 %vm10990_vm3, %v11025_v14  ;;  %22873 = vmatmul.mubr.msk.f32.vlgmr.msra.gmra.mxu1 %vm10990_vm3, %v11027_v43  ;;  %v14052_v14 = vld [vmem:[#allocation2 + $0x68] sm:$0xf]  ;;  %v14054_v43 = vld [vmem:[#allocation2 + $0x78] sm:$0xf] }
 0x1f1   : > { %22876 = vmatpush3.msra.mxu0 %v25507_v20  ;;  %22883 = vmatpush3.msra.mxu1 %v25507_v20 }
 0x1f2   : > { %22877 = vmatprep.subr.mxu0 %v25520_v35  ;;  %22879 = vmatprep.mubr.msk.f32.mxu0 %vm10990_vm3, %v25561_v2 }
 0x1f3   : > { %22884 = vmatprep.subr.mxu1 %v25520_v35  ;;  %22886 = vmatprep.mubr.msk.f32.mxu1 %vm10990_vm3, %v25566_v18 }
 0x1f4   : > { %22878 = vmatpush3.msra.mxu0 %v25520_v35  ;;  %22885 = vmatpush3.msra.mxu1 %v25520_v35 }
 0x1f5   : > { %22889 = vmatprep.subr.mxu0 %v25507_v20  ;;  %22896 = vmatprep.subr.mxu1 %v25507_v20 }
 0x1f6   : > { %22880 = vmatmul.mubr.msk.f32.vlgmr.msra.gmra.mxu0 %vm10990_vm3, %v11029_v25  ;;  %22887 = vmatmul.mubr.msk.f32.vlgmr.msra.gmra.mxu1 %vm10990_vm3, %v11031_v54  ;;  %v14056_v25 = vld [vmem:[#allocation2 + $0x88] sm:$0xf]  ;;  %v14058_v54 = vld [vmem:[#allocation2 + $0x98] sm:$0xf] }
 0x1f7   : > { %22890 = vmatpush3.msra.mxu0 %v25507_v20  ;;  %22897 = vmatpush3.msra.mxu1 %v25507_v20 }
 0x1f8   : > { %22891 = vmatprep.subr.mxu0 %v25520_v35  ;;  %22893 = vmatprep.mubr.msk.f32.mxu0 %vm10990_vm3, %v25579_v51 }
 0x1f9   : > { %22898 = vmatprep.subr.mxu1 %v25520_v35  ;;  %22900 = vmatprep.mubr.msk.f32.mxu1 %vm10990_vm3, %v25584_v10 }
 0x1fa   : > { %22892 = vmatpush3.msra.mxu0 %v25520_v35  ;;  %22899 = vmatpush3.msra.mxu1 %v25520_v35 }
 0x1fb   : > { %22903 = vmatprep.subr.mxu0 %v25507_v20  ;;  %22910 = vmatprep.subr.mxu1 %v25507_v20 }
 0x1fc   : > { %22894 = vmatmul.mubr.msk.f32.vlgmr.msra.gmra.mxu0 %vm10990_vm3, %v11033_v44  ;;  %22901 = vmatmul.mubr.msk.f32.vlgmr.msra.gmra.mxu1 %vm10990_vm3, %v11035_v16  ;;  %v14060_v44 = vld [vmem:[#allocation2 + $0xa8] sm:$0xf] }
 0x1fd   : > { %22904 = vmatpush3.msra.mxu0 %v25507_v20  ;;  %22911 = vmatpush3.msra.mxu1 %v25507_v20  ;;  %v25831_v16 = vld [vmem:[%s26853_s3 + $0x48] sm:$0xff] }
 0x1fe   : > { %22905 = vmatprep.subr.mxu0 %v25520_v35  ;;  %22907 = vmatprep.mubr.msk.f32.mxu0 %vm10990_vm3, %v25597_v52 }
 0x1ff   : > { %22912 = vmatprep.subr.mxu1 %v25520_v35  ;;  %22914 = vmatprep.mubr.msk.f32.mxu1 %vm10990_vm3, %v25602_v31 }
 0x200   : > { %22906 = vmatpush3.msra.mxu0 %v25520_v35  ;;  %22913 = vmatpush3.msra.mxu1 %v25520_v35 }
 0x201   : > { %22917 = vmatprep.subr.mxu0 %v25507_v20  ;;  %22924 = vmatprep.subr.mxu1 %v25507_v20 }
 0x202   : > { %22908 = vmatmul.mubr.msk.f32.vlgmr.msra.gmra.mxu0 %vm10990_vm3, %v11037_v48  ;;  %22915 = vmatmul.mubr.msk.f32.vlgmr.msra.gmra.mxu1 %vm10990_vm3, %v11039_v15  ;;  %v25836_v48 = vld [vmem:[#allocation2 + $0xc0] sm:$0xff]  ;;  %v14062_v15 = vld [vmem:[#allocation2 + $0xb8] sm:$0xf] }
 0x203   : > { %22918 = vmatpush3.msra.mxu0 %v25507_v20  ;;  %22925 = vmatpush3.msra.mxu1 %v25507_v20  ;;  %v13038_v20 = vld [vmem:[#allocation2 + $0xaa] sm:$0xf] }
 0x204   : > { %22919 = vmatprep.subr.mxu0 %v25520_v35  ;;  %22921 = vmatprep.mubr.msk.f32.mxu0 %vm10990_vm3, %v25615_v55 }
 0x205   : > { %22926 = vmatprep.subr.mxu1 %v25520_v35  ;;  %22928 = vmatprep.mubr.msk.f32.mxu1 %vm10990_vm3, %v25625_v56 }
 0x206   : > { %22920 = vmatpush3.msra.mxu0 %v25520_v35  ;;  %22927 = vmatpush3.msra.mxu1 %v25520_v35  ;;  %v13040_v35 = vld [vmem:[#allocation2 + $0xba] sm:$0xf] }
 0x207   : > { %22931 = vmatprep.subr.mxu0 %v25620_v50  ;;  %22938 = vmatprep.subr.mxu1 %v25620_v50 }
 0x208   : > { %22922 = vmatmul.mubr.msk.f32.vlgmr.msra.gmra.mxu0 %vm10990_vm3, %v11041_v28  ;;  %22929 = vmatmul.mubr.msk.f32.vlgmr.msra.gmra.mxu1 %vm10990_vm3, %v11043_v8  ;;  %v14064_v28 = vld [vmem:[#allocation2 + $0xc8] sm:$0xf] }
 0x209   : > { %22932 = vmatpush3.msra.mxu0 %v25620_v50  ;;  %22939 = vmatpush3.msra.mxu1 %v25620_v50  ;;  %v15067_v8 = vld [vmem:[#allocation2 + $0x29] sm:$0xf] }
 0x20a   : > { %22933 = vmatprep.subr.mxu0 %v25635_v49  ;;  %22935 = vmatprep.mubr.msk.f32.mxu0 %vm10990_vm3, %v13017_v60  ;;  %v15085_v60 = vld [vmem:[#allocation2 + $0xb9] sm:$0xf] }
 0x20b   : > { %22940 = vmatprep.subr.mxu1 %v25635_v49  ;;  %22942 = vmatprep.mubr.msk.f32.mxu1 %vm10990_vm3, %v25645_v62 }
 0x20c   : > { %22934 = vmatpush3.msra.mxu0 %v25635_v49  ;;  %22941 = vmatpush3.msra.mxu1 %v25635_v49 }
 0x20d   : > { %22945 = vmatprep.subr.mxu0 %v25620_v50  ;;  %22952 = vmatprep.subr.mxu1 %v25620_v50 }
 0x20e   : > { %22936 = vmatmul.mubr.msk.f32.vlgmr.msra.gmra.mxu0 %vm10990_vm3, %v13018_v7  ;;  %22943 = vmatmul.mubr.msk.f32.vlgmr.msra.gmra.mxu1 %vm10990_vm3, %v13020_v34  ;;  %v25942_v7 = vld [vmem:[%s26853_s3 + $0x50] sm:$0xff]  ;;  %v16088_v34 = vld [vmem:[#allocation2 + $0x1a] sm:$0xf] }
 0x20f   : > { %22946 = vmatpush3.msra.mxu0 %v25620_v50  ;;  %22953 = vmatpush3.msra.mxu1 %v25620_v50 }
 0x210   : > { %22947 = vmatprep.subr.mxu0 %v25635_v49  ;;  %22949 = vmatprep.mubr.msk.f32.mxu0 %vm10990_vm3, %v25658_v36 }
 0x211   : > { %22954 = vmatprep.subr.mxu1 %v25635_v49  ;;  %22956 = vmatprep.mubr.msk.f32.mxu1 %vm10990_vm3, %v25663_v53 }
 0x212   : > { %22948 = vmatpush3.msra.mxu0 %v25635_v49  ;;  %22955 = vmatpush3.msra.mxu1 %v25635_v49 }
 0x213   : > { %22959 = vmatprep.subr.mxu0 %v25620_v50  ;;  %22966 = vmatprep.subr.mxu1 %v25620_v50 }
 0x214   : > { %22950 = vmatmul.mubr.msk.f32.vlgmr.msra.gmra.mxu0 %vm10990_vm3, %v13022_v57  ;;  %22957 = vmatmul.mubr.msk.f32.vlgmr.msra.gmra.mxu1 %vm10990_vm3, %v13024_v41  ;;  %v16090_v57 = vld [vmem:[#allocation2 + $0x2a] sm:$0xf] }
 0x215   : > { %22960 = vmatpush3.msra.mxu0 %v25620_v50  ;;  %22967 = vmatpush3.msra.mxu1 %v25620_v50  ;;  %v16098_v41 = vld [vmem:[#allocation2 + $0x6a] sm:$0xf] }
 0x216   : > { %22961 = vmatprep.subr.mxu0 %v25635_v49  ;;  %22963 = vmatprep.mubr.msk.f32.mxu0 %vm10990_vm3, %v25676_v22 }
 0x217   : > { %22968 = vmatprep.subr.mxu1 %v25635_v49  ;;  %22970 = vmatprep.mubr.msk.f32.mxu1 %vm10990_vm3, %v25681_v40 }
 0x218   : > { %22962 = vmatpush3.msra.mxu0 %v25635_v49  ;;  %22969 = vmatpush3.msra.mxu1 %v25635_v49 }
 0x219   : > { %22973 = vmatprep.subr.mxu0 %v25620_v50  ;;  %22980 = vmatprep.subr.mxu1 %v25620_v50 }
 0x21a   : > { %22964 = vmatmul.mubr.msk.f32.vlgmr.msra.gmra.mxu0 %vm10990_vm3, %v13026_v59  ;;  %22971 = vmatmul.mubr.msk.f32.vlgmr.msra.gmra.mxu1 %vm10990_vm3, %v13028_v63 }
 0x21b   : > { %22974 = vmatpush3.msra.mxu0 %v25620_v50  ;;  %22981 = vmatpush3.msra.mxu1 %v25620_v50 }
 0x21c   : > { %22975 = vmatprep.subr.mxu0 %v25635_v49  ;;  %22977 = vmatprep.mubr.msk.f32.mxu0 %vm10990_vm3, %v25694_v6 }
 0x21d   : > { %22982 = vmatprep.subr.mxu1 %v25635_v49  ;;  %22984 = vmatprep.mubr.msk.f32.mxu1 %vm10990_vm3, %v25699_v37 }
 0x21e   : > { %22976 = vmatpush3.msra.mxu0 %v25635_v49  ;;  %22983 = vmatpush3.msra.mxu1 %v25635_v49 }
 0x21f   : > { %22987 = vmatprep.subr.mxu0 %v25620_v50  ;;  %22994 = vmatprep.subr.mxu1 %v25620_v50 }
 0x220   : > { %22978 = vmatmul.mubr.msk.f32.vlgmr.msra.gmra.mxu0 %vm10990_vm3, %v13030_v13  ;;  %22985 = vmatmul.mubr.msk.f32.vlgmr.msra.gmra.mxu1 %vm10990_vm3, %v13032_v30  ;;  %v16102_v13 = vld [vmem:[#allocation2 + $0x8a] sm:$0xf] }
 0x221   : > { %22988 = vmatpush3.msra.mxu0 %v25620_v50  ;;  %22995 = vmatpush3.msra.mxu1 %v25620_v50 }
 0x222   : > { %22989 = vmatprep.subr.mxu0 %v25635_v49  ;;  %22991 = vmatprep.mubr.msk.f32.mxu0 %vm10990_vm3, %v25712_v17 }
 0x223   : > { %22996 = vmatprep.subr.mxu1 %v25635_v49  ;;  %22998 = vmatprep.mubr.msk.f32.mxu1 %vm10990_vm3, %v25717_v45 }
 0x224   : > { %22990 = vmatpush3.msra.mxu0 %v25635_v49  ;;  %22997 = vmatpush3.msra.mxu1 %v25635_v49 }
 0x225   : > { %23001 = vmatprep.subr.mxu0 %v25620_v50  ;;  %23008 = vmatprep.subr.mxu1 %v25620_v50 }
 0x226   : > { %22992 = vmatmul.mubr.msk.f32.vlgmr.msra.gmra.mxu0 %vm10990_vm3, %v13034_v21  ;;  %22999 = vmatmul.mubr.msk.f32.vlgmr.msra.gmra.mxu1 %vm10990_vm3, %v13036_v24  ;;  %v16104_v24 = vld [vmem:[#allocation2 + $0x9a] sm:$0xf] }
 0x227   : > { %23002 = vmatpush3.msra.mxu0 %v25620_v50  ;;  %23009 = vmatpush3.msra.mxu1 %v25620_v50  ;;  %v25846_v50 = vld [vmem:[%s26853_s3 + $0x40] sm:$0xff] }
 0x228   : > { %23003 = vmatprep.subr.mxu0 %v25635_v49  ;;  %23005 = vmatprep.mubr.msk.f32.mxu0 %vm10990_vm3, %v25730_v11 }
 0x229   : > { %23010 = vmatprep.subr.mxu1 %v25635_v49  ;;  %23012 = vmatprep.mubr.msk.f32.mxu1 %vm10990_vm3, %v25740_v46 }
 0x22a   : > { %23004 = vmatpush3.msra.mxu0 %v25635_v49  ;;  %23011 = vmatpush3.msra.mxu1 %v25635_v49  ;;  %v15065_v49 = vld [vmem:[#allocation2 + $0x19] sm:$0xf] }
 0x22b   : > { %23015 = vmatprep.subr.mxu0 %v25735_v26  ;;  %23022 = vmatprep.subr.mxu1 %v25735_v26 }
 0x22c   : > { %23006 = vmatmul.mubr.msk.f32.vlgmr.msra.gmra.mxu0 %vm10990_vm3, %v13038_v20  ;;  %23013 = vmatmul.mubr.msk.f32.vlgmr.msra.gmra.mxu1 %vm10990_vm3, %v13040_v35  ;;  %v26050_v35 = vld [vmem:[#allocation2 + $0xc2] sm:$0xff] }
 0x22d   : > { %23016 = vmatpush3.msra.mxu0 %v25735_v26  ;;  %23023 = vmatpush3.msra.mxu1 %v25735_v26 }
 0x22e   : > { %23017 = vmatprep.subr.mxu0 %v25750_v38  ;;  %23019 = vmatprep.mubr.msk.f32.mxu0 %vm10990_vm3, %v25530_v27  ;;  %v14046_v27 = vld [vmem:[#allocation2 + $0x38] sm:$0xf] }
 0x22f   : > { %23024 = vmatprep.subr.mxu1 %v25750_v38  ;;  %23026 = vmatprep.mubr.msk.f32.mxu1 %vm10990_vm3, %v25543_v61 }
 0x230   : > { %23018 = vmatpush3.msra.mxu0 %v25750_v38  ;;  %23025 = vmatpush3.msra.mxu1 %v25750_v38 }
 0x231   : > { %23029 = vmatprep.subr.mxu0 %v25735_v26  ;;  %23036 = vmatprep.subr.mxu1 %v25735_v26 }
 0x232   : > { %23020 = vmatmul.mubr.msk.f32.vlgmr.msra.gmra.mxu0 %vm10990_vm3, %v14042_v12  ;;  %23027 = vmatmul.mubr.msk.f32.vlgmr.msra.gmra.mxu1 %vm10990_vm3, %v14044_v42  ;;  %v16108_v42 = vld [vmem:[#allocation2 + $0xba] sm:$0xf] }
 0x233   : > { %23030 = vmatpush3.msra.mxu0 %v25735_v26  ;;  %23037 = vmatpush3.msra.mxu1 %v25735_v26 }
 0x234   : > { %23031 = vmatprep.subr.mxu0 %v25750_v38  ;;  %23033 = vmatprep.mubr.msk.f32.mxu0 %vm10990_vm3, %v25548_v32 }
 0x235   : > { %23038 = vmatprep.subr.mxu1 %v25750_v38  ;;  %23040 = vmatprep.mubr.msk.f32.mxu1 %vm10990_vm3, %v25561_v2 }
 0x236   : > { %23032 = vmatpush3.msra.mxu0 %v25750_v38  ;;  %23039 = vmatpush3.msra.mxu1 %v25750_v38 }
 0x237   : > { %23043 = vmatprep.subr.mxu0 %v25735_v26  ;;  %23050 = vmatprep.subr.mxu1 %v25735_v26 }
 0x238   : > { %23034 = vmatmul.mubr.msk.f32.vlgmr.msra.gmra.mxu0 %vm10990_vm3, %v14046_v27  ;;  %23041 = vmatmul.mubr.msk.f32.vlgmr.msra.gmra.mxu1 %vm10990_vm3, %v14048_v0  ;;  %v16110_v27 = vld [vmem:[#allocation2 + $0xca] sm:$0xf] }
 0x239   : > { %23044 = vmatpush3.msra.mxu0 %v25735_v26  ;;  %23051 = vmatpush3.msra.mxu1 %v25735_v26 }
 0x23a   : > { %23045 = vmatprep.subr.mxu0 %v25750_v38  ;;  %23047 = vmatprep.mubr.msk.f32.mxu0 %vm10990_vm3, %v25566_v18 }
 0x23b   : > { %23052 = vmatprep.subr.mxu1 %v25750_v38  ;;  %23054 = vmatprep.mubr.msk.f32.mxu1 %vm10990_vm3, %v25579_v51 }
 0x23c   : > { %23046 = vmatpush3.msra.mxu0 %v25750_v38  ;;  %23053 = vmatpush3.msra.mxu1 %v25750_v38 }
 0x23d   : > { %23057 = vmatprep.subr.mxu0 %v25735_v26  ;;  %23064 = vmatprep.subr.mxu1 %v25735_v26 }
 0x23e   : > { %23048 = vmatmul.mubr.msk.f32.vlgmr.msra.gmra.mxu0 %vm10990_vm3, %v14050_v19  ;;  %23055 = vmatmul.mubr.msk.f32.vlgmr.msra.gmra.mxu1 %vm10990_vm3, %v14052_v14 }
 0x23f   : > { %23058 = vmatpush3.msra.mxu0 %v25735_v26  ;;  %23065 = vmatpush3.msra.mxu1 %v25735_v26 }
 0x240   : > { %23059 = vmatprep.subr.mxu0 %v25750_v38  ;;  %23061 = vmatprep.mubr.msk.f32.mxu0 %vm10990_vm3, %v25584_v10 }
 0x241   : > { %23066 = vmatprep.subr.mxu1 %v25750_v38  ;;  %23068 = vmatprep.mubr.msk.f32.mxu1 %vm10990_vm3, %v25597_v52 }
 0x242   : > { %23060 = vmatpush3.msra.mxu0 %v25750_v38  ;;  %23067 = vmatpush3.msra.mxu1 %v25750_v38 }
 0x243   : > { %23071 = vmatprep.subr.mxu0 %v25735_v26  ;;  %23078 = vmatprep.subr.mxu1 %v25735_v26 }
 0x244   : > { %23062 = vmatmul.mubr.msk.f32.vlgmr.msra.gmra.mxu0 %vm10990_vm3, %v14054_v43  ;;  %23069 = vmatmul.mubr.msk.f32.vlgmr.msra.gmra.mxu1 %vm10990_vm3, %v14056_v25  ;;  %v17112_v25 = vld [vmem:[#allocation2 + $0x28] sm:$0xf] }
 0x245   : > { %23072 = vmatpush3.msra.mxu0 %v25735_v26  ;;  %23079 = vmatpush3.msra.mxu1 %v25735_v26 }
 0x246   : > { %23073 = vmatprep.subr.mxu0 %v25750_v38  ;;  %23075 = vmatprep.mubr.msk.f32.mxu0 %vm10990_vm3, %v25602_v31 }
 0x247   : > { %23080 = vmatprep.subr.mxu1 %v25750_v38  ;;  %23082 = vmatprep.mubr.msk.f32.mxu1 %vm10990_vm3, %v25615_v55 }
 0x248   : > { %23074 = vmatpush3.msra.mxu0 %v25750_v38  ;;  %23081 = vmatpush3.msra.mxu1 %v25750_v38 }
 0x249   : > { %23085 = vmatprep.subr.mxu0 %v25735_v26  ;;  %23092 = vmatprep.subr.mxu1 %v25735_v26 }
 0x24a   : > { %23076 = vmatmul.mubr.msk.f32.vlgmr.msra.gmra.mxu0 %vm10990_vm3, %v14058_v54  ;;  %23083 = vmatmul.mubr.msk.f32.vlgmr.msra.gmra.mxu1 %vm10990_vm3, %v14060_v44  ;;  %v17114_v54 = vld [vmem:[#allocation2 + $0x38] sm:$0xf] }
 0x24b   : > { %23086 = vmatpush3.msra.mxu0 %v25735_v26  ;;  %23093 = vmatpush3.msra.mxu1 %v25735_v26  ;;  %v16106_v26 = vld [vmem:[#allocation2 + $0xaa] sm:$0xf] }
 0x24c   : > { %23087 = vmatprep.subr.mxu0 %v25750_v38  ;;  %23089 = vmatprep.mubr.msk.f32.mxu0 %vm10990_vm3, %v25625_v56 }
 0x24d   : > { %23094 = vmatprep.subr.mxu1 %v25750_v38  ;;  %23096 = vmatprep.mubr.msk.f32.mxu1 %vm10990_vm3, %v25836_v48 }
 0x24e   : > { %23088 = vmatpush3.msra.mxu0 %v25750_v38  ;;  %23095 = vmatpush3.msra.mxu1 %v25750_v38 }
 0x24f   : > { %23099 = vmatprep.subr.mxu0 %v25831_v16  ;;  %23106 = vmatprep.subr.mxu1 %v25831_v16 }
 0x250   : > { %23090 = vmatmul.mubr.msk.f32.vlgmr.msra.gmra.mxu0 %vm10990_vm3, %v14062_v15  ;;  %23097 = vmatmul.mubr.msk.f32.vlgmr.msra.gmra.mxu1 %vm10990_vm3, %v14064_v28  ;;  %v17116_v15 = vld [vmem:[#allocation2 + $0x48] sm:$0xf] }
 0x251   : > { %23100 = vmatpush3.msra.mxu0 %v25831_v16  ;;  %23107 = vmatpush3.msra.mxu1 %v25831_v16 }
 0x252   : > { %23101 = vmatprep.subr.mxu0 %v25846_v50  ;;  %23103 = vmatprep.mubr.msk.f32.mxu0 %vm10990_vm3, %v25374_v33  ;;  %v15069_v33 = vld [vmem:[#allocation2 + $0x39] sm:$0xf] }
 0x253   : > { %23108 = vmatprep.subr.mxu1 %v25846_v50  ;;  %23110 = vmatprep.mubr.msk.f32.mxu1 %vm10990_vm3, %v25397_v39  ;;  %v15071_v39 = vld [vmem:[#allocation2 + $0x49] sm:$0xf] }
 0x254   : > { %23102 = vmatpush3.msra.mxu0 %v25846_v50  ;;  %23109 = vmatpush3.msra.mxu1 %v25846_v50 }
 0x255   : > { %23113 = vmatprep.subr.mxu0 %v25831_v16  ;;  %23120 = vmatprep.subr.mxu1 %v25831_v16 }
 0x256   : > { %23104 = vmatmul.mubr.msk.f32.vlgmr.msra.gmra.mxu0 %vm10990_vm3, %v15065_v49  ;;  %23111 = vmatmul.mubr.msk.f32.vlgmr.msra.gmra.mxu1 %vm10990_vm3, %v15067_v8  ;;  %v17120_v8 = vld [vmem:[#allocation2 + $0x68] sm:$0xf] }
 0x257   : > { %23114 = vmatpush3.msra.mxu0 %v25831_v16  ;;  %23121 = vmatpush3.msra.mxu1 %v25831_v16 }
 0x258   : > { %23115 = vmatprep.subr.mxu0 %v25846_v50  ;;  %23117 = vmatprep.mubr.msk.f32.mxu0 %vm10990_vm3, %v25399_v47  ;;  %v15073_v47 = vld [vmem:[#allocation2 + $0x59] sm:$0xf] }
 0x259   : > { %23122 = vmatprep.subr.mxu1 %v25846_v50  ;;  %23124 = vmatprep.mubr.msk.f32.mxu1 %vm10990_vm3, %v25428_v4  ;;  %v15075_v4 = vld [vmem:[#allocation2 + $0x69] sm:$0xf] }
 0x25a   : > { %23116 = vmatpush3.msra.mxu0 %v25846_v50  ;;  %23123 = vmatpush3.msra.mxu1 %v25846_v50 }
 0x25b   : > { %23127 = vmatprep.subr.mxu0 %v25831_v16  ;;  %23134 = vmatprep.subr.mxu1 %v25831_v16 }
 0x25c   : > { %23118 = vmatmul.mubr.msk.f32.vlgmr.msra.gmra.mxu0 %vm10990_vm3, %v15069_v33  ;;  %23125 = vmatmul.mubr.msk.f32.vlgmr.msra.gmra.mxu1 %vm10990_vm3, %v15071_v39  ;;  %v17122_v33 = vld [vmem:[#allocation2 + $0x78] sm:$0xf] }
 0x25d   : > { %23128 = vmatpush3.msra.mxu0 %v25831_v16  ;;  %23135 = vmatpush3.msra.mxu1 %v25831_v16 }
 0x25e   : > { %23129 = vmatprep.subr.mxu0 %v25846_v50  ;;  %23131 = vmatprep.mubr.msk.f32.mxu0 %vm10990_vm3, %v25436_v23  ;;  %v15077_v23 = vld [vmem:[#allocation2 + $0x79] sm:$0xf] }
 0x25f   : > { %23136 = vmatprep.subr.mxu1 %v25846_v50  ;;  %23138 = vmatprep.mubr.msk.f32.mxu1 %vm10990_vm3, %v25460_v3  ;;  %v15079_v3 = vld [vmem:[#allocation2 + $0x89] sm:$0xf] }
 0x260   : > { %23130 = vmatpush3.msra.mxu0 %v25846_v50  ;;  %23137 = vmatpush3.msra.mxu1 %v25846_v50 }
 0x261   : > { %23141 = vmatprep.subr.mxu0 %v25831_v16  ;;  %23148 = vmatprep.subr.mxu1 %v25831_v16 }
 0x262   : > { %23132 = vmatmul.mubr.msk.f32.vlgmr.msra.gmra.mxu0 %vm10990_vm3, %v15073_v47  ;;  %23139 = vmatmul.mubr.msk.f32.vlgmr.msra.gmra.mxu1 %vm10990_vm3, %v15075_v4 }
 0x263   : > { %23142 = vmatpush3.msra.mxu0 %v25831_v16  ;;  %23149 = vmatpush3.msra.mxu1 %v25831_v16 }
 0x264   : > { %23143 = vmatprep.subr.mxu0 %v25846_v50  ;;  %23145 = vmatprep.mubr.msk.f32.mxu0 %vm10990_vm3, %v25464_v29  ;;  %v15081_v29 = vld [vmem:[#allocation2 + $0x99] sm:$0xf] }
 0x265   : > { %23150 = vmatprep.subr.mxu1 %v25846_v50  ;;  %23152 = vmatprep.mubr.msk.f32.mxu1 %vm10990_vm3, %v25480_v9  ;;  %v15083_v9 = vld [vmem:[#allocation2 + $0xa9] sm:$0xf] }
 0x266   : > { %23144 = vmatpush3.msra.mxu0 %v25846_v50  ;;  %23151 = vmatpush3.msra.mxu1 %v25846_v50 }
 0x267   : > { %23155 = vmatprep.subr.mxu0 %v25831_v16  ;;  %23162 = vmatprep.subr.mxu1 %v25831_v16 }
 0x268   : > { %23146 = vmatmul.mubr.msk.f32.vlgmr.msra.gmra.mxu0 %vm10990_vm3, %v15077_v23  ;;  %23153 = vmatmul.mubr.msk.f32.vlgmr.msra.gmra.mxu1 %vm10990_vm3, %v15079_v3 }
 0x269   : > { %23156 = vmatpush3.msra.mxu0 %v25831_v16  ;;  %23163 = vmatpush3.msra.mxu1 %v25831_v16 }
 0x26a   : > { %23157 = vmatprep.subr.mxu0 %v25846_v50  ;;  %23159 = vmatprep.mubr.msk.f32.mxu0 %vm10990_vm3, %v25484_v5  ;;  %v25927_v5 = vld [vmem:[%s26853_s3 + $0x58] sm:$0xff] }
 0x26b   : > { %23164 = vmatprep.subr.mxu1 %v25846_v50  ;;  %23166 = vmatprep.mubr.msk.f32.mxu1 %vm10990_vm3, %v25498_v58  ;;  %v25932_v58 = vld [vmem:[#allocation2 + $0xc1] sm:$0xff] }
 0x26c   : > { %23158 = vmatpush3.msra.mxu0 %v25846_v50  ;;  %23165 = vmatpush3.msra.mxu1 %v25846_v50 }
 0x26d   : > { %23169 = vmatprep.subr.mxu0 %v25831_v16  ;;  %23176 = vmatprep.subr.mxu1 %v25831_v16 }
 0x26e   : > { %23160 = vmatmul.mubr.msk.f32.vlgmr.msra.gmra.mxu0 %vm10990_vm3, %v15081_v29  ;;  %23167 = vmatmul.mubr.msk.f32.vlgmr.msra.gmra.mxu1 %vm10990_vm3, %v15083_v9  ;;  %v17124_v9 = vld [vmem:[#allocation2 + $0x88] sm:$0xf] }
 0x26f   : > { %23170 = vmatpush3.msra.mxu0 %v25831_v16  ;;  %23177 = vmatpush3.msra.mxu1 %v25831_v16 }
 0x270   : > { %23171 = vmatprep.subr.mxu0 %v25846_v50  ;;  %23173 = vmatprep.mubr.msk.f32.mxu0 %vm10990_vm3, %v25502_v1  ;;  %v15087_v1 = vld [vmem:[#allocation2 + $0xc9] sm:$0xf] }
 0x271   : > { %23178 = vmatprep.subr.mxu1 %v25846_v50  ;;  %23180 = vmatprep.mubr.msk.f32.mxu1 %vm10990_vm3, %v25932_v58 }
 0x272   : > { %23172 = vmatpush3.msra.mxu0 %v25846_v50  ;;  %23179 = vmatpush3.msra.mxu1 %v25846_v50  ;;  %v17118_v50 = vld [vmem:[#allocation2 + $0x58] sm:$0xf] }
 0x273   : > { %23183 = vmatprep.subr.mxu0 %v25927_v5  ;;  %23190 = vmatprep.subr.mxu1 %v25927_v5 }
 0x274   : > { %23174 = vmatmul.mubr.msk.f32.vlgmr.msra.gmra.mxu0 %vm10990_vm3, %v15085_v60  ;;  %23181 = vmatmul.mubr.msk.f32.vlgmr.msra.gmra.mxu1 %vm10990_vm3, %v15087_v1 }
 0x275   : > { %23184 = vmatpush3.msra.mxu0 %v25927_v5  ;;  %23191 = vmatpush3.msra.mxu1 %v25927_v5 }
 0x276   : > { %23185 = vmatprep.subr.mxu0 %v25942_v7  ;;  %23187 = vmatprep.mubr.msk.f32.mxu0 %vm10990_vm3, %v25645_v62  ;;  %v16092_v62 = vld [vmem:[#allocation2 + $0x3a] sm:$0xf] }
 0x277   : > { %23192 = vmatprep.subr.mxu1 %v25942_v7  ;;  %23194 = vmatprep.mubr.msk.f32.mxu1 %vm10990_vm3, %v25658_v36  ;;  %v16094_v36 = vld [vmem:[#allocation2 + $0x4a] sm:$0xf] }
 0x278   : > { %23186 = vmatpush3.msra.mxu0 %v25942_v7  ;;  %23193 = vmatpush3.msra.mxu1 %v25942_v7 }
 0x279   : > { %23197 = vmatprep.subr.mxu0 %v25927_v5  ;;  %23204 = vmatprep.subr.mxu1 %v25927_v5 }
 0x27a   : > { %23188 = vmatmul.mubr.msk.f32.vlgmr.msra.gmra.mxu0 %vm10990_vm3, %v16088_v34  ;;  %23195 = vmatmul.mubr.msk.f32.vlgmr.msra.gmra.mxu1 %vm10990_vm3, %v16090_v57 }
 0x27b   : > { %23198 = vmatpush3.msra.mxu0 %v25927_v5  ;;  %23205 = vmatpush3.msra.mxu1 %v25927_v5 }
 0x27c   : > { %23199 = vmatprep.subr.mxu0 %v25942_v7  ;;  %23201 = vmatprep.mubr.msk.f32.mxu0 %vm10990_vm3, %v25663_v53  ;;  %v16096_v53 = vld [vmem:[#allocation2 + $0x5a] sm:$0xf] }
 0x27d   : > { %23206 = vmatprep.subr.mxu1 %v25942_v7  ;;  %23208 = vmatprep.mubr.msk.f32.mxu1 %vm10990_vm3, %v25676_v22 }
 0x27e   : > { %23200 = vmatpush3.msra.mxu0 %v25942_v7  ;;  %23207 = vmatpush3.msra.mxu1 %v25942_v7 }
 0x27f   : > { %23211 = vmatprep.subr.mxu0 %v25927_v5  ;;  %23218 = vmatprep.subr.mxu1 %v25927_v5 }
 0x280   : > { %23202 = vmatmul.mubr.msk.f32.vlgmr.msra.gmra.mxu0 %vm10990_vm3, %v16092_v62  ;;  %23209 = vmatmul.mubr.msk.f32.vlgmr.msra.gmra.mxu1 %vm10990_vm3, %v16094_v36  ;;  %v17128_v36 = vld [vmem:[#allocation2 + $0xa8] sm:$0xf] }
 0x281   : > { %23212 = vmatpush3.msra.mxu0 %v25927_v5  ;;  %23219 = vmatpush3.msra.mxu1 %v25927_v5 }
 0x282   : > { %23213 = vmatprep.subr.mxu0 %v25942_v7  ;;  %23215 = vmatprep.mubr.msk.f32.mxu0 %vm10990_vm3, %v25681_v40 }
 0x283   : > { %23220 = vmatprep.subr.mxu1 %v25942_v7  ;;  %23222 = vmatprep.mubr.msk.f32.mxu1 %vm10990_vm3, %v25694_v6  ;;  %v16100_v6 = vld [vmem:[#allocation2 + $0x7a] sm:$0xf] }
 0x284   : > { %23214 = vmatpush3.msra.mxu0 %v25942_v7  ;;  %23221 = vmatpush3.msra.mxu1 %v25942_v7  ;;  %v25988_v22 = vpop.f32.mrf.mxu0 }
 0x285   : > { %23225 = vmatprep.subr.mxu0 %v25927_v5  ;;  %23232 = vmatprep.subr.mxu1 %v25927_v5  ;;  %v25990_v40 = vpop.f32.mrf.mxu1 }
 0x286   : > { %23216 = vmatmul.mubr.msk.f32.vlgmr.msra.gmra.mxu0 %vm10990_vm3, %v16096_v53  ;;  %23223 = vmatmul.mubr.msk.f32.vlgmr.msra.gmra.mxu1 %vm10990_vm3, %v16098_v41  ;;  %v25996_v59 = vpop.f32.mrf.mxu0 }
 0x287   : > { %23226 = vmatpush3.msra.mxu0 %v25927_v5  ;;  %23233 = vmatpush3.msra.mxu1 %v25927_v5  ;;  %v26001_v63 = vpop.f32.mrf.mxu1 }
 0x288   : > { %23227 = vmatprep.subr.mxu0 %v25942_v7  ;;  %23229 = vmatprep.mubr.msk.f32.mxu0 %vm10990_vm3, %v25699_v37 }
 0x289   : > { %23234 = vmatprep.subr.mxu1 %v25942_v7  ;;  %23236 = vmatprep.mubr.msk.f32.mxu1 %vm10990_vm3, %v25712_v17 }
 0x28a   : > { %23228 = vmatpush3.msra.mxu0 %v25942_v7  ;;  %23235 = vmatpush3.msra.mxu1 %v25942_v7 }
 0x28b   : > { %23239 = vmatprep.subr.mxu0 %v25927_v5  ;;  %23246 = vmatprep.subr.mxu1 %v25927_v5  ;;  %v26010_v37 = vpop.f32.mrf.mxu0 }
 0x28c   : > { %23230 = vmatmul.mubr.msk.f32.vlgmr.msra.gmra.mxu0 %vm10990_vm3, %v16100_v6  ;;  %23237 = vmatmul.mubr.msk.f32.vlgmr.msra.gmra.mxu1 %vm10990_vm3, %v16102_v13  ;;  %v26014_v30 = vpop.f32.mrf.mxu1 }
 0x28d   : > { %23240 = vmatpush3.msra.mxu0 %v25927_v5  ;;  %23247 = vmatpush3.msra.mxu1 %v25927_v5  ;;  %v26018_v17 = vpop.f32.mrf.mxu0 }
 0x28e   : > { %23241 = vmatprep.subr.mxu0 %v25942_v7  ;;  %23243 = vmatprep.mubr.msk.f32.mxu0 %vm10990_vm3, %v25717_v45  ;;  %v26023_v21 = vpop.f32.mrf.mxu1 }
 0x28f   : > { %23248 = vmatprep.subr.mxu1 %v25942_v7  ;;  %23250 = vmatprep.mubr.msk.f32.mxu1 %vm10990_vm3, %v25730_v11  ;;  %v26043_v11 = vld [vmem:[%s26853_s3 + $0x68] sm:$0xff] }
 0x290   : > { %23242 = vmatpush3.msra.mxu0 %v25942_v7  ;;  %23249 = vmatpush3.msra.mxu1 %v25942_v7 }
 0x291   : > { %23253 = vmatprep.subr.mxu0 %v25927_v5  ;;  %23260 = vmatprep.subr.mxu1 %v25927_v5 }
 0x292   : > { %23244 = vmatmul.mubr.msk.f32.vlgmr.msra.gmra.mxu0 %vm10990_vm3, %v16104_v24  ;;  %v26032_v45 = vpop.f32.mrf.mxu0  ;;  %23251 = vmatmul.mubr.msk.f32.vlgmr.msra.gmra.mxu1 %vm10990_vm3, %v16106_v26  ;;  %v26036_v20 = vpop.f32.mrf.mxu1 }
 0x293   : > { %23254 = vmatpush3.msra.mxu0 %v25927_v5  ;;  %23261 = vmatpush3.msra.mxu1 %v25927_v5 }
 0x294   : > { %23255 = vmatprep.subr.mxu0 %v25942_v7  ;;  %v26045_v38 = vpop.f32.mrf.mxu0  ;;  %23257 = vmatprep.mubr.msk.f32.mxu0 %vm10990_vm3, %v25740_v46  ;;  %v26052_v12 = vpop.f32.mrf.mxu1  ;;  %v26062_v46 = vld [vmem:[%s26853_s3 + $0x60] sm:$0xff] }
 0x295   : > { %23262 = vmatprep.subr.mxu1 %v25942_v7  ;;  %23264 = vmatprep.mubr.msk.f32.mxu1 %vm10990_vm3, %v26050_v35 }
 0x296   : > { %23256 = vmatpush3.msra.mxu0 %v25942_v7  ;;  %23263 = vmatpush3.msra.mxu1 %v25942_v7 }
 0x297   : > { %23267 = vmatprep.subr.mxu0 %v26043_v11  ;;  %23274 = vmatprep.subr.mxu1 %v26043_v11 }
 0x298   : > { %23258 = vmatmul.mubr.msk.f32.vlgmr.msra.gmra.mxu0 %vm10990_vm3, %v16108_v42  ;;  %v26066_v0 = vpop.f32.mrf.mxu0  ;;  %23265 = vmatmul.mubr.msk.f32.vlgmr.msra.gmra.mxu1 %vm10990_vm3, %v16110_v27  ;;  %v26070_v19 = vpop.f32.mrf.mxu1  ;;  %v18135_v27 = vld [vmem:[#allocation2 + $0x29] sm:$0xf] }
 0x299   : > { %23268 = vmatpush3.msra.mxu0 %v26043_v11  ;;  %23275 = vmatpush3.msra.mxu1 %v26043_v11 }
 0x29a   : > { %23269 = vmatprep.subr.mxu0 %v26062_v46  ;;  %v26074_v14 = vpop.f32.mrf.mxu0  ;;  %23271 = vmatprep.mubr.msk.f32.mxu0 %vm10990_vm3, %v25543_v61  ;;  %v26079_v43 = vpop.f32.mrf.mxu1 }
 0x29b   : > { %23276 = vmatprep.subr.mxu1 %v26062_v46  ;;  %23278 = vmatprep.mubr.msk.f32.mxu1 %vm10990_vm3, %v25548_v32 }
 0x29c   : > { %23270 = vmatpush3.msra.mxu0 %v26062_v46  ;;  %23277 = vmatpush3.msra.mxu1 %v26062_v46 }
 0x29d   : > { %23281 = vmatprep.subr.mxu0 %v26043_v11  ;;  %23288 = vmatprep.subr.mxu1 %v26043_v11 }
 0x29e   : > { %23272 = vmatmul.mubr.msk.f32.vlgmr.msra.gmra.mxu0 %vm10990_vm3, %v17112_v25  ;;  %v26088_v61 = vpop.f32.mrf.mxu0  ;;  %23279 = vmatmul.mubr.msk.f32.vlgmr.msra.gmra.mxu1 %vm10990_vm3, %v17114_v54  ;;  %v26092_v44 = vpop.f32.mrf.mxu1  ;;  %v18138_v25 = vld [vmem:[#allocation2 + $0x41] sm:$0xff] }
 0x29f   : > { %23282 = vmatpush3.msra.mxu0 %v26043_v11  ;;  %23289 = vmatpush3.msra.mxu1 %v26043_v11 }
 0x2a0   : > { %23283 = vmatprep.subr.mxu0 %v26062_v46  ;;  %v26096_v32 = vpop.f32.mrf.mxu0  ;;  %23285 = vmatprep.mubr.msk.f32.mxu0 %vm10990_vm3, %v25561_v2  ;;  %v26101_v16 = vpop.f32.mrf.mxu1 }
 0x2a1   : > { %23290 = vmatprep.subr.mxu1 %v26062_v46  ;;  %23292 = vmatprep.mubr.msk.f32.mxu1 %vm10990_vm3, %v25566_v18 }
 0x2a2   : > { %23284 = vmatpush3.msra.mxu0 %v26062_v46  ;;  %23291 = vmatpush3.msra.mxu1 %v26062_v46 }
 0x2a3   : > { %23295 = vmatprep.subr.mxu0 %v26043_v11  ;;  %23302 = vmatprep.subr.mxu1 %v26043_v11 }
 0x2a4   : > { %23286 = vmatmul.mubr.msk.f32.vlgmr.msra.gmra.mxu0 %vm10990_vm3, %v17116_v15  ;;  %v26110_v2 = vpop.f32.mrf.mxu0  ;;  %23293 = vmatmul.mubr.msk.f32.vlgmr.msra.gmra.mxu1 %vm10990_vm3, %v17118_v50  ;;  %v26114_v28 = vpop.f32.mrf.mxu1  ;;  %v18140_v50 = vld [vmem:[#allocation2 + $0x51] sm:$0xff] }
 0x2a5   : > { %23296 = vmatpush3.msra.mxu0 %v26043_v11  ;;  %23303 = vmatpush3.msra.mxu1 %v26043_v11 }
 0x2a6   : > { %23297 = vmatprep.subr.mxu0 %v26062_v46  ;;  %v26118_v18 = vpop.f32.mrf.mxu0  ;;  %23299 = vmatprep.mubr.msk.f32.mxu0 %vm10990_vm3, %v25579_v51  ;;  %v26123_v49 = vpop.f32.mrf.mxu1 }
 0x2a7   : > { %23304 = vmatprep.subr.mxu1 %v26062_v46  ;;  %23306 = vmatprep.mubr.msk.f32.mxu1 %vm10990_vm3, %v25584_v10 }
 0x2a8   : > { %23298 = vmatpush3.msra.mxu0 %v26062_v46  ;;  %23305 = vmatpush3.msra.mxu1 %v26062_v46 }
 0x2a9   : > { %23309 = vmatprep.subr.mxu0 %v26043_v11  ;;  %23316 = vmatprep.subr.mxu1 %v26043_v11 }
 0x2aa   : > { %23300 = vmatmul.mubr.msk.f32.vlgmr.msra.gmra.mxu0 %vm10990_vm3, %v17120_v8  ;;  %v22853_v51 = vpop.f32.mrf.mxu0  ;;  %23307 = vmatmul.mubr.msk.f32.vlgmr.msra.gmra.mxu1 %vm10990_vm3, %v17122_v33  ;;  %v22860_v10 = vpop.f32.mrf.mxu1 }
 0x2ab   : > { %23310 = vmatpush3.msra.mxu0 %v26043_v11  ;;  %v26135_v39 = vadd.f32 %v22853_v51, %v25988_v22  ;;  %23317 = vmatpush3.msra.mxu1 %v26043_v11  ;;  %v26140_v47 = vadd.f32 %v22860_v10, %v25990_v40  ;;  %v26194_v22 = vld [vmem:[%s26853_s3 + $0x78] sm:$0xff] }
 0x2ac   : > { %23311 = vmatprep.subr.mxu0 %v26062_v46  ;;  %v12117_v4 = vpop.f32.mrf.mxu0  ;;  %23313 = vmatprep.mubr.msk.f32.mxu0 %vm10990_vm3, %v25597_v52  ;;  %v12198_v3 = vpop.f32.mrf.mxu1  ;;  %v17126_v52 = vld [vmem:[#allocation2 + $0x98] sm:$0xf] }
 0x2ad   : > { %23318 = vmatprep.subr.mxu1 %v26062_v46  ;;  %v26146_v23 = vadd.f32 %v12117_v4, %v25996_v59  ;;  %23320 = vmatprep.mubr.msk.f32.mxu1 %vm10990_vm3, %v25602_v31  ;;  %v26152_v29 = vadd.f32 %v12198_v3, %v26001_v63  ;;  %v17133_v63 = vld [vmem:[#allocation2 + $0xd0] sm:$0xff]  ;;  %v18141_v51 = vld [vmem:[#allocation2 + $0x59] sm:$0xf]  ;;  %v18142_v4 = vld [vmem:[#allocation2 + $0x61] sm:$0xff] }
 0x2ae   : > { %23312 = vmatpush3.msra.mxu0 %v26062_v46  ;;  %23319 = vmatpush3.msra.mxu1 %v26062_v46 }
 0x2af   : > { %23323 = vmatprep.subr.mxu0 %v26043_v11  ;;  %23330 = vmatprep.subr.mxu1 %v26043_v11 }
 0x2b0   : > { %23314 = vmatmul.mubr.msk.f32.vlgmr.msra.gmra.mxu0 %vm10990_vm3, %v17124_v9  ;;  %v22867_v5 = vpop.f32.mrf.mxu0  ;;  %23321 = vmatmul.mubr.msk.f32.vlgmr.msra.gmra.mxu1 %vm10990_vm3, %v17126_v52  ;;  %v22874_v60 = vpop.f32.mrf.mxu1  ;;  %v18144_v52 = vld [vmem:[#allocation2 + $0x71] sm:$0xff] }
 0x2b1   : > { %23324 = vmatpush3.msra.mxu0 %v26043_v11  ;;  %v26161_v31 = vadd.f32 %v22867_v5, %v26010_v37  ;;  %23331 = vmatpush3.msra.mxu1 %v26043_v11  ;;  %v26166_v7 = vadd.f32 %v22874_v60, %v26014_v30  ;;  %v17132_v30 = vld [vmem:[#allocation2 + $0xc8] sm:$0xf] }
 0x2b2   : > { %23325 = vmatprep.subr.mxu0 %v26062_v46  ;;  %v12279_v1 = vpop.f32.mrf.mxu0  ;;  %23327 = vmatprep.mubr.msk.f32.mxu0 %vm10990_vm3, %v25615_v55  ;;  %v12360_v57 = vpop.f32.mrf.mxu1  ;;  %v17130_v55 = vld [vmem:[#allocation2 + $0xb8] sm:$0xf] }
 0x2b3   : > { %23332 = vmatprep.subr.mxu1 %v26062_v46  ;;  %v26172_v34 = vadd.f32 %v12279_v1, %v26018_v17  ;;  %23334 = vmatprep.mubr.msk.f32.mxu1 %vm10990_vm3, %v25625_v56  ;;  %v26178_v62 = vadd.f32 %v12360_v57, %v26023_v21  ;;  %v17134_v17 = vld [vmem:[#allocation2 + $0xd8] sm:$0xf] }
 0x2b4   : > { %23326 = vmatpush3.msra.mxu0 %v26062_v46  ;;  %23333 = vmatpush3.msra.mxu1 %v26062_v46  ;;  %v18145_v1 = vld [vmem:[#allocation2 + $0x79] sm:$0xf] }
 0x2b5   : > { %23337 = vmatprep.subr.mxu0 %v26043_v11  ;;  %23344 = vmatprep.subr.mxu1 %v26043_v11 }
 0x2b6   : > { %23328 = vmatmul.mubr.msk.f32.vlgmr.msra.gmra.mxu0 %vm10990_vm3, %v17128_v36  ;;  %v22881_v53 = vpop.f32.mrf.mxu0  ;;  %23335 = vmatmul.mubr.msk.f32.vlgmr.msra.gmra.mxu1 %vm10990_vm3, %v17130_v55  ;;  %v22888_v41 = vpop.f32.mrf.mxu1  ;;  %v18146_v36 = vld [vmem:[#allocation2 + $0x81] sm:$0xff] }
 0x2b7   : > { %23338 = vmatpush3.msra.mxu0 %v26043_v11  ;;  %v26187_v56 = vadd.f32 %v22881_v53, %v26032_v45  ;;  %23345 = vmatpush3.msra.mxu1 %v26043_v11  ;;  %v26197_v40 = vadd.f32 %v22888_v41, %v26036_v20  ;;  %v18134_v45 = vld [vmem:[#allocation2 + $0x21] sm:$0xff]  ;;  %v18148_v41 = vld [vmem:[#allocation2 + $0x91] sm:$0xff] }
 0x2b8   : > { %23339 = vmatprep.subr.mxu0 %v26062_v46  ;;  %v12441_v59 = vpop.f32.mrf.mxu0  ;;  %23341 = vmatprep.mubr.msk.f32.mxu0 %vm10990_vm3, %v25836_v48  ;;  %v12522_v13 = vpop.f32.mrf.mxu1  ;;  %v26215_v48 = vld [vmem:[%s26853_s3 + $0x70] sm:$0xff] }
 0x2b9   : > { %23346 = vmatprep.subr.mxu1 %v26062_v46  ;;  %v26203_v6 = vadd.f32 %v12441_v59, %v26045_v38  ;;  %23348 = vmatprep.mubr.msk.f32.mxu1 %vm10990_vm3, %v17133_v63  ;;  %v26208_v37 = vadd.f32 %v12522_v13, %v26052_v12  ;;  %v18136_v38 = vld [vmem:[#allocation2 + $0x31] sm:$0xff]  ;;  %v18149_v13 = vld [vmem:[#allocation2 + $0x99] sm:$0xf] }
 0x2ba   : > { %23340 = vmatpush3.msra.mxu0 %v26062_v46  ;;  %23347 = vmatpush3.msra.mxu1 %v26062_v46 }
 0x2bb   : > { %23351 = vmatprep.subr.mxu0 %v26194_v22  ;;  %23358 = vmatprep.subr.mxu1 %v26194_v22 }
 0x2bc   : > { %23342 = vmatmul.mubr.msk.f32.vlgmr.msra.gmra.mxu0 %vm10990_vm3, %v17132_v30  ;;  %v22895_v21 = vpop.f32.mrf.mxu0  ;;  %23349 = vmatmul.mubr.msk.f32.vlgmr.msra.gmra.mxu1 %vm10990_vm3, %v17134_v17  ;;  %v22902_v26 = vpop.f32.mrf.mxu1  ;;  %v18150_v17 = vld [vmem:[#allocation2 + $0xa1] sm:$0xff] }
 0x2bd   : > { %23352 = vmatpush3.msra.mxu0 %v26194_v22  ;;  %v26222_v24 = vadd.f32 %v22895_v21, %v26066_v0  ;;  %23359 = vmatpush3.msra.mxu1 %v26194_v22  ;;  %v26227_v20 = vadd.f32 %v22902_v26, %v26070_v19  ;;  %v18137_v0 = vld [vmem:[#allocation2 + $0x39] sm:$0xf] }
 0x2be   : > { %23353 = vmatprep.subr.mxu0 %v26215_v48  ;;  %v12603_v11 = vpop.f32.mrf.mxu0  ;;  %23355 = vmatprep.mubr.msk.f32.mxu0 %vm10990_vm3, %v18134_v45  ;;  %v12684_v42 = vpop.f32.mrf.mxu1  ;;  %v18152_v45 = vld [vmem:[#allocation2 + $0xb1] sm:$0xff] }
 0x2bf   : > { %23360 = vmatprep.subr.mxu1 %v26215_v48  ;;  %v26232_v12 = vadd.f32 %v12603_v11, %v26074_v14  ;;  %23362 = vmatprep.mubr.msk.f32.mxu1 %vm10990_vm3, %v18136_v38  ;;  %v26237_v46 = vadd.f32 %v12684_v42, %v26079_v43  ;;  %v18153_v42 = vld [vmem:[#allocation2 + $0xb9] sm:$0xf] }
 0x2c0   : > { %23354 = vmatpush3.msra.mxu0 %v26215_v48  ;;  %23361 = vmatpush3.msra.mxu1 %v26215_v48 }
 0x2c1   : > { %23365 = vmatprep.subr.mxu0 %v26194_v22  ;;  %23372 = vmatprep.subr.mxu1 %v26194_v22 }
 0x2c2   : > { %23356 = vmatmul.mubr.msk.f32.vlgmr.msra.gmra.mxu0 %vm10990_vm3, %v18135_v27  ;;  %v22909_v19 = vpop.f32.mrf.mxu0  ;;  %23363 = vmatmul.mubr.msk.f32.vlgmr.msra.gmra.mxu1 %vm10990_vm3, %v18137_v0  ;;  %v22916_v43 = vpop.f32.mrf.mxu1  ;;  %v26349_v0 = vld [vmem:[%s26853_s3 + $0x88] sm:$0xff] }
 0x2c3   : > { %23366 = vmatpush3.msra.mxu0 %v26194_v22  ;;  %v26246_v14 = vadd.f32 %v22909_v19, %v26088_v61  ;;  %23373 = vmatpush3.msra.mxu1 %v26194_v22  ;;  %v26251_v54 = vadd.f32 %v22916_v43, %v26092_v44  ;;  %v18139_v44 = vld [vmem:[#allocation2 + $0x49] sm:$0xf] }
 0x2c4   : > { %23367 = vmatprep.subr.mxu0 %v26215_v48  ;;  %v12765_v15 = vpop.f32.mrf.mxu0  ;;  %23369 = vmatprep.mubr.msk.f32.mxu0 %vm10990_vm3, %v18138_v25  ;;  %v12846_v61 = vpop.f32.mrf.mxu1 }
 0x2c5   : > { %23374 = vmatprep.subr.mxu1 %v26215_v48  ;;  %v26256_v8 = vadd.f32 %v12765_v15, %v26096_v32  ;;  %23376 = vmatprep.mubr.msk.f32.mxu1 %vm10990_vm3, %v18140_v50  ;;  %v26261_v33 = vadd.f32 %v12846_v61, %v26101_v16  ;;  %v19157_v61 = vld [vmem:[#allocation2 + $0x22] sm:$0xff] }
 0x2c6   : > { %23368 = vmatpush3.msra.mxu0 %v26215_v48  ;;  %23375 = vmatpush3.msra.mxu1 %v26215_v48 }
 0x2c7   : > { %23379 = vmatprep.subr.mxu0 %v26194_v22  ;;  %23386 = vmatprep.subr.mxu1 %v26194_v22 }
 0x2c8   : > { %23370 = vmatmul.mubr.msk.f32.vlgmr.msra.gmra.mxu0 %vm10990_vm3, %v18139_v44  ;;  %v22923_v32 = vpop.f32.mrf.mxu0  ;;  %23377 = vmatmul.mubr.msk.f32.vlgmr.msra.gmra.mxu1 %vm10990_vm3, %v18141_v51  ;;  %v22930_v16 = vpop.f32.mrf.mxu1 }
 0x2c9   : > { %23380 = vmatpush3.msra.mxu0 %v26194_v22  ;;  %v26270_v10 = vadd.f32 %v22923_v32, %v26110_v2  ;;  %23387 = vmatpush3.msra.mxu1 %v26194_v22  ;;  %v26275_v3 = vadd.f32 %v22930_v16, %v26114_v28  ;;  %v18143_v28 = vld [vmem:[#allocation2 + $0x69] sm:$0xf]  ;;  %v19159_v32 = vld [vmem:[#allocation2 + $0x32] sm:$0xff] }
 0x2ca   : > { %23381 = vmatprep.subr.mxu0 %v26215_v48  ;;  %v12927_v9 = vpop.f32.mrf.mxu0  ;;  %23383 = vmatprep.mubr.msk.f32.mxu0 %vm10990_vm3, %v18142_v4  ;;  %v13008_v2 = vpop.f32.mrf.mxu1 }
 0x2cb   : > { %23388 = vmatprep.subr.mxu1 %v26215_v48  ;;  %v26280_v5 = vadd.f32 %v12927_v9, %v26118_v18  ;;  %23390 = vmatprep.mubr.msk.f32.mxu1 %vm10990_vm3, %v18144_v52  ;;  %v26285_v60 = vadd.f32 %v13008_v2, %v26123_v49  ;;  %v19160_v9 = vld [vmem:[#allocation2 + $0x3a] sm:$0xf]  ;;  %v19161_v2 = vld [vmem:[#allocation2 + $0x42] sm:$0xff] }
 0x2cc   : > { %23382 = vmatpush3.msra.mxu0 %v26215_v48  ;;  %23389 = vmatpush3.msra.mxu1 %v26215_v48 }
 0x2cd   : > { %23393 = vmatprep.subr.mxu0 %v26194_v22  ;;  %23400 = vmatprep.subr.mxu1 %v26194_v22 }
 0x2ce   : > { %23384 = vmatmul.mubr.msk.f32.vlgmr.msra.gmra.mxu0 %vm10990_vm3, %v18143_v28  ;;  %v22937_v18 = vpop.f32.mrf.mxu0  ;;  %23391 = vmatmul.mubr.msk.f32.vlgmr.msra.gmra.mxu1 %vm10990_vm3, %v18145_v1  ;;  %v22944_v49 = vpop.f32.mrf.mxu1 }
 0x2cf   : > { %23394 = vmatpush3.msra.mxu0 %v26194_v22  ;;  %v26294_v57 = vadd.f32 %v22937_v18, %v26135_v39  ;;  %23401 = vmatpush3.msra.mxu1 %v26194_v22  ;;  %v26299_v55 = vadd.f32 %v22944_v49, %v26140_v47  ;;  %v18147_v47 = vld [vmem:[#allocation2 + $0x89] sm:$0xf]  ;;  %v19163_v18 = vld [vmem:[#allocation2 + $0x52] sm:$0xff] }
 0x2d0   : > { %23395 = vmatprep.subr.mxu0 %v26215_v48  ;;  %v13116_v53 = vpop.f32.mrf.mxu0  ;;  %23397 = vmatprep.mubr.msk.f32.mxu0 %vm10990_vm3, %v18146_v36  ;;  %v13197_v39 = vpop.f32.mrf.mxu1 }
 0x2d1   : > { %23402 = vmatprep.subr.mxu1 %v26215_v48  ;;  %v26304_v59 = vadd.f32 %v13116_v53, %v26146_v23  ;;  %23404 = vmatprep.mubr.msk.f32.mxu1 %vm10990_vm3, %v18148_v41  ;;  %v26309_v63 = vadd.f32 %v13197_v39, %v26152_v29  ;;  %v19164_v53 = vld [vmem:[#allocation2 + $0x5a] sm:$0xf]  ;;  %v19165_v39 = vld [vmem:[#allocation2 + $0x62] sm:$0xff] }
 0x2d2   : > { %23396 = vmatpush3.msra.mxu0 %v26215_v48  ;;  %23403 = vmatpush3.msra.mxu1 %v26215_v48 }
 0x2d3   : > { %23407 = vmatprep.subr.mxu0 %v26194_v22  ;;  %23414 = vmatprep.subr.mxu1 %v26194_v22 }
 0x2d4   : > { %23398 = vmatmul.mubr.msk.f32.vlgmr.msra.gmra.mxu0 %vm10990_vm3, %v18147_v47  ;;  %v22951_v23 = vpop.f32.mrf.mxu0  ;;  %23405 = vmatmul.mubr.msk.f32.vlgmr.msra.gmra.mxu1 %vm10990_vm3, %v18149_v13  ;;  %v22958_v29 = vpop.f32.mrf.mxu1 }
 0x2d5   : > { %23408 = vmatpush3.msra.mxu0 %v26194_v22  ;;  %v26318_v30 = vadd.f32 %v22951_v23, %v26161_v31  ;;  %23415 = vmatpush3.msra.mxu1 %v26194_v22  ;;  %v26323_v21 = vadd.f32 %v22958_v29, %v26166_v7  ;;  %v18151_v7 = vld [vmem:[#allocation2 + $0xa9] sm:$0xf]  ;;  %v19167_v23 = vld [vmem:[#allocation2 + $0x72] sm:$0xff] }
 0x2d6   : > { %23409 = vmatprep.subr.mxu0 %v26215_v48  ;;  %v13278_v26 = vpop.f32.mrf.mxu0  ;;  %23411 = vmatprep.mubr.msk.f32.mxu0 %vm10990_vm3, %v18150_v17  ;;  %v13359_v31 = vpop.f32.mrf.mxu1 }
 0x2d7   : > { %23416 = vmatprep.subr.mxu1 %v26215_v48  ;;  %v26328_v11 = vadd.f32 %v13278_v26, %v26172_v34  ;;  %23418 = vmatprep.mubr.msk.f32.mxu1 %vm10990_vm3, %v18152_v45  ;;  %v26333_v38 = vadd.f32 %v13359_v31, %v26178_v62  ;;  %v19168_v26 = vld [vmem:[#allocation2 + $0x7a] sm:$0xf]  ;;  %v19169_v31 = vld [vmem:[#allocation2 + $0x82] sm:$0xff] }
 0x2d8   : > { %23410 = vmatpush3.msra.mxu0 %v26215_v48  ;;  %23417 = vmatpush3.msra.mxu1 %v26215_v48 }
 0x2d9   : > { %23421 = vmatprep.subr.mxu0 %v26194_v22  ;;  %23428 = vmatprep.subr.mxu1 %v26194_v22 }
 0x2da   : > { %23412 = vmatmul.mubr.msk.f32.vlgmr.msra.gmra.mxu0 %vm10990_vm3, %v18151_v7  ;;  %v22965_v34 = vpop.f32.mrf.mxu0  ;;  %23419 = vmatmul.mubr.msk.f32.vlgmr.msra.gmra.mxu1 %vm10990_vm3, %v18153_v42  ;;  %v22972_v62 = vpop.f32.mrf.mxu1 }
 0x2db   : > { %23422 = vmatpush3.msra.mxu0 %v26194_v22  ;;  %v26342_v27 = vadd.f32 %v22965_v34, %v26187_v56  ;;  %23429 = vmatpush3.msra.mxu1 %v26194_v22  ;;  %v26352_v19 = vadd.f32 %v22972_v62, %v26197_v40  ;;  %v18156_v56 = vld [vmem:[#allocation2 + $0xd1] sm:$0xff]  ;;  %v18155_v40 = vld [vmem:[#allocation2 + $0xc9] sm:$0xf] }
 0x2dc   : > { %23423 = vmatprep.subr.mxu0 %v26215_v48  ;;  %v13440_v43 = vpop.f32.mrf.mxu0  ;;  %23425 = vmatprep.mubr.msk.f32.mxu0 %vm10990_vm3, %v25932_v58  ;;  %v13521_v22 = vpop.f32.mrf.mxu1  ;;  %v26370_v58 = vld [vmem:[%s26853_s3 + $0x80] sm:$0xff]  ;;  %v19171_v34 = vld [vmem:[#allocation2 + $0x92] sm:$0xff] }
 0x2dd   : > { %23430 = vmatprep.subr.mxu1 %v26215_v48  ;;  %v26358_v25 = vadd.f32 %v13440_v43, %v26203_v6  ;;  %23432 = vmatprep.mubr.msk.f32.mxu1 %vm10990_vm3, %v18156_v56  ;;  %v26363_v15 = vadd.f32 %v13521_v22, %v26208_v37  ;;  %v18157_v6 = vld [vmem:[#allocation2 + $0xd9] sm:$0xf] }
 0x2de   : > { %23424 = vmatpush3.msra.mxu0 %v26215_v48  ;;  %23431 = vmatpush3.msra.mxu1 %v26215_v48  ;;  %v19172_v56 = vld [vmem:[#allocation2 + $0x9a] sm:$0xf] }
 0x2df   : > { %23435 = vmatprep.subr.mxu0 %v26349_v0  ;;  %23442 = vmatprep.subr.mxu1 %v26349_v0 }
 0x2e0   : > { %23426 = vmatmul.mubr.msk.f32.vlgmr.msra.gmra.mxu0 %vm10990_vm3, %v18155_v40  ;;  %v22979_v50 = vpop.f32.mrf.mxu0  ;;  %23433 = vmatmul.mubr.msk.f32.vlgmr.msra.gmra.mxu1 %vm10990_vm3, %v18157_v6  ;;  %v22986_v48 = vpop.f32.mrf.mxu1  ;;  %v19173_v40 = vld [vmem:[#allocation2 + $0xa2] sm:$0xff] }
 0x2e1   : > { %23436 = vmatpush3.msra.mxu0 %v26349_v0  ;;  %v26377_v37 = vadd.f32 %v22979_v50, %v26222_v24  ;;  %23443 = vmatpush3.msra.mxu1 %v26349_v0  ;;  %v26382_v44 = vadd.f32 %v22986_v48, %v26227_v20  ;;  %v19158_v20 = vld [vmem:[#allocation2 + $0x2a] sm:$0xf]  ;;  %v19175_v48 = vld [vmem:[#allocation2 + $0xb2] sm:$0xff] }
 0x2e2   : > { %23437 = vmatprep.subr.mxu0 %v26370_v58  ;;  %v13602_v51 = vpop.f32.mrf.mxu0  ;;  %23439 = vmatprep.mubr.msk.f32.mxu0 %vm10990_vm3, %v19157_v61  ;;  %v13683_v24 = vpop.f32.mrf.mxu1 }
 0x2e3   : > { %23444 = vmatprep.subr.mxu1 %v26370_v58  ;;  %v26387_v16 = vadd.f32 %v13602_v51, %v26232_v12  ;;  %23446 = vmatprep.mubr.msk.f32.mxu1 %vm10990_vm3, %v19159_v32  ;;  %v26392_v4 = vadd.f32 %v13683_v24, %v26237_v46  ;;  %v19176_v32 = vld [vmem:[#allocation2 + $0xba] sm:$0xf] }
 0x2e4   : > { %23438 = vmatpush3.msra.mxu0 %v26370_v58  ;;  %23445 = vmatpush3.msra.mxu1 %v26370_v58 }
 0x2e5   : > { %23449 = vmatprep.subr.mxu0 %v26349_v0  ;;  %23456 = vmatprep.subr.mxu1 %v26349_v0 }
 0x2e6   : > { %23440 = vmatmul.mubr.msk.f32.vlgmr.msra.gmra.mxu0 %vm10990_vm3, %v19158_v20  ;;  %v22993_v12 = vpop.f32.mrf.mxu0  ;;  %23447 = vmatmul.mubr.msk.f32.vlgmr.msra.gmra.mxu1 %vm10990_vm3, %v19160_v9  ;;  %v23000_v46 = vpop.f32.mrf.mxu1 }
 0x2e7   : > { %23450 = vmatpush3.msra.mxu0 %v26349_v0  ;;  %v26401_v52 = vadd.f32 %v22993_v12, %v26246_v14  ;;  %23457 = vmatpush3.msra.mxu1 %v26349_v0  ;;  %v26406_v28 = vadd.f32 %v23000_v46, %v26251_v54  ;;  %v19162_v54 = vld [vmem:[#allocation2 + $0x4a] sm:$0xf]  ;;  %v19179_v12 = vld [vmem:[#allocation2 + $0xd2] sm:$0xff] }
 0x2e8   : > { %23451 = vmatprep.subr.mxu0 %v26370_v58  ;;  %v13764_v1 = vpop.f32.mrf.mxu0  ;;  %23453 = vmatprep.mubr.msk.f32.mxu0 %vm10990_vm3, %v19161_v2  ;;  %v13845_v14 = vpop.f32.mrf.mxu1 }
 0x2e9   : > { %23458 = vmatprep.subr.mxu1 %v26370_v58  ;;  %v26411_v49 = vadd.f32 %v13764_v1, %v26256_v8  ;;  %23460 = vmatprep.mubr.msk.f32.mxu1 %vm10990_vm3, %v19163_v18  ;;  %v26416_v36 = vadd.f32 %v13845_v14, %v26261_v33 }
 0x2ea   : > { %23452 = vmatpush3.msra.mxu0 %v26370_v58  ;;  %23459 = vmatpush3.msra.mxu1 %v26370_v58 }
 0x2eb   : > { %23463 = vmatprep.subr.mxu0 %v26349_v0  ;;  %23470 = vmatprep.subr.mxu1 %v26349_v0 }
 0x2ec   : > { %23454 = vmatmul.mubr.msk.f32.vlgmr.msra.gmra.mxu0 %vm10990_vm3, %v19162_v54  ;;  %v23007_v8 = vpop.f32.mrf.mxu0  ;;  %23461 = vmatmul.mubr.msk.f32.vlgmr.msra.gmra.mxu1 %vm10990_vm3, %v19164_v53  ;;  %v23014_v33 = vpop.f32.mrf.mxu1 }
 0x2ed   : > { %23464 = vmatpush3.msra.mxu0 %v26349_v0  ;;  %v26425_v41 = vadd.f32 %v23007_v8, %v26270_v10  ;;  %23471 = vmatpush3.msra.mxu1 %v26349_v0  ;;  %v26430_v47 = vadd.f32 %v23014_v33, %v26275_v3  ;;  %v19166_v3 = vld [vmem:[#allocation2 + $0x6a] sm:$0xf] }
 0x2ee   : > { %23465 = vmatprep.subr.mxu0 %v26370_v58  ;;  %v13926_v13 = vpop.f32.mrf.mxu0  ;;  %23467 = vmatprep.mubr.msk.f32.mxu0 %vm10990_vm3, %v19165_v39  ;;  %v14007_v10 = vpop.f32.mrf.mxu1 }
 0x2ef   : > { %23472 = vmatprep.subr.mxu1 %v26370_v58  ;;  %v26435_v29 = vadd.f32 %v13926_v13, %v26280_v5  ;;  %23474 = vmatprep.mubr.msk.f32.mxu1 %vm10990_vm3, %v19167_v23  ;;  %v26440_v17 = vadd.f32 %v14007_v10, %v26285_v60 }
 0x2f0   : > { %23466 = vmatpush3.msra.mxu0 %v26370_v58  ;;  %23473 = vmatpush3.msra.mxu1 %v26370_v58 }
 0x2f1   : > { %23477 = vmatprep.subr.mxu0 %v26349_v0  ;;  %23484 = vmatprep.subr.mxu1 %v26349_v0 }
 0x2f2   : > { %23468 = vmatmul.mubr.msk.f32.vlgmr.msra.gmra.mxu0 %vm10990_vm3, %v19166_v3  ;;  %v23021_v5 = vpop.f32.mrf.mxu0  ;;  %23475 = vmatmul.mubr.msk.f32.vlgmr.msra.gmra.mxu1 %vm10990_vm3, %v19168_v26  ;;  %v23028_v60 = vpop.f32.mrf.mxu1 }
 0x2f3   : > { %23478 = vmatpush3.msra.mxu0 %v26349_v0  ;;  %v26449_v45 = vadd.f32 %v23021_v5, %v26294_v57  ;;  %23485 = vmatpush3.msra.mxu1 %v26349_v0  ;;  %v26454_v7 = vadd.f32 %v23028_v60, %v26299_v55  ;;  %v19170_v55 = vld [vmem:[#allocation2 + $0x8a] sm:$0xf] }
 0x2f4   : > { %23479 = vmatprep.subr.mxu0 %v26370_v58  ;;  %v14140_v42 = vpop.f32.mrf.mxu0  ;;  %23481 = vmatprep.mubr.msk.f32.mxu0 %vm10990_vm3, %v19169_v31  ;;  %v14221_v57 = vpop.f32.mrf.mxu1 }
 0x2f5   : > { %23486 = vmatprep.subr.mxu1 %v26370_v58  ;;  %v26459_v62 = vadd.f32 %v14140_v42, %v26304_v59  ;;  %23488 = vmatprep.mubr.msk.f32.mxu1 %vm10990_vm3, %v19171_v34  ;;  %v26464_v43 = vadd.f32 %v14221_v57, %v26309_v63 }
 0x2f6   : > { %23480 = vmatpush3.msra.mxu0 %v26370_v58  ;;  %23487 = vmatpush3.msra.mxu1 %v26370_v58 }
 0x2f7   : > { %23491 = vmatprep.subr.mxu0 %v26349_v0  ;;  %23498 = vmatprep.subr.mxu1 %v26349_v0 }
 0x2f8   : > { %23482 = vmatmul.mubr.msk.f32.vlgmr.msra.gmra.mxu0 %vm10990_vm3, %v19170_v55  ;;  %v23035_v59 = vpop.f32.mrf.mxu0  ;;  %23489 = vmatmul.mubr.msk.f32.vlgmr.msra.gmra.mxu1 %vm10990_vm3, %v19172_v56  ;;  %v23042_v63 = vpop.f32.mrf.mxu1 }
 0x2f9   : > { %23492 = vmatpush3.msra.mxu0 %v26349_v0  ;;  %v26473_v22 = vadd.f32 %v23035_v59, %v26318_v30  ;;  %23499 = vmatpush3.msra.mxu1 %v26349_v0  ;;  %v26478_v6 = vadd.f32 %v23042_v63, %v26323_v21  ;;  %v19174_v21 = vld [vmem:[#allocation2 + $0xaa] sm:$0xf] }
 0x2fa   : > { %23493 = vmatprep.subr.mxu0 %v26370_v58  ;;  %v14302_v50 = vpop.f32.mrf.mxu0  ;;  %23495 = vmatprep.mubr.msk.f32.mxu0 %vm10990_vm3, %v19173_v40  ;;  %v14383_v30 = vpop.f32.mrf.mxu1 }
 0x2fb   : > { %23500 = vmatprep.subr.mxu1 %v26370_v58  ;;  %v26483_v61 = vadd.f32 %v14302_v50, %v26328_v11  ;;  %23502 = vmatprep.mubr.msk.f32.mxu1 %vm10990_vm3, %v19175_v48  ;;  %v26488_v51 = vadd.f32 %v14383_v30, %v26333_v38 }
 0x2fc   : > { %23494 = vmatpush3.msra.mxu0 %v26370_v58  ;;  %23501 = vmatpush3.msra.mxu1 %v26370_v58 }
 0x2fd   : > { %23505 = vmatprep.subr.mxu0 %v26349_v0  ;;  %23512 = vmatprep.subr.mxu1 %v26349_v0 }
 0x2fe   : > { %23496 = vmatmul.mubr.msk.f32.vlgmr.msra.gmra.mxu0 %vm10990_vm3, %v19174_v21  ;;  %v23049_v11 = vpop.f32.mrf.mxu0  ;;  %23503 = vmatmul.mubr.msk.f32.vlgmr.msra.gmra.mxu1 %vm10990_vm3, %v19176_v32  ;;  %v23056_v20 = vpop.f32.mrf.mxu1 }
 0x2ff   : > { %23506 = vmatpush3.msra.mxu0 %v26349_v0  ;;  %v15049_v24 = vadd.f32 %v23049_v11, %v26342_v27  ;;  %23513 = vmatpush3.msra.mxu1 %v26349_v0  ;;  %v15051_v38 = vadd.f32 %v23056_v20, %v26352_v19  ;;  %v19178_v27 = vld [vmem:[#allocation2 + $0xca] sm:$0xf]  ;;  %v19180_v19 = vld [vmem:[#allocation2 + $0xda] sm:$0xf] }
 0x300   : > { %23507 = vmatprep.subr.mxu0 %v26370_v58  ;;  %v14464_v9 = vpop.f32.mrf.mxu0  ;;  %23509 = vmatprep.mubr.msk.f32.mxu0 %vm10990_vm3, %v26050_v35  ;;  %v14545_v2 = vpop.f32.mrf.mxu1 }
 0x301   : > { %23514 = vmatprep.subr.mxu1 %v26370_v58  ;;  %v15048_v46 = vadd.f32 %v14464_v9, %v26358_v25  ;;  %23516 = vmatprep.mubr.msk.f32.mxu1 %vm10990_vm3, %v19179_v12  ;;  %v15050_v0 = vadd.f32 %v14545_v2, %v26363_v15 }
 0x302   : > { %23508 = vmatpush3.msra.mxu0 %v26370_v58  ;;  %23515 = vmatpush3.msra.mxu1 %v26370_v58 }
 0x303   : > { %23510 = vmatmul.mubr.msk.f32.vlgmr.msra.gmra.mxu0 %vm10990_vm3, %v19178_v27  ;;  %23517 = vmatmul.mubr.msk.f32.vlgmr.msra.gmra.mxu1 %vm10990_vm3, %v19180_v19 }
 0x304   : > { %v23063_v35 = vpop.f32.mrf.mxu0  ;;  %v23070_v18 = vpop.f32.mrf.mxu1 }
 0x305   : > { %v15053_v1 = vadd.f32 %v23063_v35, %v26377_v37  ;;  %v15055_v25 = vadd.f32 %v23070_v18, %v26382_v44 }
 0x306   : > { %v14626_v14 = vpop.f32.mrf.mxu0  ;;  %v14707_v53 = vpop.f32.mrf.mxu1 }
 0x307   : > { %v15052_v54 = vadd.f32 %v14626_v14, %v26387_v16  ;;  %v15054_v8 = vadd.f32 %v14707_v53, %v26392_v4 }
 0x30a   : > { %v23077_v15 = vpop.f32.mrf.mxu0  ;;  %v23084_v33 = vpop.f32.mrf.mxu1 }
 0x30b   : > { %v15057_v58 = vadd.f32 %v23077_v15, %v26401_v52  ;;  %v15059_v39 = vadd.f32 %v23084_v33, %v26406_v28 }
 0x30c   : > { %v14788_v13 = vpop.f32.mrf.mxu0  ;;  %v14869_v10 = vpop.f32.mrf.mxu1 }
 0x30d   : > { %v15056_v23 = vadd.f32 %v14788_v13, %v26411_v49  ;;  %v15058_v37 = vadd.f32 %v14869_v10, %v26416_v36 }
 0x310   : > { %v23091_v3 = vpop.f32.mrf.mxu0  ;;  %v23098_v26 = vpop.f32.mrf.mxu1 }
 0x311   : > { %v15061_v44 = vadd.f32 %v23091_v3, %v26425_v41  ;;  %v15063_v16 = vadd.f32 %v23098_v26, %v26430_v47 }
 0x312   : > { %v14950_v5 = vpop.f32.mrf.mxu0  ;;  %v15031_v60 = vpop.f32.mrf.mxu1 }
 0x313   : > { %v15060_v4 = vadd.f32 %v14950_v5, %v26435_v29  ;;  %v15062_v52 = vadd.f32 %v15031_v60, %v26440_v17 }
 0x316   : > { %v23105_v31 = vpop.f32.mrf.mxu0  ;;  %v23112_v42 = vpop.f32.mrf.mxu1 }
 0x317   : > { %v16064_v28 = vadd.f32 %v23105_v31, %v26449_v45  ;;  %v16066_v49 = vadd.f32 %v23112_v42, %v26454_v7 }
 0x318   : > { %v15163_v34 = vpop.f32.mrf.mxu0  ;;  %v15244_v57 = vpop.f32.mrf.mxu1 }
 0x319   : > { %v16063_v36 = vadd.f32 %v15163_v34, %v26459_v62  ;;  %v16065_v41 = vadd.f32 %v15244_v57, %v26464_v43 }
 0x31c   : > { %v23119_v55 = vpop.f32.mrf.mxu0  ;;  %v23126_v56 = vpop.f32.mrf.mxu1 }
 0x31d   : > { %v16068_v47 = vadd.f32 %v23119_v55, %v26473_v22  ;;  %v16070_v29 = vadd.f32 %v23126_v56, %v26478_v6 }
 0x31e   : > { %v15325_v59 = vpop.f32.mrf.mxu0  ;;  %v15406_v63 = vpop.f32.mrf.mxu1 }
 0x31f   : > { %v16067_v17 = vadd.f32 %v15325_v59, %v26483_v61  ;;  %v16069_v45 = vadd.f32 %v15406_v63, %v26488_v51 }
 0x322   : > { %v23133_v40 = vpop.f32.mrf.mxu0  ;;  %v23140_v50 = vpop.f32.mrf.mxu1 }
 0x323   : > { %v16072_v7 = vadd.f32 %v23133_v40, %v15049_v24  ;;  %v16074_v48 = vadd.f32 %v23140_v50, %v15051_v38 }
 0x324   : > { %v15487_v62 = vpop.f32.mrf.mxu0  ;;  %v15568_v21 = vpop.f32.mrf.mxu1 }
 0x325   : > { %v16071_v30 = vadd.f32 %v15487_v62, %v15048_v46  ;;  %v16073_v43 = vadd.f32 %v15568_v21, %v15050_v0 }
 0x328   : > { %v23147_v32 = vpop.f32.mrf.mxu0  ;;  %v23154_v22 = vpop.f32.mrf.mxu1 }
 0x329   : > { %v16076_v11 = vadd.f32 %v23147_v32, %v15053_v1  ;;  %v16078_v20 = vadd.f32 %v23154_v22, %v15055_v25 }
 0x32a   : > { %v15649_v9 = vpop.f32.mrf.mxu0  ;;  %v15730_v12 = vpop.f32.mrf.mxu1 }
 0x32b   : > { %v16075_v6 = vadd.f32 %v15649_v9, %v15052_v54  ;;  %v16077_v2 = vadd.f32 %v15730_v12, %v15054_v8 }
 0x32e   : > { %v23161_v61 = vpop.f32.mrf.mxu0  ;;  %v23168_v19 = vpop.f32.mrf.mxu1 }
 0x32f   : > { %v16080_v27 = vadd.f32 %v23161_v61, %v15057_v58  ;;  %v16082_v51 = vadd.f32 %v23168_v19, %v15059_v39 }
 0x330   : > { %v15811_v35 = vpop.f32.mrf.mxu0  ;;  %v15892_v18 = vpop.f32.mrf.mxu1 }
 0x331   : > { %v16079_v24 = vadd.f32 %v15811_v35, %v15056_v23  ;;  %v16081_v38 = vadd.f32 %v15892_v18, %v15058_v37 }
 0x334   : > { %v23175_v14 = vpop.f32.mrf.mxu0  ;;  %v23182_v53 = vpop.f32.mrf.mxu1 }
 0x335   : > { %v16084_v46 = vadd.f32 %v23175_v14, %v15061_v44  ;;  %v16086_v0 = vadd.f32 %v23182_v53, %v15063_v16 }
 0x336   : > { %v15973_v15 = vpop.f32.mrf.mxu0  ;;  %v16054_v33 = vpop.f32.mrf.mxu1 }
 0x337   : > { %v16083_v1 = vadd.f32 %v15973_v15, %v15060_v4  ;;  %v16085_v25 = vadd.f32 %v16054_v33, %v15062_v52 }
 0x33a   : > { %v23189_v13 = vpop.f32.mrf.mxu0  ;;  %v23196_v8 = vpop.f32.mrf.mxu1 }
 0x33b   : > { %v26530_v54 = vadd.f32 %v23189_v13, %v16064_v28  ;;  %v26532_v10 = vadd.f32 %v23196_v8, %v16066_v49 }
 0x33c   : > { %v16186_v58 = vpop.f32.mrf.mxu0  ;;  %v16267_v23 = vpop.f32.mrf.mxu1 }
 0x33d   : > { %v26534_v39 = vadd.f32 %v16186_v58, %v16063_v36  ;;  %v26536_v3 = vadd.f32 %v16267_v23, %v16065_v41 }
 0x340   : > { %v23203_v37 = vpop.f32.mrf.mxu0  ;;  %v23210_v26 = vpop.f32.mrf.mxu1 }
 0x341   : > { %v26538_v44 = vadd.f32 %v23203_v37, %v16068_v47  ;;  %v26540_v16 = vadd.f32 %v23210_v26, %v16070_v29 }
 0x342   : > { %v16348_v5 = vpop.f32.mrf.mxu0  ;;  %v16429_v60 = vpop.f32.mrf.mxu1 }
 0x343   : > { %v26542_v4 = vadd.f32 %v16348_v5, %v16067_v17  ;;  %v26544_v52 = vadd.f32 %v16429_v60, %v16069_v45 }
 0x346   : > { %v23217_v31 = vpop.f32.mrf.mxu0  ;;  %v23224_v42 = vpop.f32.mrf.mxu1 }
 0x347   : > { %v26546_v28 = vadd.f32 %v23217_v31, %v16072_v7  ;;  %v26548_v49 = vadd.f32 %v23224_v42, %v16074_v48 }
 0x348   : > { %v16510_v34 = vpop.f32.mrf.mxu0  ;;  %v16591_v57 = vpop.f32.mrf.mxu1 }
 0x349   : > { %v26550_v36 = vadd.f32 %v16510_v34, %v16071_v30  ;;  %v26552_v41 = vadd.f32 %v16591_v57, %v16073_v43 }
 0x34c   : > { %v23231_v55 = vpop.f32.mrf.mxu0  ;;  %v23238_v56 = vpop.f32.mrf.mxu1 }
 0x34d   : > { %v26554_v47 = vadd.f32 %v23231_v55, %v16076_v11  ;;  %v26556_v29 = vadd.f32 %v23238_v56, %v16078_v20 }
 0x34e   : > { %v16672_v59 = vpop.f32.mrf.mxu0  ;;  %v16753_v63 = vpop.f32.mrf.mxu1 }
 0x34f   : > { %v26558_v17 = vadd.f32 %v16672_v59, %v16075_v6  ;;  %v26560_v45 = vadd.f32 %v16753_v63, %v16077_v2 }
 0x352   : > { %v23245_v40 = vpop.f32.mrf.mxu0  ;;  %v23252_v50 = vpop.f32.mrf.mxu1 }
 0x353   : > { %v26562_v7 = vadd.f32 %v23245_v40, %v16080_v27  ;;  %v26564_v48 = vadd.f32 %v23252_v50, %v16082_v51 }
 0x354   : > { %v16834_v62 = vpop.f32.mrf.mxu0  ;;  %v16915_v21 = vpop.f32.mrf.mxu1 }
 0x355   : > { %v26566_v30 = vadd.f32 %v16834_v62, %v16079_v24  ;;  %v26568_v43 = vadd.f32 %v16915_v21, %v16081_v38 }
 0x357   : > { %27024 = vst [vmem:[#allocation11_spill] sm:$0xff] %v26568_v43 }
 0x358   : > { %v23259_v32 = vpop.f32.mrf.mxu0  ;;  %v23266_v22 = vpop.f32.mrf.mxu1 }
 0x359   : > { %v26570_v11 = vadd.f32 %v23259_v32, %v16084_v46  ;;  %v26572_v20 = vadd.f32 %v23266_v22, %v16086_v0 }
 0x35a   : > { %v16996_v9 = vpop.f32.mrf.mxu0  ;;  %v17077_v12 = vpop.f32.mrf.mxu1 }
 0x35b   : > { %27025 = vst [vmem:[#allocation12_spill] sm:$0xff] %v26570_v11  ;;  %27026 = vst [vmem:[#allocation13_spill] sm:$0xff] %v26572_v20  ;;  %v26574_v6 = vadd.f32 %v16996_v9, %v16083_v1  ;;  %v26576_v2 = vadd.f32 %v17077_v12, %v16085_v25 }
 0x35d   : > { %27027 = vst [vmem:[#allocation14_spill] sm:$0xff] %v26574_v6  ;;  %27028 = vst [vmem:[#allocation15_spill] sm:$0xff] %v26576_v2 }
 0x35e   : > { %v23273_v61 = vpop.f32.mrf.mxu0  ;;  %v23280_v27 = vpop.f32.mrf.mxu1 }
 0x35f   : > { %v18111_v11 = vadd.f32 %v23273_v61, %v26530_v54  ;;  %v18113_v43 = vadd.f32 %v23280_v27, %v26532_v10 }
 0x360   : > { %v17210_v19 = vpop.f32.mrf.mxu0  ;;  %v17291_v51 = vpop.f32.mrf.mxu1 }
 0x364   : > { %v23287_v35 = vpop.f32.mrf.mxu0  ;;  %v23294_v24 = vpop.f32.mrf.mxu1 }
 0x365   : > { %v18115_v10 = vadd.f32 %v23287_v35, %v26538_v44 }
 0x366   : > { %v26578_v18 = vpop.f32.mrf.mxu0  ;;  %v26580_v38 = vpop.f32.mrf.mxu1 }
 0x367   : > { %v18116_v44 = vadd.f32 %v26580_v38, %v26544_v52 }
 0x36a   : > { %v26582_v14 = vpop.f32.mrf.mxu0  ;;  %v26584_v46 = vpop.f32.mrf.mxu1 }
 0x36b   : > { %v18119_v52 = vadd.f32 %v26582_v14, %v26546_v28 }
 0x36c   : > { %v26586_v53 = vpop.f32.mrf.mxu0  ;;  %v26588_v0 = vpop.f32.mrf.mxu1 }
 0x370   : > { %v26590_v15 = vpop.f32.mrf.mxu0  ;;  %v26592_v1 = vpop.f32.mrf.mxu1 }
 0x372   : > { %v26594_v33 = vpop.f32.mrf.mxu0  ;;  %v26596_v25 = vpop.f32.mrf.mxu1 }
 0x376   : > { %v26598_v13 = vpop.f32.mrf.mxu0  ;;  %v26600_v8 = vpop.f32.mrf.mxu1 }
 0x378   : > { %v26602_v58 = vpop.f32.mrf.mxu0  ;;  %v26604_v23 = vpop.f32.mrf.mxu1 }
 0x379   : > { %27029 = vst [vmem:[#allocation16_spill] sm:$0xff] %v26602_v58  ;;  %27030 = vst [vmem:[#allocation17_spill] sm:$0xff] %v26604_v23 }
 0x37c   : > { %v26606_v37 = vpop.f32.mrf.mxu0  ;;  %v26608_v26 = vpop.f32.mrf.mxu1 }
 0x37d   : > { %27031 = vst [vmem:[#allocation18_spill] sm:$0xff] %v26606_v37  ;;  %27032 = vst [vmem:[#allocation19_spill] sm:$0xff] %v26608_v26 }
 0x37e   : > { %v26610_v5 = vpop.f32.mrf.mxu0  ;;  %v26612_v60 = vpop.f32.mrf.mxu1 }
 0x37f   : > { %27033 = vst [vmem:[#allocation20_spill] sm:$0xff] %v26610_v5  ;;  %27034 = vst [vmem:[#allocation21_spill] sm:$0xff] %v26612_v60 }
 0x382   : > { %v23357_v31 = vpop.f32.mrf.mxu0  ;;  %v23364_v42 = vpop.f32.mrf.mxu1 }
 0x384   : > { %v18233_v34 = vpop.f32.mrf.mxu0  ;;  %v18314_v57 = vpop.f32.mrf.mxu1 }
 0x388   : > { %v23371_v55 = vpop.f32.mrf.mxu0  ;;  %v23378_v56 = vpop.f32.mrf.mxu1 }
 0x38a   : > { %v18395_v59 = vpop.f32.mrf.mxu0  ;;  %v18476_v63 = vpop.f32.mrf.mxu1 }
 0x38e   : > { %v26614_v40 = vpop.f32.mrf.mxu0  ;;  %v26616_v50 = vpop.f32.mrf.mxu1 }
 0x390   : > { %v26618_v62 = vpop.f32.mrf.mxu0  ;;  %v26620_v21 = vpop.f32.mrf.mxu1 }
 0x394   : > { %v26622_v32 = vpop.f32.mrf.mxu0  ;;  %v26624_v22 = vpop.f32.mrf.mxu1 }
 0x396   : > { %v26626_v9 = vpop.f32.mrf.mxu0  ;;  %v26628_v12 = vpop.f32.mrf.mxu1 }
 0x397   : > { %27035 = vst [vmem:[#allocation22_spill] sm:$0xff] %v26628_v12  ;;  %v19134_v12 = vadd.f32 %v23357_v31, %v18111_v11  ;;  %v19139_v31 = vadd.f32 %v18476_v63, %v18116_v44  ;;  %v18118_v63 = vadd.f32 %v26586_v53, %v26550_v36 }
 0x39a   : > { %v26630_v60 = vpop.f32.mrf.mxu0  ;;  %v26632_v2 = vpop.f32.mrf.mxu1 }
 0x39b   : > { %27036 = vst [vmem:[#allocation23_spill] sm:$0xff] %v26630_v60  ;;  %27037 = vst [vmem:[#allocation24_spill] sm:$0xff] %v26632_v2  ;;  %v18110_v60 = vadd.f32 %v17210_v19, %v26534_v39  ;;  %v18112_v2 = vadd.f32 %v17291_v51, %v26536_v3  ;;  %v18117_v3 = vadd.f32 %v23294_v24, %v26540_v16 }
 0x39c   : > { %v26634_v5 = vpop.f32.mrf.mxu0  ;;  %v26636_v6 = vpop.f32.mrf.mxu1  ;;  %v18114_v51 = vadd.f32 %v26578_v18, %v26542_v4 }
 0x39d   : > { %27038 = vst [vmem:[#allocation25_spill] sm:$0xff] %v26634_v5  ;;  %27039 = vst [vmem:[#allocation26_spill] sm:$0xff] %v26636_v6  ;;  %v19136_v5 = vadd.f32 %v23364_v42, %v18113_v43  ;;  %v19135_v54 = vadd.f32 %v18314_v57, %v18112_v2  ;;  %v19140_v2 = vadd.f32 %v23378_v56, %v18117_v3 }
 0x39e   : > { %v19137_v16 = vadd.f32 %v18395_v59, %v18114_v51 }
 0x3a0   : > { %v26638_v26 = vpop.f32.mrf.mxu0  ;;  %v26640_v20 = vpop.f32.mrf.mxu1 }
 0x3a1   : > { %27040 = vst [vmem:[#allocation27_spill] sm:$0xff] %v26638_v26  ;;  %27041 = vst [vmem:[#allocation30_spill] sm:$0xff] %v26640_v20  ;;  %v26653_v26 = vld [vmem:[%s26854_s4] ss:$0 sm:$0xff]  ;;  %v19133_v20 = vadd.f32 %v18233_v34, %v18110_v60 }
 0x3a2   : > { %v26642_v37 = vpop.f32.mrf.mxu0  ;;  %v26645_v23 = vpop.f32.mrf.mxu1 }
 0x3a3   : > { %27042 = vst [vmem:[#allocation31_spill] sm:$0xff] %v26642_v37  ;;  %27043 = vst [vmem:[#allocation32_spill] sm:$0xff] %v26645_v23 }
 0x3a6   : > { %v23441_v58 = vpop.f32.mrf.mxu0  ;;  %v23448_v6 = vpop.f32.mrf.mxu1 }
 0x3a7   : > { %v20157_v37 = vadd.f32 %v23441_v58, %v19134_v12  ;;  %v20159_v61 = vadd.f32 %v23448_v6, %v19136_v5  ;;  %v19138_v58 = vadd.f32 %v23371_v55, %v18115_v10  ;;  %v18121_v55 = vadd.f32 %v26584_v46, %v26548_v49 }
 0x3a8   : > { %v19256_v23 = vpop.f32.mrf.mxu0  ;;  %v19337_v27 = vpop.f32.mrf.mxu1  ;;  %v19142_v12 = vadd.f32 %v26614_v40, %v18119_v52  ;;  %v18123_v40 = vadd.f32 %v26590_v15, %v26554_v47 }
 0x3a9   : > { %v20188_v39 = vadd.f32 %v26653_v26, %v20157_v37  ;;  %v20156_v11 = vadd.f32 %v19256_v23, %v19133_v20  ;;  %v20190_v43 = vadd.f32 %v26653_v26, %v20159_v61  ;;  %v20158_v19 = vadd.f32 %v19337_v27, %v19135_v54 }
 0x3aa   : > { %v18120_v54 = vadd.f32 %v26588_v0, %v26552_v41  ;;  %v19144_v61 = vadd.f32 %v26616_v50, %v18121_v55 }
 0x3ab   : > { %v20212_v60 = vmax.f32 %v20188_v39, 0.0  ;;  %v20187_v6 = vadd.f32 %v26653_v26, %v20156_v11  ;;  %v20214_v35 = vmax.f32 %v20190_v43, 0.0  ;;  %v20189_v20 = vadd.f32 %v26653_v26, %v20158_v19 }
 0x3ac   : > { %v23455_v23 = vpop.f32.mrf.mxu0  ;;  %v23462_v5 = vpop.f32.mrf.mxu1  ;;  %v19141_v39 = vadd.f32 %v26618_v62, %v18118_v63  ;;  %v19143_v27 = vadd.f32 %v26620_v21, %v18120_v54  ;;  %v18125_v43 = vadd.f32 %v26592_v1, %v26556_v29  ;;  %v18122_v62 = vadd.f32 %v26594_v33, %v26558_v17  ;;  %v27050_v63 = vld [vmem:[#allocation13_spill] sm:$0xff] }
 0x3ad   : > { %20237 = vst.msk [vmem:[#allocation3 + $0x8] sm:$0xf] %vm20236_vm4, %v20212_v60  ;;  %v20211_v24 = vmax.f32 %v20187_v6, 0.0  ;;  %v20161_v37 = vadd.f32 %v23455_v23, %v19138_v58  ;;  %20239 = vst.msk [vmem:[#allocation3 + $0x18] sm:$0xf] %vm20236_vm4, %v20214_v35  ;;  %v20213_v4 = vmax.f32 %v20189_v20, 0.0  ;;  %v20163_v18 = vadd.f32 %v23462_v5, %v19140_v2 }
 0x3ae   : > { %v19418_v42 = vpop.f32.mrf.mxu0  ;;  %v19499_v57 = vpop.f32.mrf.mxu1  ;;  %v18124_v21 = vadd.f32 %v26596_v25, %v26560_v45  ;;  %v18127_v17 = vadd.f32 %v26598_v13, %v26562_v7  ;;  %v19146_v1 = vadd.f32 %v26622_v32, %v18123_v40  ;;  %v19148_v35 = vadd.f32 %v26624_v22, %v18125_v43  ;;  %v27044_v22 = vld [vmem:[#allocation16_spill] sm:$0xff]  ;;  %v27045_v5 = vld [vmem:[#allocation22_spill] sm:$0xff] }
 0x3af   : > { %20235 = vst.msk [vmem:[#allocation3] sm:$0xff] %vm10990_vm3, %v20211_v24  ;;  %v20192_v38 = vadd.f32 %v26653_v26, %v20161_v37  ;;  %v20160_v34 = vadd.f32 %v19418_v42, %v19137_v16  ;;  %20238 = vst.msk [vmem:[#allocation3 + $0x10] sm:$0xff] %vm10990_vm3, %v20213_v4  ;;  %v20194_v56 = vadd.f32 %v26653_v26, %v20163_v18  ;;  %v27046_v42 = vld [vmem:[#allocation11_spill] sm:$0xff] }
 0x3b0   : > { %v20162_v59 = vadd.f32 %v19499_v57, %v19139_v31  ;;  %v18129_v16 = vadd.f32 %v26600_v8, %v26564_v48  ;;  %v19145_v7 = vadd.f32 %v26626_v9, %v18122_v62  ;;  %v18126_v37 = vadd.f32 %v27044_v22, %v26566_v30  ;;  %v27047_v9 = vld [vmem:[#allocation17_spill] sm:$0xff] }
 0x3b1   : > { %v20216_v28 = vmax.f32 %v20192_v38, 0.0  ;;  %v20191_v14 = vadd.f32 %v26653_v26, %v20160_v34  ;;  %v20218_v10 = vmax.f32 %v20194_v56, 0.0  ;;  %v19147_v31 = vadd.f32 %v27045_v5, %v18124_v21  ;;  %v27048_v38 = vld [vmem:[#allocation12_spill] sm:$0xff]  ;;  %v27049_v34 = vld [vmem:[#allocation18_spill] sm:$0xff] }
 0x3b2   : > { %v20193_v49 = vadd.f32 %v26653_v26, %v20162_v59  ;;  %v23469_v46 = vpop.f32.mrf.mxu0  ;;  %v23476_v53 = vpop.f32.mrf.mxu1  ;;  %v18128_v52 = vadd.f32 %v27047_v9, %v27046_v42  ;;  %v18131_v57 = vadd.f32 %v27049_v34, %v27048_v38  ;;  %v27062_v34 = vld [vmem:[#allocation31_spill] sm:$0xff] }
 0x3b3   : > { %20241 = vst.msk [vmem:[#allocation3 + $0x28] sm:$0xf] %vm20236_vm4, %v20216_v28  ;;  %v20215_v11 = vmax.f32 %v20191_v14, 0.0  ;;  %v20165_v36 = vadd.f32 %v23469_v46, %v19142_v12  ;;  %20243 = vst.msk [vmem:[#allocation3 + $0x38] sm:$0xf] %vm20236_vm4, %v20218_v10  ;;  %v20167_v0 = vadd.f32 %v23476_v53, %v19144_v61  ;;  %v27051_v12 = vld [vmem:[#allocation19_spill] sm:$0xff] }
 0x3b4   : > { %v20261_v3 = vld [vmem:[#allocation3 + $0x8] sm:$0xf]  ;;  %v20217_v41 = vmax.f32 %v20193_v49, 0.0  ;;  %v19580_v50 = vpop.f32.mrf.mxu0  ;;  %v20264_v19 = vld [vmem:[#allocation3 + $0x18] sm:$0xf]  ;;  %v19661_v15 = vpop.f32.mrf.mxu1  ;;  %v18133_v28 = vadd.f32 %v27051_v12, %v27050_v63 }
 0x3b5   : > { %20240 = vst.msk [vmem:[#allocation3 + $0x20] sm:$0xff] %vm10990_vm3, %v20215_v11  ;;  %v20196_v51 = vadd.f32 %v26653_v26, %v20165_v36  ;;  %v20164_v47 = vadd.f32 %v19580_v50, %v19141_v39  ;;  %v20266_v58 = vmax.f32 %v20261_v3, %v20264_v19  ;;  %v20198_v6 = vadd.f32 %v26653_v26, %v20167_v0  ;;  %v27052_v49 = vld [vmem:[#allocation14_spill] sm:$0xff]  ;;  %v27053_v46 = vld [vmem:[#allocation20_spill] sm:$0xff]  ;;  %v27054_v11 = vld [vmem:[#allocation23_spill] sm:$0xff] }
 0x3b6   : > { %v20260_v60 = vld [vmem:[#allocation3] sm:$0xff]  ;;  %20242 = vst.msk [vmem:[#allocation3 + $0x30] sm:$0xff] %vm10990_vm3, %v20217_v41  ;;  %v20166_v29 = vadd.f32 %v19661_v15, %v19143_v27  ;;  %v20263_v33 = vld [vmem:[#allocation3 + $0x10] sm:$0xff]  ;;  %v18130_v39 = vadd.f32 %v27053_v46, %v27052_v49  ;;  %v19150_v36 = vadd.f32 %v27054_v11, %v18127_v17  ;;  %v27055_v3 = vld [vmem:[#allocation24_spill] sm:$0xff] }
 0x3b7   : > { %v20220_v44 = vmax.f32 %v20196_v51, 0.0  ;;  %v20195_v2 = vadd.f32 %v26653_v26, %v20164_v47  ;;  %20268 = vst.msk [vmem:[#allocation4 + $0x8] sm:$0xf] %vm20236_vm4, %v20266_v58  ;;  %v20265_v45 = vmax.f32 %v20260_v60, %v20263_v33  ;;  %v20222_v25 = vmax.f32 %v20198_v6, 0.0  ;;  %v27056_v19 = vld [vmem:[#allocation15_spill] sm:$0xff]  ;;  %v27057_v51 = vld [vmem:[#allocation21_spill] sm:$0xff] }
 0x3b8   : > { %v20197_v20 = vadd.f32 %v26653_v26, %v20166_v29  ;;  %v23483_v23 = vpop.f32.mrf.mxu0  ;;  %v23490_v24 = vpop.f32.mrf.mxu1  ;;  %v19152_v41 = vadd.f32 %v27055_v3, %v18129_v16  ;;  %v18132_v47 = vadd.f32 %v27057_v51, %v27056_v19  ;;  %v27058_v15 = vld [vmem:[#allocation25_spill] sm:$0xff]  ;;  %v27059_v58 = vld [vmem:[#allocation26_spill] sm:$0xff]  ;;  %v27060_v16 = vld [vmem:[#allocation27_spill] sm:$0xff] }
 0x3b9   : > { %20245 = vst.msk [vmem:[#allocation3 + $0x48] sm:$0xf] %vm20236_vm4, %v20220_v44  ;;  %v20219_v13 = vmax.f32 %v20195_v2, 0.0  ;;  %v20169_v32 = vadd.f32 %v23483_v23, %v19146_v1  ;;  %20247 = vst.msk [vmem:[#allocation3 + $0x58] sm:$0xf] %vm20236_vm4, %v20222_v25  ;;  %v20171_v48 = vadd.f32 %v23490_v24, %v19148_v35  ;;  %v19149_v21 = vadd.f32 %v27058_v15, %v18126_v37  ;;  %v27063_v11 = vld [vmem:[#allocation32_spill] sm:$0xff] }
 0x3ba   : > { %20267 = vst.msk [vmem:[#allocation4] sm:$0xff] %vm10990_vm3, %v20265_v45  ;;  %v20271_v4 = vld [vmem:[#allocation3 + $0x28] sm:$0xf]  ;;  %v20221_v18 = vmax.f32 %v20197_v20, 0.0  ;;  %v19742_v8 = vpop.f32.mrf.mxu0  ;;  %v20274_v55 = vld [vmem:[#allocation3 + $0x38] sm:$0xf]  ;;  %v19823_v59 = vpop.f32.mrf.mxu1  ;;  %v19151_v60 = vadd.f32 %v27059_v58, %v18128_v52 }
 0x3bb   : > { %20244 = vst.msk [vmem:[#allocation3 + $0x40] sm:$0xff] %vm10990_vm3, %v20219_v13  ;;  %v20200_v30 = vadd.f32 %v26653_v26, %v20169_v32  ;;  %v20168_v56 = vadd.f32 %v19742_v8, %v19145_v7  ;;  %v20276_v14 = vmax.f32 %v20271_v4, %v20274_v55  ;;  %v20202_v61 = vadd.f32 %v26653_v26, %v20171_v48  ;;  %v27061_v4 = vld [vmem:[#allocation30_spill] sm:$0xff] }
 0x3bc   : > { %v20270_v54 = vld [vmem:[#allocation3 + $0x20] sm:$0xff]  ;;  %20246 = vst.msk [vmem:[#allocation3 + $0x50] sm:$0xff] %vm10990_vm3, %v20221_v18  ;;  %v20170_v10 = vadd.f32 %v19823_v59, %v19147_v31  ;;  %v19154_v7 = vadd.f32 %v27060_v16, %v18131_v57  ;;  %v19156_v18 = vadd.f32 %v27061_v4, %v18133_v28  ;;  %v19153_v57 = vadd.f32 %v27062_v34, %v18130_v39 }
 0x3bd   : > { %v20273_v53 = vld [vmem:[#allocation3 + $0x30] sm:$0xff]  ;;  %v20224_v40 = vmax.f32 %v20200_v30, 0.0  ;;  %v20199_v27 = vadd.f32 %v26653_v26, %v20168_v56  ;;  %20279 = vst.msk [vmem:[#allocation4 + $0x18] sm:$0xf] %vm20236_vm4, %v20276_v14  ;;  %v20226_v50 = vmax.f32 %v20202_v61, 0.0 }
 0x3be   : > { %v20275_v0 = vmax.f32 %v20270_v54, %v20273_v53  ;;  %v20201_v43 = vadd.f32 %v26653_v26, %v20170_v10  ;;  %v23497_v62 = vpop.f32.mrf.mxu0  ;;  %v20421_v6 = vld [vmem:[#allocation4 + $0x8] sm:$0x1]  ;;  %v20427_v29 = vld [vmem:[#allocation4 + $0x9] sm:$0x1]  ;;  %v20445_v17 = vld [vmem:[#allocation4 + $0xa] sm:$0x1]  ;;  %v23504_v33 = vpop.f32.mrf.mxu1 }
 0x3bf   : > { %20249 = vst.msk [vmem:[#allocation3 + $0x68] sm:$0xf] %vm20236_vm4, %v20224_v40  ;;  %v20173_v1 = vadd.f32 %v23497_v62, %v19150_v36  ;;  %v20433_v44 = vmax.f32 %v20421_v6, %v20427_v29  ;;  %v20451_v2 = vld [vmem:[#allocation4 + $0xb] sm:$0x1]  ;;  %20251 = vst.msk [vmem:[#allocation3 + $0x78] sm:$0xf] %vm20236_vm4, %v20226_v50  ;;  %v20175_v20 = vadd.f32 %v23504_v33, %v19152_v41 }
 0x3c0   : > { %20278 = vst.msk [vmem:[#allocation4 + $0x10] sm:$0xff] %vm10990_vm3, %v20275_v0  ;;  %v20282_v35 = vld [vmem:[#allocation3 + $0x48] sm:$0xf]  ;;  %v20223_v45 = vmax.f32 %v20199_v27, 0.0  ;;  %v20225_v25 = vmax.f32 %v20201_v43, 0.0  ;;  %v19904_v23 = vpop.f32.mrf.mxu0  ;;  %v20457_v13 = vmax.f32 %v20445_v17, %v20451_v2  ;;  %v19985_v31 = vpop.f32.mrf.mxu1  ;;  %v19155_v36 = vadd.f32 %v27063_v11, %v18132_v47 }
 0x3c1   : > { %v20324_v32 = vld [vmem:[#allocation4] sm:$0x1]  ;;  %v20330_v24 = vld [vmem:[#allocation4 + $0x1] sm:$0x1]  ;;  %v20349_v22 = vld [vmem:[#allocation4 + $0x2] sm:$0x1]  ;;  %v20204_v37 = vadd.f32 %v26653_v26, %v20173_v1  ;;  %v20172_v5 = vadd.f32 %v19904_v23, %v19149_v21  ;;  %v20206_v52 = vadd.f32 %v26653_v26, %v20175_v20  ;;  %v20174_v38 = vadd.f32 %v19985_v31, %v19151_v60 }
 0x3c2   : > { %20439 = vst.msk [vmem:[%s26740_s13 + $0x4] sm:$0x1] %vm20342_vm5, %v20433_v44  ;;  %v20336_v48 = vmax.f32 %v20324_v32, %v20330_v24  ;;  %v20355_v8 = vld [vmem:[#allocation4 + $0x3] sm:$0x1]  ;;  %v20373_v42 = vld [vmem:[#allocation4 + $0x4] sm:$0x1] }
 0x3c3   : > { %v20379_v9 = vld [vmem:[#allocation4 + $0x5] sm:$0x1]  ;;  %20248 = vst.msk [vmem:[#allocation3 + $0x60] sm:$0xff] %vm10990_vm3, %v20223_v45  ;;  %20250 = vst.msk [vmem:[#allocation3 + $0x70] sm:$0xff] %vm10990_vm3, %v20225_v25  ;;  %v20361_v55 = vmax.f32 %v20349_v22, %v20355_v8  ;;  %v20397_v56 = vld [vmem:[#allocation4 + $0x6] sm:$0x1]  ;;  %v20203_v12 = vadd.f32 %v26653_v26, %v20172_v5  ;;  %v23511_v28 = vpop.f32.mrf.mxu0  ;;  %v23518_v39 = vpop.f32.mrf.mxu1  ;;  %v20205_v47 = vadd.f32 %v26653_v26, %v20174_v38 }
 0x3c4   : > { %20463 = vst.msk [vmem:[%s26740_s13 + $0x5] sm:$0x1] %vm20342_vm5, %v20457_v13  ;;  %v20385_v30 = vmax.f32 %v20373_v42, %v20379_v9  ;;  %v20403_v59 = vld [vmem:[#allocation4 + $0x7] sm:$0x1]  ;;  %v20285_v63 = vld [vmem:[#allocation3 + $0x58] sm:$0xf]  ;;  %v20177_v41 = vadd.f32 %v23511_v28, %v19154_v7  ;;  %v20179_v0 = vadd.f32 %v23518_v39, %v19156_v18 }
 0x3c5   : > { %20343 = vst.msk [vmem:[%s26740_s13] sm:$0x1] %vm20342_vm5, %v20336_v48  ;;  %v20409_v14 = vmax.f32 %v20397_v56, %v20403_v59  ;;  %v20287_v54 = vmax.f32 %v20282_v35, %v20285_v63  ;;  %v20281_v61 = vld [vmem:[#allocation3 + $0x40] sm:$0xff]  ;;  %v20284_v10 = vld [vmem:[#allocation3 + $0x50] sm:$0xff]  ;;  %v20228_v49 = vmax.f32 %v20204_v37, 0.0  ;;  %v20230_v46 = vmax.f32 %v20206_v52, 0.0  ;;  %v20066_v50 = vpop.f32.mrf.mxu0  ;;  %v20147_v21 = vpop.f32.mrf.mxu1 }
 0x3c6   : > { %20367 = vst.msk [vmem:[%s26740_s13 + $0x1] sm:$0x1] %vm20342_vm5, %v20361_v55  ;;  %20391 = vst.msk [vmem:[%s26740_s13 + $0x2] sm:$0x1] %vm20342_vm5, %v20385_v30  ;;  %v20422_v53 = vld [vmem:[#allocation4 + $0x18] sm:$0x1]  ;;  %v20286_v3 = vmax.f32 %v20281_v61, %v20284_v10  ;;  %v20176_v15 = vadd.f32 %v20066_v50, %v19153_v57  ;;  %v20208_v17 = vadd.f32 %v26653_v26, %v20177_v41 }
 0x3c7   : > { %v20428_v40 = vld [vmem:[#allocation4 + $0x19] sm:$0x1]  ;;  %v20446_v27 = vld [vmem:[#allocation4 + $0x1a] sm:$0x1]  ;;  %20415 = vst.msk [vmem:[%s26740_s13 + $0x3] sm:$0x1] %vm20342_vm5, %v20409_v14  ;;  %v20210_v1 = vadd.f32 %v26653_v26, %v20179_v0  ;;  %v20178_v33 = vadd.f32 %v20147_v21, %v19155_v36 }
 0x3c8   : > { %v20434_v43 = vmax.f32 %v20422_v53, %v20428_v40  ;;  %v20452_v62 = vld [vmem:[#allocation4 + $0x1b] sm:$0x1]  ;;  %20290 = vst.msk [vmem:[#allocation4 + $0x28] sm:$0xf] %vm20236_vm4, %v20287_v54  ;;  %v20293_v19 = vld [vmem:[#allocation3 + $0x68] sm:$0xf]  ;;  %v20207_v25 = vadd.f32 %v26653_v26, %v20176_v15 }
 0x3c9   : > { %20253 = vst.msk [vmem:[#allocation3 + $0x88] sm:$0xf] %vm20236_vm4, %v20228_v49  ;;  %20255 = vst.msk [vmem:[#allocation3 + $0x98] sm:$0xf] %vm20236_vm4, %v20230_v46  ;;  %v20227_v51 = vmax.f32 %v20203_v12, 0.0  ;;  %v20458_v58 = vmax.f32 %v20446_v27, %v20452_v62  ;;  %v20209_v32 = vadd.f32 %v26653_v26, %v20178_v33  ;;  %v20229_v31 = vmax.f32 %v20205_v47, 0.0 }
 0x3ca   : > { %v20325_v60 = vld [vmem:[#allocation4 + $0x10] sm:$0x1]  ;;  %v20331_v6 = vld [vmem:[#allocation4 + $0x11] sm:$0x1]  ;;  %v20350_v29 = vld [vmem:[#allocation4 + $0x12] sm:$0x1] }
 0x3cb   : > { %20289 = vst.msk [vmem:[#allocation4 + $0x20] sm:$0xff] %vm10990_vm3, %v20286_v3  ;;  %v20337_v44 = vmax.f32 %v20325_v60, %v20331_v6  ;;  %v20356_v2 = vld [vmem:[#allocation4 + $0x13] sm:$0x1]  ;;  %v20374_v35 = vld [vmem:[#allocation4 + $0x14] sm:$0x1]  ;;  %20252 = vst.msk [vmem:[#allocation3 + $0x80] sm:$0xff] %vm10990_vm3, %v20227_v51 }
 0x3cc   : > { %20440 = vst.msk [vmem:[%s26740_s13 + $0xc] sm:$0x1] %vm20342_vm5, %v20434_v43  ;;  %v20380_v45 = vld [vmem:[#allocation4 + $0x15] sm:$0x1]  ;;  %20464 = vst.msk [vmem:[%s26740_s13 + $0xd] sm:$0x1] %vm20342_vm5, %v20458_v58  ;;  %v20362_v20 = vmax.f32 %v20350_v29, %v20356_v2 }
 0x3cd   : > { %v20386_v23 = vmax.f32 %v20374_v35, %v20380_v45  ;;  %v20398_v16 = vld [vmem:[#allocation4 + $0x16] sm:$0x1]  ;;  %v20404_v7 = vld [vmem:[#allocation4 + $0x17] sm:$0x1]  ;;  %v20296_v13 = vld [vmem:[#allocation3 + $0x78] sm:$0xf] }
 0x3ce   : > { %20344 = vst.msk [vmem:[%s26740_s13 + $0x8] sm:$0x1] %vm20342_vm5, %v20337_v44  ;;  %v20410_v24 = vmax.f32 %v20398_v16, %v20404_v7  ;;  %v20298_v22 = vmax.f32 %v20293_v19, %v20296_v13  ;;  %v20292_v37 = vld [vmem:[#allocation3 + $0x60] sm:$0xff]  ;;  %v20295_v5 = vld [vmem:[#allocation3 + $0x70] sm:$0xff]  ;;  %v20232_v4 = vmax.f32 %v20208_v17, 0.0  ;;  %v20234_v48 = vmax.f32 %v20210_v1, 0.0 }
 0x3cf   : > { %20368 = vst.msk [vmem:[%s26740_s13 + $0x9] sm:$0x1] %vm20342_vm5, %v20362_v20  ;;  %20392 = vst.msk [vmem:[%s26740_s13 + $0xa] sm:$0x1] %vm20342_vm5, %v20386_v23  ;;  %v20297_v18 = vmax.f32 %v20292_v37, %v20295_v5  ;;  %v20231_v8 = vmax.f32 %v20207_v25, 0.0  ;;  %v20233_v42 = vmax.f32 %v20209_v32, 0.0 }
 0x3d0   : > { %20416 = vst.msk [vmem:[%s26740_s13 + $0xb] sm:$0x1] %vm20342_vm5, %v20410_v24  ;;  %v20423_v26 = vld [vmem:[#allocation4 + $0x28] sm:$0x1]  ;;  %v20429_v9 = vld [vmem:[#allocation4 + $0x29] sm:$0x1] }
 0x3d1   : > { %20301 = vst.msk [vmem:[#allocation4 + $0x38] sm:$0xf] %vm20236_vm4, %v20298_v22  ;;  %20257 = vst.msk [vmem:[#allocation3 + $0xa8] sm:$0xf] %vm20236_vm4, %v20232_v4  ;;  %v20447_v52 = vld [vmem:[#allocation4 + $0x2a] sm:$0x1]  ;;  %v20435_v38 = vmax.f32 %v20423_v26, %v20429_v9 }
 0x3d2   : > { %20254 = vst.msk [vmem:[#allocation3 + $0x90] sm:$0xff] %vm10990_vm3, %v20229_v31  ;;  %20300 = vst.msk [vmem:[#allocation4 + $0x30] sm:$0xff] %vm10990_vm3, %v20297_v18  ;;  %v20453_v34 = vld [vmem:[#allocation4 + $0x2b] sm:$0x1]  ;;  %v20326_v57 = vld [vmem:[#allocation4 + $0x20] sm:$0x1] }
 0x3d3   : > { %20259 = vst.msk [vmem:[#allocation3 + $0xb8] sm:$0xf] %vm20236_vm4, %v20234_v48  ;;  %v20332_v55 = vld [vmem:[#allocation4 + $0x21] sm:$0x1]  ;;  %v20459_v30 = vmax.f32 %v20447_v52, %v20453_v34  ;;  %v20351_v59 = vld [vmem:[#allocation4 + $0x22] sm:$0x1] }
 0x3d4   : > { %20256 = vst.msk [vmem:[#allocation3 + $0xa0] sm:$0xff] %vm10990_vm3, %v20231_v8  ;;  %20258 = vst.msk [vmem:[#allocation3 + $0xb0] sm:$0xff] %vm10990_vm3, %v20233_v42  ;;  %v20338_v56 = vmax.f32 %v20326_v57, %v20332_v55  ;;  %v20357_v63 = vld [vmem:[#allocation4 + $0x23] sm:$0x1]  ;;  %v20375_v12 = vld [vmem:[#allocation4 + $0x24] sm:$0x1] }
 0x3d5   : > { %20441 = vst.msk [vmem:[%s26740_s13 + $0x14] sm:$0x1] %vm20342_vm5, %v20435_v38  ;;  %v20363_v28 = vmax.f32 %v20351_v59, %v20357_v63  ;;  %v20381_v14 = vld [vmem:[#allocation4 + $0x25] sm:$0x1]  ;;  %v20399_v54 = vld [vmem:[#allocation4 + $0x26] sm:$0x1] }
 0x3d6   : > { %v20405_v61 = vld [vmem:[#allocation4 + $0x27] sm:$0x1]  ;;  %20465 = vst.msk [vmem:[%s26740_s13 + $0x15] sm:$0x1] %vm20342_vm5, %v20459_v30  ;;  %20345 = vst.msk [vmem:[%s26740_s13 + $0x10] sm:$0x1] %vm20342_vm5, %v20338_v56  ;;  %v20387_v10 = vmax.f32 %v20375_v12, %v20381_v14 }
 0x3d7   : > { %v20411_v49 = vmax.f32 %v20399_v54, %v20405_v61  ;;  %v20304_v46 = vld [vmem:[#allocation3 + $0x88] sm:$0xf]  ;;  %v20307_v39 = vld [vmem:[#allocation3 + $0x98] sm:$0xf]  ;;  %20369 = vst.msk [vmem:[%s26740_s13 + $0x11] sm:$0x1] %vm20342_vm5, %v20363_v28 }
 0x3d8   : > { %v20309_v11 = vmax.f32 %v20304_v46, %v20307_v39  ;;  %20393 = vst.msk [vmem:[%s26740_s13 + $0x12] sm:$0x1] %vm20342_vm5, %v20387_v10  ;;  %v20424_v36 = vld [vmem:[#allocation4 + $0x38] sm:$0x1]  ;;  %v20430_v53 = vld [vmem:[#allocation4 + $0x39] sm:$0x1] }
 0x3d9   : > { %20417 = vst.msk [vmem:[%s26740_s13 + $0x13] sm:$0x1] %vm20342_vm5, %v20411_v49  ;;  %v20448_v40 = vld [vmem:[#allocation4 + $0x3a] sm:$0x1]  ;;  %v20303_v27 = vld [vmem:[#allocation3 + $0x80] sm:$0xff]  ;;  %v20436_v3 = vmax.f32 %v20424_v36, %v20430_v53  ;;  %v20306_v17 = vld [vmem:[#allocation3 + $0x90] sm:$0xff] }
 0x3da   : > { %v20454_v41 = vld [vmem:[#allocation4 + $0x3b] sm:$0x1]  ;;  %v20327_v0 = vld [vmem:[#allocation4 + $0x30] sm:$0x1]  ;;  %v20333_v50 = vld [vmem:[#allocation4 + $0x31] sm:$0x1]  ;;  %v20308_v44 = vmax.f32 %v20303_v27, %v20306_v17 }
 0x3db   : > { %20312 = vst.msk [vmem:[#allocation4 + $0x48] sm:$0xf] %vm20236_vm4, %v20309_v11  ;;  %v20460_v43 = vmax.f32 %v20448_v40, %v20454_v41  ;;  %v20339_v62 = vmax.f32 %v20327_v0, %v20333_v50  ;;  %v20352_v19 = vld [vmem:[#allocation4 + $0x32] sm:$0x1]  ;;  %v20358_v51 = vld [vmem:[#allocation4 + $0x33] sm:$0x1] }
 0x3dc   : > { %v20376_v47 = vld [vmem:[#allocation4 + $0x34] sm:$0x1]  ;;  %20442 = vst.msk [vmem:[%s26740_s13 + $0x1c] sm:$0x1] %vm20342_vm5, %v20436_v3  ;;  %v20364_v15 = vmax.f32 %v20352_v19, %v20358_v51  ;;  %v20382_v21 = vld [vmem:[#allocation4 + $0x35] sm:$0x1] }
 0x3dd   : > { %v20400_v58 = vld [vmem:[#allocation4 + $0x36] sm:$0x1]  ;;  %v20406_v60 = vld [vmem:[#allocation4 + $0x37] sm:$0x1]  ;;  %20466 = vst.msk [vmem:[%s26740_s13 + $0x1d] sm:$0x1] %vm20342_vm5, %v20460_v43  ;;  %v20388_v6 = vmax.f32 %v20376_v47, %v20382_v21 }
 0x3de   : > { %20346 = vst.msk [vmem:[%s26740_s13 + $0x18] sm:$0x1] %vm20342_vm5, %v20339_v62  ;;  %v20412_v29 = vmax.f32 %v20400_v58, %v20406_v60  ;;  %v20315_v1 = vld [vmem:[#allocation3 + $0xa8] sm:$0xf]  ;;  %v20318_v33 = vld [vmem:[#allocation3 + $0xb8] sm:$0xf] }
 0x3df   : > { %20370 = vst.msk [vmem:[%s26740_s13 + $0x19] sm:$0x1] %vm20342_vm5, %v20364_v15  ;;  %v20320_v2 = vmax.f32 %v20315_v1, %v20318_v33  ;;  %v20314_v35 = vld [vmem:[#allocation3 + $0xa0] sm:$0xff]  ;;  %v20317_v45 = vld [vmem:[#allocation3 + $0xb0] sm:$0xff]  ;;  %20394 = vst.msk [vmem:[%s26740_s13 + $0x1a] sm:$0x1] %vm20342_vm5, %v20388_v6 }
 0x3e0   : > { %20418 = vst.msk [vmem:[%s26740_s13 + $0x1b] sm:$0x1] %vm20342_vm5, %v20412_v29  ;;  %v20319_v25 = vmax.f32 %v20314_v35, %v20317_v45 }
 0x3e1   : > { %20311 = vst.msk [vmem:[#allocation4 + $0x40] sm:$0xff] %vm10990_vm3, %v20308_v44 }
 0x3e2   : > { %20323 = vst.msk [vmem:[#allocation4 + $0x58] sm:$0xf] %vm20236_vm4, %v20320_v2  ;;  %v20425_v20 = vld [vmem:[#allocation4 + $0x48] sm:$0x1]  ;;  %v20431_v23 = vld [vmem:[#allocation4 + $0x49] sm:$0x1] }
 0x3e3   : > { %v20449_v16 = vld [vmem:[#allocation4 + $0x4a] sm:$0x1]  ;;  %20322 = vst.msk [vmem:[#allocation4 + $0x50] sm:$0xff] %vm10990_vm3, %v20319_v25  ;;  %v20437_v7 = vmax.f32 %v20425_v20, %v20431_v23  ;;  %v20455_v13 = vld [vmem:[#allocation4 + $0x4b] sm:$0x1] }
 0x3e4   : > { %v20461_v32 = vmax.f32 %v20449_v16, %v20455_v13 }
 0x3e5   : > { %20443 = vst.msk [vmem:[%s26740_s13 + $0x24] sm:$0x1] %vm20342_vm5, %v20437_v7 }
 0x3e6   : > { %20467 = vst.msk [vmem:[%s26740_s13 + $0x25] sm:$0x1] %vm20342_vm5, %v20461_v32 }
 0x3e8   : > { %v20328_v24 = vld [vmem:[#allocation4 + $0x40] sm:$0x1]  ;;  %v20334_v22 = vld [vmem:[#allocation4 + $0x41] sm:$0x1]  ;;  %v20353_v37 = vld [vmem:[#allocation4 + $0x42] sm:$0x1] }
 0x3e9   : > { %v20340_v5 = vmax.f32 %v20328_v24, %v20334_v22  ;;  %v20359_v31 = vld [vmem:[#allocation4 + $0x43] sm:$0x1]  ;;  %v20377_v4 = vld [vmem:[#allocation4 + $0x44] sm:$0x1]  ;;  %v20383_v18 = vld [vmem:[#allocation4 + $0x45] sm:$0x1] }
 0x3ea   : > { %v20365_v48 = vmax.f32 %v20353_v37, %v20359_v31  ;;  %v20389_v8 = vmax.f32 %v20377_v4, %v20383_v18  ;;  %v20401_v42 = vld [vmem:[#allocation4 + $0x46] sm:$0x1]  ;;  %v20407_v26 = vld [vmem:[#allocation4 + $0x47] sm:$0x1]  ;;  %v20426_v9 = vld [vmem:[#allocation4 + $0x58] sm:$0x1] }
 0x3eb   : > { %20347 = vst.msk [vmem:[%s26740_s13 + $0x20] sm:$0x1] %vm20342_vm5, %v20340_v5  ;;  %v20413_v52 = vmax.f32 %v20401_v42, %v20407_v26  ;;  %v20432_v38 = vld [vmem:[#allocation4 + $0x59] sm:$0x1]  ;;  %v20450_v34 = vld [vmem:[#allocation4 + $0x5a] sm:$0x1] }
 0x3ec   : > { %v20456_v57 = vld [vmem:[#allocation4 + $0x5b] sm:$0x1]  ;;  %20371 = vst.msk [vmem:[%s26740_s13 + $0x21] sm:$0x1] %vm20342_vm5, %v20365_v48  ;;  %20395 = vst.msk [vmem:[%s26740_s13 + $0x22] sm:$0x1] %vm20342_vm5, %v20389_v8  ;;  %v20438_v55 = vmax.f32 %v20426_v9, %v20432_v38 }
 0x3ed   : > { %v20462_v30 = vmax.f32 %v20450_v34, %v20456_v57  ;;  %v20329_v56 = vld [vmem:[#allocation4 + $0x50] sm:$0x1]  ;;  %v20335_v59 = vld [vmem:[#allocation4 + $0x51] sm:$0x1]  ;;  %v20354_v63 = vld [vmem:[#allocation4 + $0x52] sm:$0x1] }
 0x3ee   : > { %20419 = vst.msk [vmem:[%s26740_s13 + $0x23] sm:$0x1] %vm20342_vm5, %v20413_v52  ;;  %v20341_v12 = vmax.f32 %v20329_v56, %v20335_v59  ;;  %v20360_v28 = vld [vmem:[#allocation4 + $0x53] sm:$0x1]  ;;  %v20378_v14 = vld [vmem:[#allocation4 + $0x54] sm:$0x1] }
 0x3ef   : > { %v20384_v54 = vld [vmem:[#allocation4 + $0x55] sm:$0x1]  ;;  %20444 = vst.msk [vmem:[%s26740_s13 + $0x2c] sm:$0x1] %vm20342_vm5, %v20438_v55  ;;  %20468 = vst.msk [vmem:[%s26740_s13 + $0x2d] sm:$0x1] %vm20342_vm5, %v20462_v30  ;;  %v20366_v61 = vmax.f32 %v20354_v63, %v20360_v28 }
 0x3f0   : > { %v20390_v10 = vmax.f32 %v20378_v14, %v20384_v54  ;;  %v20402_v49 = vld [vmem:[#allocation4 + $0x56] sm:$0x1]  ;;  %v20408_v46 = vld [vmem:[#allocation4 + $0x57] sm:$0x1]  ;;  %20348 = vst.msk [vmem:[%s26740_s13 + $0x28] sm:$0x1] %vm20342_vm5, %v20341_v12 }
 0x3f1   : > { %v20414_v39 = vmax.f32 %v20402_v49, %v20408_v46  ;;  %20372 = vst.msk [vmem:[%s26740_s13 + $0x29] sm:$0x1] %vm20342_vm5, %v20366_v61 }
 0x3f2   : > { %20396 = vst.msk [vmem:[%s26740_s13 + $0x2a] sm:$0x1] %vm20342_vm5, %v20390_v10 }
 0x3f3   : > { %20420 = vst.msk [vmem:[%s26740_s13 + $0x2b] sm:$0x1] %vm20342_vm5, %v20414_v39 }
 0x3f4 PF: > { %s15_s18 = sadd.s32 1, %s23534_s18  }
 0x3f5   : > { %p12_p4 = scmp.ge.s32.totalorder %s15_s18, 4  }
 0x3f7   :  { %14 = sbr.rel (!%p12_p4) target bundleno = 1 (0x1), region = 106 }

</bundles_post_ra>
